<compile_context>
chip_gen: v5e
topology: v5e:2x2
jax: 0.10.0
libtpu: 0.0.40
codegen_flags: <defaults>
</compile_context>

<pallas_src>
import jax
import jax.numpy as jnp
from jax import lax
from jax.experimental import pallas as pl
from jax.experimental.pallas import tpu as pltpu

# ---- hyperparameters (small, consistent with WN.__init__) ----
N_IN = 4            # n_in_channels
N_MEL = 16          # n_mel_channels
N_LAYERS = 4
N_CHANNELS = 32     # must be even
KERNEL_SIZE = 3     # must be odd
SPK_DIM = 16        # speaker_embed_dim
HIDDEN = 256        # cond hidden_dim (hard-coded in the module)
N_SPEAKERS = 512
B = 2
T = 128             # sequence length per batch element (folded into lanes)

AUDIO_PAD = 8       # audio channels padded to one f32 sublane tile
COND_IN = N_MEL + SPK_DIM


# --------------------------- Pallas kernel ---------------------------------

def wn_kernel(xin_ref,
              start_w, start_b,
              layer_w, layer_b,
              rs_w, rs_b, rs_last_w, rs_last_b,
              end_w, end_b,
              end_ref, pre_ref):
    f32 = jnp.float32
    nc = N_CHANNELS
    lanes = xin_ref.shape[1]
    half = (KERNEL_SIZE - 1) // 2

    xin = xin_ref[...].astype(f32)          # (AUDIO_PAD + COND_IN, lanes)
    x8 = xin[:AUDIO_PAD]                    # (8, lanes), rows N_IN..7 are zero
    cond = xin[AUDIO_PAD:]                  # (COND_IN, lanes) raw conditioning

    # start 1x1 conv (start_w has zero columns for the padded rows)
    audio = jnp.dot(start_w[...], x8, preferred_element_type=f32) + start_b[...]

    # lane position within each length-T batch segment (hoisted; one iota only)
    tmod = lax.broadcasted_iota(jnp.int32, (nc, lanes), 1) % T

    output = jnp.zeros((nc, lanes), f32)
    for i in range(N_LAYERS):
        d = 2 ** i
        # Shifted copies of `audio` for the conv taps.  Roll runs on the XLU;
        # masking against the per-segment lane index zeroes both the "same"
        # padding region and any cross-batch bleed from the lane merge.
        taps = []
        for j in range(KERNEL_SIZE):
            s = (j - half) * d
            if s == 0:
                taps.append(audio)
            elif s < 0:
                taps.append(jnp.where(tmod >= -s,
                                      pltpu.roll(audio, -s, axis=1), 0.0))
            else:
                taps.append(jnp.where(tmod < T - s,
                                      pltpu.roll(audio, lanes - s, axis=1), 0.0))
        # fused dilated conv + per-layer slice of the collapsed cond matrix in
        # ONE K = 3*nc + COND_IN = 128 matmul; biases (in_b + folded cond bias)
        # pre-summed at pack time.
        stacked = jnp.concatenate(taps + [cond], axis=0)        # (128, lanes)
        z = jnp.dot(layer_w[i], stacked, preferred_element_type=f32) + layer_b[i]
        acts = jnp.tanh(z[:nc, :]) * jax.nn.sigmoid(z[nc:, :])

        if i < N_LAYERS - 1:
            # alpha (rezero) already folded into rs_w / rs_b
            rs = jnp.dot(rs_w[i], acts, preferred_element_type=f32) + rs_b[i]
            audio = audio + rs[:nc, :]
            output = output + rs[nc:, :]
        else:
            # last layer: real (nc, nc) weight, skip-only contribution
            rs = jnp.dot(rs_last_w[...], acts,
                         preferred_element_type=f32) + rs_last_b[...]
            output = output + rs

    pre_ref[...] = output
    end_ref[...] = jnp.dot(end_w[...], output,
                           preferred_element_type=f32) + end_b[...]


def wn_forward(xin_m, kparams):
    lanes = xin_m.shape[1]                  # whole batch in one program

    def full(a):
        # Grid-invariant weights; 1-step grid, so buffering depth is moot.
        nd = a.ndim
        return pl.BlockSpec(a.shape, lambda p, nd=nd: (0,) * nd)

    def stream(c):
        return pl.BlockSpec((c, lanes), lambda p: (0, p))

    in_specs = [stream(xin_m.shape[0])] + [full(w) for w in kparams]
    out_shape = (
        jax.ShapeDtypeStruct((2 * N_IN, lanes), jnp.float32),      # end (both chunks)
        jax.ShapeDtypeStruct((N_CHANNELS, lanes), jnp.float32),    # pre-end accumulator
    )
    out_specs = (stream(2 * N_IN), stream(N_CHANNELS))

    return pl.pallas_call(
        wn_kernel,
        out_shape=out_shape,
        grid=(1,),
        in_specs=in_specs,
        out_specs=out_specs,
        compiler_params=pltpu.CompilerParams(
            dimension_semantics=("arbitrary",)),
    )(xin_m, *kparams)


# ------------------------ parameter construction ---------------------------

def init_params(key):
    keys = iter(jax.random.split(key, 32))

    def w(shape, scale=0.1):
        return jax.random.normal(next(keys), shape, jnp.float32) * scale

    p = {}
    p['speaker_embed'] = w((N_SPEAKERS, SPK_DIM), 1.0) * 0.05   # .mul_(0.05)
    p['start_w'] = w((N_CHANNELS, N_IN))
    p['start_b'] = w((N_CHANNELS,), 0.05)
    p['c0_w'] = w((HIDDEN, COND_IN));                    p['c0_b'] = w((HIDDEN,), 0.05)
    p['c1_w'] = w((HIDDEN, HIDDEN), 0.05);               p['c1_b'] = w((HIDDEN,), 0.05)
    p['c2_w'] = w((2 * N_CHANNELS * N_LAYERS, HIDDEN), 0.05)
    p['c2_b'] = w((2 * N_CHANNELS * N_LAYERS,), 0.05)
    p['in_w'] = [w((2 * N_CHANNELS, N_CHANNELS, KERNEL_SIZE)) for _ in range(N_LAYERS)]
    p['in_b'] = [w((2 * N_CHANNELS,), 0.05) for _ in range(N_LAYERS)]
    p['rs_w'], p['rs_b'] = [], []
    for i in range(N_LAYERS):
        out_c = 2 * N_CHANNELS if i < N_LAYERS - 1 else N_CHANNELS
        p['rs_w'].append(w((out_c, N_CHANNELS)))
        p['rs_b'].append(w((out_c,), 0.05))
    p['alpha'] = jax.random.uniform(next(keys), (N_LAYERS,)) * 0.02 + 0.09  # rezero
    p['end_w'] = jnp.zeros((2 * N_IN, N_CHANNELS), jnp.float32)   # zeroed in __init__
    p['end_b'] = jnp.zeros((2 * N_IN,), jnp.float32)
    return p


def pack_kernel_params(p):
    col = lambda v: v[:, None]                       # bias -> (C, 1)
    f32 = jnp.float32
    nc = N_CHANNELS

    # start conv: pad input-channel dim to AUDIO_PAD with zero columns so the
    # in-kernel sublane split of the combined input is tile aligned.
    start_w = jnp.zeros((nc, AUDIO_PAD), f32).at[:, :N_IN].set(p['start_w'])

    # Collapse the purely-linear cond stack c0 -> c1 -> c2 (exact algebra).
    w_cond = p['c2_w'] @ p['c1_w'] @ p['c0_w']                        # (2*nc*L, COND_IN)
    b_cond = p['c2_w'] @ (p['c1_w'] @ p['c0_b'] + p['c1_b']) + p['c2_b']

    # Per-layer fused weight: [tap0 | tap1 | tap2 | A_i] with K = 3*nc + COND_IN
    # = 128; bias = in_b[i] + (collapsed cond bias slice).
    layer_w, layer_b = [], []
    for i in range(N_LAYERS):
        taps_w = jnp.concatenate([p['in_w'][i][:, :, j]
                                  for j in range(KERNEL_SIZE)], axis=1)   # (2nc, 3nc)
        a_i = w_cond[i * 2 * nc:(i + 1) * 2 * nc]                          # (2nc, COND_IN)
        layer_w.append(jnp.concatenate([taps_w, a_i], axis=1))            # (2nc, 128)
        layer_b.append(col(p['in_b'][i] + b_cond[i * 2 * nc:(i + 1) * 2 * nc]))
    layer_w = jnp.stack(layer_w)                                          # (L, 64, 128)
    layer_b = jnp.stack(layer_b)                                          # (L, 64, 1)

    # fold rezero alpha into res/skip weights & biases; last layer kept separate
    rs_w = jnp.stack([p['rs_w'][i] * p['alpha'][i] for i in range(N_LAYERS - 1)])
    rs_b = jnp.stack([col(p['rs_b'][i] * p['alpha'][i]) for i in range(N_LAYERS - 1)])
    rs_last_w = p['rs_w'][-1] * p['alpha'][-1]
    rs_last_b = col(p['rs_b'][-1] * p['alpha'][-1])

    return (start_w, col(p['start_b']),
            layer_w, layer_b,
            rs_w, rs_b, rs_last_w, rs_last_b,
            p['end_w'], col(p['end_b']))


# ----------------------- host-side layout helpers ---------------------------

def to_lanes(x):
    """(B, C, T) -> (C, B*T) with lane = b*T + t."""
    return jnp.transpose(x, (1, 0, 2)).reshape(x.shape[1], B * T)


def from_lanes(y, c):
    """(C, B*T) -> (B, C, T)."""
    return jnp.transpose(y.reshape(c, B, T), (1, 0, 2))


# --------------------------- pure-JAX reference -----------------------------

def conv1d_ref(x, w, b, dilation=1, padding=0):
    out = lax.conv_general_dilated(
        x, w, window_strides=(1,), padding=[(padding, padding)],
        rhs_dilation=(dilation,), dimension_numbers=('NCH', 'OIH', 'NCH'))
    return out + b[None, :, None]


def wn_reference(audio, spect, speaker_id, p):
    emb = p['speaker_embed'][speaker_id]
    emb = jnp.broadcast_to(emb[:, :, None], (B, SPK_DIM, spect.shape[2]))
    sp = jnp.concatenate([spect, emb], axis=1)
    x = conv1d_ref(audio, p['start_w'][:, :, None], p['start_b'])
    sp = conv1d_ref(sp, p['c0_w'][:, :, None], p['c0_b'])
    sp = conv1d_ref(sp, p['c1_w'][:, :, None], p['c1_b'])
    sp = conv1d_ref(sp, p['c2_w'][:, :, None], p['c2_b'])
    output = jnp.zeros_like(x)
    nc = N_CHANNELS
    for i in range(N_LAYERS):
        dilation = 2 ** i
        padding = dilation * (KERNEL_SIZE - 1) // 2
        z = conv1d_ref(x, p['in_w'][i], p['in_b'][i], dilation, padding)
        z = z + sp[:, i * 2 * nc:(i + 1) * 2 * nc, :]
        acts = jnp.tanh(z[:, :nc, :]) * jax.nn.sigmoid(z[:, nc:, :])
        rs = conv1d_ref(acts, p['rs_w'][i][:, :, None], p['rs_b'][i]) * p['alpha'][i]
        if i < N_LAYERS - 1:
            x = x + rs[:, :nc, :]
            output = output + rs[:, nc:, :]
        else:
            output = output + rs
    end = conv1d_ref(output, p['end_w'][:, :, None], p['end_b'])
    return end[:, :N_IN, :], end[:, N_IN:, :], output


# ------------------------------- main ---------------------------------------

if __name__ == "__main__":
    key = jax.random.PRNGKey(0)
    kp, ka, ks, kid, ke1, ke2 = jax.random.split(key, 6)
    params = init_params(kp)

    audio = jax.random.normal(ka, (B, N_IN, T), jnp.float32)
    spect = jax.random.normal(ks, (B, N_MEL, T), jnp.float32)
    speaker_id = jax.random.randint(kid, (B,), 0, N_SPEAKERS)

    # glue in plain JAX: speaker-embedding gather + channel concat + batch->lane fold
    emb = params['speaker_embed'][speaker_id]
    spect_cat = jnp.concatenate(
        [spect, jnp.broadcast_to(emb[:, :, None], (B, SPK_DIM, T))], axis=1)
    audio_pad = jnp.pad(audio, ((0, 0), (0, AUDIO_PAD - N_IN), (0, 0)))
    xin = jnp.concatenate([audio_pad, spect_cat], axis=1)   # (B, 8 + COND_IN, T)
    xin_m = to_lanes(xin)                                   # (40, B*T)

    def run_and_check(p, tag):
        kparams = pack_kernel_params(p)
        end_m, pre_m = wn_forward(xin_m, kparams)
        jax.block_until_ready((end_m, pre_m))
        end = from_lanes(end_m, 2 * N_IN)
        out0, out1 = end[:, :N_IN, :], end[:, N_IN:, :]
        pre = from_lanes(pre_m, N_CHANNELS)
        r0, r1, rpre = wn_reference(audio, spect, speaker_id, p)
        assert jnp.allclose(out0, r0, atol=2e-4), f"{tag}: chunk0 mismatch"
        assert jnp.allclose(out1, r1, atol=2e-4), f"{tag}: chunk1 mismatch"
        assert jnp.allclose(pre, rpre, atol=2e-4), f"{tag}: pre-end mismatch"

    # 1) faithful init (end conv zero-initialized as in WN.__init__)
    run_and_check(params, "zero-end")

    # 2) test-only variant with random end weights so the final end matmul path
    #    (and its packed layout) is actually exercised.
    params_rnd = dict(params)
    params_rnd['end_w'] = jax.random.normal(ke1, (2 * N_IN, N_CHANNELS), jnp.float32) * 0.1
    params_rnd['end_b'] = jax.random.normal(ke2, (2 * N_IN,), jnp.float32) * 0.05
    run_and_check(params_rnd, "rand-end")

    print("KERNEL_OK")
</pallas_src>

<mosaic_0001>
module attributes {stable_mosaic.version = 11 : i64} {
  func.func @wn_kernel(%arg0: i32, %arg1: memref<40x256xf32, #tpu.memory_space<vmem>>, %arg2: memref<32x8xf32, #tpu.memory_space<vmem>>, %arg3: memref<32x1xf32, #tpu.memory_space<vmem>>, %arg4: memref<4x64x128xf32, #tpu.memory_space<vmem>>, %arg5: memref<4x64x1xf32, #tpu.memory_space<vmem>>, %arg6: memref<3x64x32xf32, #tpu.memory_space<vmem>>, %arg7: memref<3x64x1xf32, #tpu.memory_space<vmem>>, %arg8: memref<32x32xf32, #tpu.memory_space<vmem>>, %arg9: memref<32x1xf32, #tpu.memory_space<vmem>>, %arg10: memref<8x32xf32, #tpu.memory_space<vmem>>, %arg11: memref<8x1xf32, #tpu.memory_space<vmem>>, %arg12: memref<8x256xf32, #tpu.memory_space<vmem>>, %arg13: memref<32x256xf32, #tpu.memory_space<vmem>>) attributes {dimension_semantics = [#tpu.dimension_semantics<arbitrary>], iteration_bounds = array<i64: 1>, scalar_prefetch = 0 : i64, scratch_operands = 0 : i64, tpu.core_type = #tpu.core_type<tc>, window_params = [{transform_indices = @transform_0, window_bounds = array<i64: 40, 256>}, {pipeline_mode = #tpu.pipeline_mode<synchronous>, transform_indices = @transform_1, window_bounds = array<i64: 32, 8>}, {pipeline_mode = #tpu.pipeline_mode<synchronous>, transform_indices = @transform_2, window_bounds = array<i64: 32, 1>}, {pipeline_mode = #tpu.pipeline_mode<synchronous>, transform_indices = @transform_3, window_bounds = array<i64: 4, 64, 128>}, {pipeline_mode = #tpu.pipeline_mode<synchronous>, transform_indices = @transform_4, window_bounds = array<i64: 4, 64, 1>}, {pipeline_mode = #tpu.pipeline_mode<synchronous>, transform_indices = @transform_5, window_bounds = array<i64: 3, 64, 32>}, {pipeline_mode = #tpu.pipeline_mode<synchronous>, transform_indices = @transform_6, window_bounds = array<i64: 3, 64, 1>}, {pipeline_mode = #tpu.pipeline_mode<synchronous>, transform_indices = @transform_7, window_bounds = array<i64: 32, 32>}, {pipeline_mode = #tpu.pipeline_mode<synchronous>, transform_indices = @transform_8, window_bounds = array<i64: 32, 1>}, {pipeline_mode = #tpu.pipeline_mode<synchronous>, transform_indices = @transform_9, window_bounds = array<i64: 8, 32>}, {pipeline_mode = #tpu.pipeline_mode<synchronous>, transform_indices = @transform_10, window_bounds = array<i64: 8, 1>}, {transform_indices = @transform_11, window_bounds = array<i64: 8, 256>}, {transform_indices = @transform_12, window_bounds = array<i64: 32, 256>}]} {
    %c0 = arith.constant 0 : index
    %c0_0 = arith.constant 0 : index
    %0 = vector.load %arg1[%c0, %c0_0] : memref<40x256xf32, #tpu.memory_space<vmem>>, vector<40x256xf32>
    %1 = vector.extract_strided_slice %0 {offsets = [0, 0], sizes = [8, 256], strides = [1, 1]} : vector<40x256xf32> to vector<8x256xf32>
    %2 = vector.extract_strided_slice %0 {offsets = [8, 0], sizes = [32, 256], strides = [1, 1]} : vector<40x256xf32> to vector<32x256xf32>
    %c0_1 = arith.constant 0 : index
    %c0_2 = arith.constant 0 : index
    %3 = vector.load %arg2[%c0_1, %c0_2] : memref<32x8xf32, #tpu.memory_space<vmem>>, vector<32x8xf32>
    %cst = arith.constant dense<0.000000e+00> : vector<32x256xf32>
    %4 = tpu.matmul %3, %1, %cst {dimension_numbers = #tpu.dot_dimension_numbers<[1], [0], [0], [1], [0, 0, 1, 1], [], []>} : vector<32x8xf32>, vector<8x256xf32>, vector<32x256xf32> -> vector<32x256xf32>
    %c0_3 = arith.constant 0 : index
    %c0_4 = arith.constant 0 : index
    %5 = vector.load %arg3[%c0_3, %c0_4] : memref<32x1xf32, #tpu.memory_space<vmem>>, vector<32x1xf32>
    %6 = vector.broadcast %5 : vector<32x1xf32> to vector<32x256xf32>
    %7 = arith.addf %4, %6 : vector<32x256xf32>
    %8 = tpu.iota {dimensions = array<i32: 1>} : vector<32x256xi32>
    %c128_i32 = arith.constant 128 : i32
    %c0_i32 = arith.constant 0 : i32
    %9 = arith.cmpi eq, %c128_i32, %c0_i32 : i32
    %c1_i32 = arith.constant 1 : i32
    %10 = arith.select %9, %c1_i32, %c128_i32 : i32
    %11 = vector.broadcast %10 : i32 to vector<32x256xi32>
    %12 = arith.remsi %8, %11 : vector<32x256xi32>
    %c0_i32_5 = arith.constant 0 : i32
    %13 = vector.broadcast %c0_i32_5 : i32 to vector<32x256xi32>
    %14 = arith.cmpi ne, %12, %13 : vector<32x256xi32>
    %c0_i32_6 = arith.constant 0 : i32
    %15 = vector.broadcast %c0_i32_6 : i32 to vector<32x256xi32>
    %16 = arith.cmpi slt, %12, %15 : vector<32x256xi32>
    %c0_i32_7 = arith.constant 0 : i32
    %17 = arith.cmpi slt, %10, %c0_i32_7 : i32
    %18 = vector.broadcast %17 : i1 to vector<32x256xi1>
    %19 = vector.broadcast %18 : vector<32x256xi1> to vector<32x256xi1>
    %20 = arith.xori %16, %19 : vector<32x256xi1>
    %21 = arith.andi %20, %14 : vector<32x256xi1>
    %22 = vector.broadcast %10 : i32 to vector<32x256xi32>
    %23 = arith.addi %12, %22 : vector<32x256xi32>
    %24 = arith.select %21, %23, %12 : vector<32x256xi1>, vector<32x256xi32>
    %cst_8 = arith.constant 0.000000e+00 : f32
    %25 = vector.broadcast %cst_8 : f32 to vector<32x256xf32>
    %c1_i32_9 = arith.constant 1 : i32
    %26 = vector.broadcast %c1_i32_9 : i32 to vector<32x256xi32>
    %27 = arith.cmpi sge, %24, %26 : vector<32x256xi32>
    %c1_i32_10 = arith.constant 1 : i32
    %28 = tpu.dynamic_rotate %7 by %c1_i32_10 dim 1 : vector<32x256xf32>, i32 -> vector<32x256xf32>
    %cst_11 = arith.constant 0.000000e+00 : f32
    %29 = vector.broadcast %cst_11 : f32 to vector<32x256xf32>
    %30 = arith.select %27, %28, %29 : vector<32x256xi1>, vector<32x256xf32>
    %c127_i32 = arith.constant 127 : i32
    %31 = vector.broadcast %c127_i32 : i32 to vector<32x256xi32>
    %32 = arith.cmpi slt, %24, %31 : vector<32x256xi32>
    %c255_i32 = arith.constant 255 : i32
    %33 = tpu.dynamic_rotate %7 by %c255_i32 dim 1 : vector<32x256xf32>, i32 -> vector<32x256xf32>
    %cst_12 = arith.constant 0.000000e+00 : f32
    %34 = vector.broadcast %cst_12 : f32 to vector<32x256xf32>
    %35 = arith.select %32, %33, %34 : vector<32x256xi1>, vector<32x256xf32>
    %36 = tpu.concatenate %30, %7, %35, %2 in 0 : vector<32x256xf32>, vector<32x256xf32>, vector<32x256xf32>, vector<32x256xf32> -> vector<128x256xf32>
    %c0_13 = arith.constant 0 : index
    %c0_14 = arith.constant 0 : index
    %c0_15 = arith.constant 0 : index
    %37 = vector.load %arg4[%c0_13, %c0_14, %c0_15] : memref<4x64x128xf32, #tpu.memory_space<vmem>>, vector<1x64x128xf32>
    %38 = vector.shape_cast %37 : vector<1x64x128xf32> to vector<64x128xf32>
    %cst_16 = arith.constant dense<0.000000e+00> : vector<64x256xf32>
    %39 = tpu.matmul %38, %36, %cst_16 {dimension_numbers = #tpu.dot_dimension_numbers<[1], [0], [0], [1], [0, 0, 1, 1], [], []>} : vector<64x128xf32>, vector<128x256xf32>, vector<64x256xf32> -> vector<64x256xf32>
    %c0_17 = arith.constant 0 : index
    %c0_18 = arith.constant 0 : index
    %c0_19 = arith.constant 0 : index
    %40 = vector.load %arg5[%c0_17, %c0_18, %c0_19] : memref<4x64x1xf32, #tpu.memory_space<vmem>>, vector<1x64x1xf32>
    %41 = vector.shape_cast %40 : vector<1x64x1xf32> to vector<64x1xf32>
    %42 = vector.broadcast %41 : vector<64x1xf32> to vector<64x256xf32>
    %43 = arith.addf %39, %42 : vector<64x256xf32>
    %44 = vector.extract_strided_slice %43 {offsets = [0, 0], sizes = [32, 256], strides = [1, 1]} : vector<64x256xf32> to vector<32x256xf32>
    %45 = math.tanh %44 : vector<32x256xf32>
    %46 = vector.extract_strided_slice %43 {offsets = [32, 0], sizes = [32, 256], strides = [1, 1]} : vector<64x256xf32> to vector<32x256xf32>
    %47 = arith.negf %46 : vector<32x256xf32>
    %48 = math.exp %47 : vector<32x256xf32>
    %cst_20 = arith.constant 1.000000e+00 : f32
    %49 = vector.broadcast %cst_20 : f32 to vector<32x256xf32>
    %50 = arith.addf %49, %48 : vector<32x256xf32>
    %51 = arith.divf %49, %50 : vector<32x256xf32>
    %52 = arith.mulf %45, %51 : vector<32x256xf32>
    %c0_21 = arith.constant 0 : index
    %c0_22 = arith.constant 0 : index
    %c0_23 = arith.constant 0 : index
    %53 = vector.load %arg6[%c0_21, %c0_22, %c0_23] : memref<3x64x32xf32, #tpu.memory_space<vmem>>, vector<1x64x32xf32>
    %54 = vector.shape_cast %53 : vector<1x64x32xf32> to vector<64x32xf32>
    %cst_24 = arith.constant dense<0.000000e+00> : vector<64x256xf32>
    %55 = tpu.matmul %54, %52, %cst_24 {dimension_numbers = #tpu.dot_dimension_numbers<[1], [0], [0], [1], [0, 0, 1, 1], [], []>} : vector<64x32xf32>, vector<32x256xf32>, vector<64x256xf32> -> vector<64x256xf32>
    %c0_25 = arith.constant 0 : index
    %c0_26 = arith.constant 0 : index
    %c0_27 = arith.constant 0 : index
    %56 = vector.load %arg7[%c0_25, %c0_26, %c0_27] : memref<3x64x1xf32, #tpu.memory_space<vmem>>, vector<1x64x1xf32>
    %57 = vector.shape_cast %56 : vector<1x64x1xf32> to vector<64x1xf32>
    %58 = vector.broadcast %57 : vector<64x1xf32> to vector<64x256xf32>
    %59 = arith.addf %55, %58 : vector<64x256xf32>
    %60 = vector.extract_strided_slice %59 {offsets = [0, 0], sizes = [32, 256], strides = [1, 1]} : vector<64x256xf32> to vector<32x256xf32>
    %61 = arith.addf %7, %60 : vector<32x256xf32>
    %62 = vector.extract_strided_slice %59 {offsets = [32, 0], sizes = [32, 256], strides = [1, 1]} : vector<64x256xf32> to vector<32x256xf32>
    %63 = arith.addf %25, %62 : vector<32x256xf32>
    %c2_i32 = arith.constant 2 : i32
    %64 = vector.broadcast %c2_i32 : i32 to vector<32x256xi32>
    %65 = arith.cmpi sge, %24, %64 : vector<32x256xi32>
    %c2_i32_28 = arith.constant 2 : i32
    %66 = tpu.dynamic_rotate %61 by %c2_i32_28 dim 1 : vector<32x256xf32>, i32 -> vector<32x256xf32>
    %cst_29 = arith.constant 0.000000e+00 : f32
    %67 = vector.broadcast %cst_29 : f32 to vector<32x256xf32>
    %68 = arith.select %65, %66, %67 : vector<32x256xi1>, vector<32x256xf32>
    %c126_i32 = arith.constant 126 : i32
    %69 = vector.broadcast %c126_i32 : i32 to vector<32x256xi32>
    %70 = arith.cmpi slt, %24, %69 : vector<32x256xi32>
    %c254_i32 = arith.constant 254 : i32
    %71 = tpu.dynamic_rotate %61 by %c254_i32 dim 1 : vector<32x256xf32>, i32 -> vector<32x256xf32>
    %cst_30 = arith.constant 0.000000e+00 : f32
    %72 = vector.broadcast %cst_30 : f32 to vector<32x256xf32>
    %73 = arith.select %70, %71, %72 : vector<32x256xi1>, vector<32x256xf32>
    %74 = tpu.concatenate %68, %61, %73, %2 in 0 : vector<32x256xf32>, vector<32x256xf32>, vector<32x256xf32>, vector<32x256xf32> -> vector<128x256xf32>
    %c1 = arith.constant 1 : index
    %c0_31 = arith.constant 0 : index
    %c0_32 = arith.constant 0 : index
    %75 = vector.load %arg4[%c1, %c0_31, %c0_32] : memref<4x64x128xf32, #tpu.memory_space<vmem>>, vector<1x64x128xf32>
    %76 = vector.shape_cast %75 : vector<1x64x128xf32> to vector<64x128xf32>
    %cst_33 = arith.constant dense<0.000000e+00> : vector<64x256xf32>
    %77 = tpu.matmul %76, %74, %cst_33 {dimension_numbers = #tpu.dot_dimension_numbers<[1], [0], [0], [1], [0, 0, 1, 1], [], []>} : vector<64x128xf32>, vector<128x256xf32>, vector<64x256xf32> -> vector<64x256xf32>
    %c1_34 = arith.constant 1 : index
    %c0_35 = arith.constant 0 : index
    %c0_36 = arith.constant 0 : index
    %78 = vector.load %arg5[%c1_34, %c0_35, %c0_36] : memref<4x64x1xf32, #tpu.memory_space<vmem>>, vector<1x64x1xf32>
    %79 = vector.shape_cast %78 : vector<1x64x1xf32> to vector<64x1xf32>
    %80 = vector.broadcast %79 : vector<64x1xf32> to vector<64x256xf32>
    %81 = arith.addf %77, %80 : vector<64x256xf32>
    %82 = vector.extract_strided_slice %81 {offsets = [0, 0], sizes = [32, 256], strides = [1, 1]} : vector<64x256xf32> to vector<32x256xf32>
    %83 = math.tanh %82 : vector<32x256xf32>
    %84 = vector.extract_strided_slice %81 {offsets = [32, 0], sizes = [32, 256], strides = [1, 1]} : vector<64x256xf32> to vector<32x256xf32>
    %85 = arith.negf %84 : vector<32x256xf32>
    %86 = math.exp %85 : vector<32x256xf32>
    %cst_37 = arith.constant 1.000000e+00 : f32
    %87 = vector.broadcast %cst_37 : f32 to vector<32x256xf32>
    %88 = arith.addf %87, %86 : vector<32x256xf32>
    %89 = arith.divf %87, %88 : vector<32x256xf32>
    %90 = arith.mulf %83, %89 : vector<32x256xf32>
    %c1_38 = arith.constant 1 : index
    %c0_39 = arith.constant 0 : index
    %c0_40 = arith.constant 0 : index
    %91 = vector.load %arg6[%c1_38, %c0_39, %c0_40] : memref<3x64x32xf32, #tpu.memory_space<vmem>>, vector<1x64x32xf32>
    %92 = vector.shape_cast %91 : vector<1x64x32xf32> to vector<64x32xf32>
    %cst_41 = arith.constant dense<0.000000e+00> : vector<64x256xf32>
    %93 = tpu.matmul %92, %90, %cst_41 {dimension_numbers = #tpu.dot_dimension_numbers<[1], [0], [0], [1], [0, 0, 1, 1], [], []>} : vector<64x32xf32>, vector<32x256xf32>, vector<64x256xf32> -> vector<64x256xf32>
    %c1_42 = arith.constant 1 : index
    %c0_43 = arith.constant 0 : index
    %c0_44 = arith.constant 0 : index
    %94 = vector.load %arg7[%c1_42, %c0_43, %c0_44] : memref<3x64x1xf32, #tpu.memory_space<vmem>>, vector<1x64x1xf32>
    %95 = vector.shape_cast %94 : vector<1x64x1xf32> to vector<64x1xf32>
    %96 = vector.broadcast %95 : vector<64x1xf32> to vector<64x256xf32>
    %97 = arith.addf %93, %96 : vector<64x256xf32>
    %98 = vector.extract_strided_slice %97 {offsets = [0, 0], sizes = [32, 256], strides = [1, 1]} : vector<64x256xf32> to vector<32x256xf32>
    %99 = arith.addf %61, %98 : vector<32x256xf32>
    %100 = vector.extract_strided_slice %97 {offsets = [32, 0], sizes = [32, 256], strides = [1, 1]} : vector<64x256xf32> to vector<32x256xf32>
    %101 = arith.addf %63, %100 : vector<32x256xf32>
    %c4_i32 = arith.constant 4 : i32
    %102 = vector.broadcast %c4_i32 : i32 to vector<32x256xi32>
    %103 = arith.cmpi sge, %24, %102 : vector<32x256xi32>
    %c4_i32_45 = arith.constant 4 : i32
    %104 = tpu.dynamic_rotate %99 by %c4_i32_45 dim 1 : vector<32x256xf32>, i32 -> vector<32x256xf32>
    %cst_46 = arith.constant 0.000000e+00 : f32
    %105 = vector.broadcast %cst_46 : f32 to vector<32x256xf32>
    %106 = arith.select %103, %104, %105 : vector<32x256xi1>, vector<32x256xf32>
    %c124_i32 = arith.constant 124 : i32
    %107 = vector.broadcast %c124_i32 : i32 to vector<32x256xi32>
    %108 = arith.cmpi slt, %24, %107 : vector<32x256xi32>
    %c252_i32 = arith.constant 252 : i32
    %109 = tpu.dynamic_rotate %99 by %c252_i32 dim 1 : vector<32x256xf32>, i32 -> vector<32x256xf32>
    %cst_47 = arith.constant 0.000000e+00 : f32
    %110 = vector.broadcast %cst_47 : f32 to vector<32x256xf32>
    %111 = arith.select %108, %109, %110 : vector<32x256xi1>, vector<32x256xf32>
    %112 = tpu.concatenate %106, %99, %111, %2 in 0 : vector<32x256xf32>, vector<32x256xf32>, vector<32x256xf32>, vector<32x256xf32> -> vector<128x256xf32>
    %c2 = arith.constant 2 : index
    %c0_48 = arith.constant 0 : index
    %c0_49 = arith.constant 0 : index
    %113 = vector.load %arg4[%c2, %c0_48, %c0_49] : memref<4x64x128xf32, #tpu.memory_space<vmem>>, vector<1x64x128xf32>
    %114 = vector.shape_cast %113 : vector<1x64x128xf32> to vector<64x128xf32>
    %cst_50 = arith.constant dense<0.000000e+00> : vector<64x256xf32>
    %115 = tpu.matmul %114, %112, %cst_50 {dimension_numbers = #tpu.dot_dimension_numbers<[1], [0], [0], [1], [0, 0, 1, 1], [], []>} : vector<64x128xf32>, vector<128x256xf32>, vector<64x256xf32> -> vector<64x256xf32>
    %c2_51 = arith.constant 2 : index
    %c0_52 = arith.constant 0 : index
    %c0_53 = arith.constant 0 : index
    %116 = vector.load %arg5[%c2_51, %c0_52, %c0_53] : memref<4x64x1xf32, #tpu.memory_space<vmem>>, vector<1x64x1xf32>
    %117 = vector.shape_cast %116 : vector<1x64x1xf32> to vector<64x1xf32>
    %118 = vector.broadcast %117 : vector<64x1xf32> to vector<64x256xf32>
    %119 = arith.addf %115, %118 : vector<64x256xf32>
    %120 = vector.extract_strided_slice %119 {offsets = [0, 0], sizes = [32, 256], strides = [1, 1]} : vector<64x256xf32> to vector<32x256xf32>
    %121 = math.tanh %120 : vector<32x256xf32>
    %122 = vector.extract_strided_slice %119 {offsets = [32, 0], sizes = [32, 256], strides = [1, 1]} : vector<64x256xf32> to vector<32x256xf32>
    %123 = arith.negf %122 : vector<32x256xf32>
    %124 = math.exp %123 : vector<32x256xf32>
    %cst_54 = arith.constant 1.000000e+00 : f32
    %125 = vector.broadcast %cst_54 : f32 to vector<32x256xf32>
    %126 = arith.addf %125, %124 : vector<32x256xf32>
    %127 = arith.divf %125, %126 : vector<32x256xf32>
    %128 = arith.mulf %121, %127 : vector<32x256xf32>
    %c2_55 = arith.constant 2 : index
    %c0_56 = arith.constant 0 : index
    %c0_57 = arith.constant 0 : index
    %129 = vector.load %arg6[%c2_55, %c0_56, %c0_57] : memref<3x64x32xf32, #tpu.memory_space<vmem>>, vector<1x64x32xf32>
    %130 = vector.shape_cast %129 : vector<1x64x32xf32> to vector<64x32xf32>
    %cst_58 = arith.constant dense<0.000000e+00> : vector<64x256xf32>
    %131 = tpu.matmul %130, %128, %cst_58 {dimension_numbers = #tpu.dot_dimension_numbers<[1], [0], [0], [1], [0, 0, 1, 1], [], []>} : vector<64x32xf32>, vector<32x256xf32>, vector<64x256xf32> -> vector<64x256xf32>
    %c2_59 = arith.constant 2 : index
    %c0_60 = arith.constant 0 : index
    %c0_61 = arith.constant 0 : index
    %132 = vector.load %arg7[%c2_59, %c0_60, %c0_61] : memref<3x64x1xf32, #tpu.memory_space<vmem>>, vector<1x64x1xf32>
    %133 = vector.shape_cast %132 : vector<1x64x1xf32> to vector<64x1xf32>
    %134 = vector.broadcast %133 : vector<64x1xf32> to vector<64x256xf32>
    %135 = arith.addf %131, %134 : vector<64x256xf32>
    %136 = vector.extract_strided_slice %135 {offsets = [0, 0], sizes = [32, 256], strides = [1, 1]} : vector<64x256xf32> to vector<32x256xf32>
    %137 = arith.addf %99, %136 : vector<32x256xf32>
    %138 = vector.extract_strided_slice %135 {offsets = [32, 0], sizes = [32, 256], strides = [1, 1]} : vector<64x256xf32> to vector<32x256xf32>
    %139 = arith.addf %101, %138 : vector<32x256xf32>
    %c8_i32 = arith.constant 8 : i32
    %140 = vector.broadcast %c8_i32 : i32 to vector<32x256xi32>
    %141 = arith.cmpi sge, %24, %140 : vector<32x256xi32>
    %c8_i32_62 = arith.constant 8 : i32
    %142 = tpu.dynamic_rotate %137 by %c8_i32_62 dim 1 : vector<32x256xf32>, i32 -> vector<32x256xf32>
    %cst_63 = arith.constant 0.000000e+00 : f32
    %143 = vector.broadcast %cst_63 : f32 to vector<32x256xf32>
    %144 = arith.select %141, %142, %143 : vector<32x256xi1>, vector<32x256xf32>
    %c120_i32 = arith.constant 120 : i32
    %145 = vector.broadcast %c120_i32 : i32 to vector<32x256xi32>
    %146 = arith.cmpi slt, %24, %145 : vector<32x256xi32>
    %c248_i32 = arith.constant 248 : i32
    %147 = tpu.dynamic_rotate %137 by %c248_i32 dim 1 : vector<32x256xf32>, i32 -> vector<32x256xf32>
    %cst_64 = arith.constant 0.000000e+00 : f32
    %148 = vector.broadcast %cst_64 : f32 to vector<32x256xf32>
    %149 = arith.select %146, %147, %148 : vector<32x256xi1>, vector<32x256xf32>
    %150 = tpu.concatenate %144, %137, %149, %2 in 0 : vector<32x256xf32>, vector<32x256xf32>, vector<32x256xf32>, vector<32x256xf32> -> vector<128x256xf32>
    %c3 = arith.constant 3 : index
    %c0_65 = arith.constant 0 : index
    %c0_66 = arith.constant 0 : index
    %151 = vector.load %arg4[%c3, %c0_65, %c0_66] : memref<4x64x128xf32, #tpu.memory_space<vmem>>, vector<1x64x128xf32>
    %152 = vector.shape_cast %151 : vector<1x64x128xf32> to vector<64x128xf32>
    %cst_67 = arith.constant dense<0.000000e+00> : vector<64x256xf32>
    %153 = tpu.matmul %152, %150, %cst_67 {dimension_numbers = #tpu.dot_dimension_numbers<[1], [0], [0], [1], [0, 0, 1, 1], [], []>} : vector<64x128xf32>, vector<128x256xf32>, vector<64x256xf32> -> vector<64x256xf32>
    %c3_68 = arith.constant 3 : index
    %c0_69 = arith.constant 0 : index
    %c0_70 = arith.constant 0 : index
    %154 = vector.load %arg5[%c3_68, %c0_69, %c0_70] : memref<4x64x1xf32, #tpu.memory_space<vmem>>, vector<1x64x1xf32>
    %155 = vector.shape_cast %154 : vector<1x64x1xf32> to vector<64x1xf32>
    %156 = vector.broadcast %155 : vector<64x1xf32> to vector<64x256xf32>
    %157 = arith.addf %153, %156 : vector<64x256xf32>
    %158 = vector.extract_strided_slice %157 {offsets = [0, 0], sizes = [32, 256], strides = [1, 1]} : vector<64x256xf32> to vector<32x256xf32>
    %159 = math.tanh %158 : vector<32x256xf32>
    %160 = vector.extract_strided_slice %157 {offsets = [32, 0], sizes = [32, 256], strides = [1, 1]} : vector<64x256xf32> to vector<32x256xf32>
    %161 = arith.negf %160 : vector<32x256xf32>
    %162 = math.exp %161 : vector<32x256xf32>
    %cst_71 = arith.constant 1.000000e+00 : f32
    %163 = vector.broadcast %cst_71 : f32 to vector<32x256xf32>
    %164 = arith.addf %163, %162 : vector<32x256xf32>
    %165 = arith.divf %163, %164 : vector<32x256xf32>
    %166 = arith.mulf %159, %165 : vector<32x256xf32>
    %c0_72 = arith.constant 0 : index
    %c0_73 = arith.constant 0 : index
    %167 = vector.load %arg8[%c0_72, %c0_73] : memref<32x32xf32, #tpu.memory_space<vmem>>, vector<32x32xf32>
    %cst_74 = arith.constant dense<0.000000e+00> : vector<32x256xf32>
    %168 = tpu.matmul %167, %166, %cst_74 {dimension_numbers = #tpu.dot_dimension_numbers<[1], [0], [0], [1], [0, 0, 1, 1], [], []>} : vector<32x32xf32>, vector<32x256xf32>, vector<32x256xf32> -> vector<32x256xf32>
    %c0_75 = arith.constant 0 : index
    %c0_76 = arith.constant 0 : index
    %169 = vector.load %arg9[%c0_75, %c0_76] : memref<32x1xf32, #tpu.memory_space<vmem>>, vector<32x1xf32>
    %170 = vector.broadcast %169 : vector<32x1xf32> to vector<32x256xf32>
    %171 = arith.addf %168, %170 : vector<32x256xf32>
    %172 = arith.addf %139, %171 : vector<32x256xf32>
    %c0_77 = arith.constant 0 : index
    %c0_78 = arith.constant 0 : index
    %173 = vector.load %arg13[%c0_77, %c0_78] : memref<32x256xf32, #tpu.memory_space<vmem>>, vector<32x256xf32>
    tpu.vector_store %arg13[%c0_77, %c0_78], %172 {strides = array<i32>} : memref<32x256xf32, #tpu.memory_space<vmem>>, vector<32x256xf32>,
    %c0_79 = arith.constant 0 : index
    %c0_80 = arith.constant 0 : index
    %174 = vector.load %arg10[%c0_79, %c0_80] : memref<8x32xf32, #tpu.memory_space<vmem>>, vector<8x32xf32>
    %cst_81 = arith.constant dense<0.000000e+00> : vector<8x256xf32>
    %175 = tpu.matmul %174, %172, %cst_81 {dimension_numbers = #tpu.dot_dimension_numbers<[1], [0], [0], [1], [0, 0, 1, 1], [], []>} : vector<8x32xf32>, vector<32x256xf32>, vector<8x256xf32> -> vector<8x256xf32>
    %c0_82 = arith.constant 0 : index
    %c0_83 = arith.constant 0 : index
    %176 = vector.load %arg11[%c0_82, %c0_83] : memref<8x1xf32, #tpu.memory_space<vmem>>, vector<8x1xf32>
    %177 = vector.broadcast %176 : vector<8x1xf32> to vector<8x256xf32>
    %178 = arith.addf %175, %177 : vector<8x256xf32>
    %c0_84 = arith.constant 0 : index
    %c0_85 = arith.constant 0 : index
    %179 = vector.load %arg12[%c0_84, %c0_85] : memref<8x256xf32, #tpu.memory_space<vmem>>, vector<8x256xf32>
    tpu.vector_store %arg12[%c0_84, %c0_85], %178 {strides = array<i32>} : memref<8x256xf32, #tpu.memory_space<vmem>>, vector<8x256xf32>,
    return
  }
  func.func @transform_0(%arg0: i32) -> (i32, i32) {
    %c0_i32 = arith.constant 0 : i32
    %c0_i32_0 = arith.constant 0 : i32
    return %c0_i32, %arg0 : i32, i32
  }
  func.func @transform_1(%arg0: i32) -> (i32, i32) {
    %c0_i32 = arith.constant 0 : i32
    %c0_i32_0 = arith.constant 0 : i32
    %c0_i32_1 = arith.constant 0 : i32
    return %c0_i32, %c0_i32_0 : i32, i32
  }
  func.func @transform_2(%arg0: i32) -> (i32, i32) {
    %c0_i32 = arith.constant 0 : i32
    %c0_i32_0 = arith.constant 0 : i32
    %c0_i32_1 = arith.constant 0 : i32
    return %c0_i32, %c0_i32_0 : i32, i32
  }
  func.func @transform_3(%arg0: i32) -> (i32, i32, i32) {
    %c0_i32 = arith.constant 0 : i32
    %c0_i32_0 = arith.constant 0 : i32
    %c0_i32_1 = arith.constant 0 : i32
    %c0_i32_2 = arith.constant 0 : i32
    return %c0_i32, %c0_i32_0, %c0_i32_1 : i32, i32, i32
  }
  func.func @transform_4(%arg0: i32) -> (i32, i32, i32) {
    %c0_i32 = arith.constant 0 : i32
    %c0_i32_0 = arith.constant 0 : i32
    %c0_i32_1 = arith.constant 0 : i32
    %c0_i32_2 = arith.constant 0 : i32
    return %c0_i32, %c0_i32_0, %c0_i32_1 : i32, i32, i32
  }
  func.func @transform_5(%arg0: i32) -> (i32, i32, i32) {
    %c0_i32 = arith.constant 0 : i32
    %c0_i32_0 = arith.constant 0 : i32
    %c0_i32_1 = arith.constant 0 : i32
    %c0_i32_2 = arith.constant 0 : i32
    return %c0_i32, %c0_i32_0, %c0_i32_1 : i32, i32, i32
  }
  func.func @transform_6(%arg0: i32) -> (i32, i32, i32) {
    %c0_i32 = arith.constant 0 : i32
    %c0_i32_0 = arith.constant 0 : i32
    %c0_i32_1 = arith.constant 0 : i32
    %c0_i32_2 = arith.constant 0 : i32
    return %c0_i32, %c0_i32_0, %c0_i32_1 : i32, i32, i32
  }
  func.func @transform_7(%arg0: i32) -> (i32, i32) {
    %c0_i32 = arith.constant 0 : i32
    %c0_i32_0 = arith.constant 0 : i32
    %c0_i32_1 = arith.constant 0 : i32
    return %c0_i32, %c0_i32_0 : i32, i32
  }
  func.func @transform_8(%arg0: i32) -> (i32, i32) {
    %c0_i32 = arith.constant 0 : i32
    %c0_i32_0 = arith.constant 0 : i32
    %c0_i32_1 = arith.constant 0 : i32
    return %c0_i32, %c0_i32_0 : i32, i32
  }
  func.func @transform_9(%arg0: i32) -> (i32, i32) {
    %c0_i32 = arith.constant 0 : i32
    %c0_i32_0 = arith.constant 0 : i32
    %c0_i32_1 = arith.constant 0 : i32
    return %c0_i32, %c0_i32_0 : i32, i32
  }
  func.func @transform_10(%arg0: i32) -> (i32, i32) {
    %c0_i32 = arith.constant 0 : i32
    %c0_i32_0 = arith.constant 0 : i32
    %c0_i32_1 = arith.constant 0 : i32
    return %c0_i32, %c0_i32_0 : i32, i32
  }
  func.func @transform_11(%arg0: i32) -> (i32, i32) {
    %c0_i32 = arith.constant 0 : i32
    %c0_i32_0 = arith.constant 0 : i32
    return %c0_i32, %arg0 : i32, i32
  }
  func.func @transform_12(%arg0: i32) -> (i32, i32) {
    %c0_i32 = arith.constant 0 : i32
    %c0_i32_0 = arith.constant 0 : i32
    return %c0_i32, %arg0 : i32, i32
  }
}

</mosaic_0001>

<bundles_post_ra>
// kernel: tpu_custom_call.1
= control target key start
LH: loop header
LB: loop body
LE: loop exit
PB: predicated region body
PF: predicated region fallthrough
CT: control target
= control target key end

     0   :  { %18 = vsyncpa [#allocation3], 0  ;;  %vm80_vm0 = vcmask 64512   ;;  %v2969_v5 = vmov 0   ;;  %s5199_s0 = inlined_call_operand.vmem [shape: f32[40,256], index: 0, kind: input, shape index: {}]   ;;  %s5200_s1 = inlined_call_operand.vmem [shape: f32[32,8], index: 1, kind: input, shape index: {}]   ;;  %s5201_s2 = inlined_call_operand.vmem [shape: f32[32,1], index: 2, kind: input, shape index: {}]   ;;  %s5202_s3 = inlined_call_operand.vmem [shape: f32[4,64,128], index: 3, kind: input, shape index: {}]   ;;  %s5203_s4 = inlined_call_operand.vmem [shape: f32[4,64,1], index: 4, kind: input, shape index: {}]   ;;  %s5204_s5 = inlined_call_operand.vmem [shape: f32[3,64,32], index: 5, kind: input, shape index: {}]   ;;  %s5205_s6 = inlined_call_operand.vmem [shape: f32[3,64,1], index: 6, kind: input, shape index: {}]   ;;  %s5206_s7 = inlined_call_operand.vmem [shape: f32[32,32], index: 7, kind: input, shape index: {}]   ;;  %s5207_s8 = inlined_call_operand.vmem [shape: f32[32,1], index: 8, kind: input, shape index: {}]   ;;  %s5208_s9 = inlined_call_operand.vmem [shape: f32[8,32], index: 9, kind: input, shape index: {}]   ;;  %s5209_s10 = inlined_call_operand.vmem [shape: f32[8,1], index: 10, kind: input, shape index: {}]   ;;  %s5210_s11 = inlined_call_operand.hbm [shape: f32[8,256], index: 11, kind: output, shape index: {0}]   ;;  %s5211_s12 = inlined_call_operand.hbm [shape: f32[32,256], index: 12, kind: output, shape index: {1}]  }
   0x1   :  { %v42_v0 = vld [vmem:[%s5199_s0] sm:$0xff]  ;;  %v43_v1 = vld [vmem:[%s5199_s0 + $0x8] sm:$0xff]  ;;  %v59_v4 = vld [vmem:[%s5201_s2 + $0x18] sm:$0xff]  ;;  %2715 = vset.pattern.permute.xlu1 %v2969_v5  ;;  %2714 = vset.pattern.permute.xlu0 %v2969_v5 }
   0x2   :  { %v52_v2 = vld [vmem:[%s5200_s1] sm:$0xff]  ;;  %108 = vmatpush.msra.mxu0 %v42_v0  ;;  %137 = vmatpush.msra.mxu1 %v43_v1  ;;  %v57_v3 = vld [vmem:[%s5201_s2 + $0x8] sm:$0xff] }
   0x3   :  { %2427 = vmatmul.msk.f32.vlgmr.msra.gmra.mxu0 %vm80_vm0, %v52_v2  ;;  %2431 = vmatmul.msk.f32.vlgmr.msra.gmra.mxu1 %vm80_vm0, %v52_v2 }
   0x4   :  { %19 = vsyncpa [#allocation5], 0  ;;  %67 = vperm.xlu1 %2715, %v57_v3   ;;  %77 = vperm.xlu0 %2714, %v59_v4   ;;  %v53_v6 = vld [vmem:[%s5200_s1 + $0x8] sm:$0xff]  ;;  %v56_v7 = vld [vmem:[%s5201_s2] sm:$0xff]  ;;  %v151_v48 = vlaneseq  ;;  %s2972_s27 = smov 126   ;;  %s2973_s28 = smov 2  }
   0x5   :  { %2716 = vset.pattern.permute.xlu2 %v2969_v5  ;;  %v58_v8 = vld [vmem:[%s5201_s2 + $0x10] sm:$0xff]  ;;  %v55_v10 = vld [vmem:[%s5200_s1 + $0x18] sm:$0xff]  ;;  %s2970_s2 = smov 127   ;;  %v261_v32 = vld [vmem:[%s5203_s4 + $0x28] sm:$0xff]  ;;  %s2974_s21 = smov 124  }
   0x6   :  { %v54_v9 = vld [vmem:[%s5200_s1 + $0x10] sm:$0xff]  ;;  %s2971_s1 = smov 1   ;;  %v259_v33 = vld [vmem:[%s5203_s4 + $0x18] sm:$0xff]  ;;  %v256_v35 = vld [vmem:[%s5203_s4] sm:$0xff]  ;;  %v3197_v49 = vand.u32 127, %v151_v48  ;;  %s2975_s22 = smov 4  }
   0x7   :  { %v262_v31 = vld [vmem:[%s5203_s4 + $0x30] sm:$0xff]  ;;  %v565_v36 = vld [vmem:[%s5205_s6 + $0x18] sm:$0xff]  ;;  %v563_v37 = vld [vmem:[%s5205_s6 + $0x8] sm:$0xff]  ;;  %s2976_s19 = smov 120   ;;  %s2978_s26 = smov [#allocation4]  }
   0x8   :  { %v258_v34 = vld [vmem:[%s5203_s4 + $0x10] sm:$0xff]  ;;  %v562_v38 = vld [vmem:[%s5205_s6] sm:$0xff]  ;;  %v3149_v40 = vld [vmem:[%s5199_s0 + $0x48] sm:$0xff]  ;;  %v153_v51 = vadd.s32 128, %v3197_v49  ;;  %vm213_vm1 = vcmp.lt.s32.totalorder %v3197_v49, 127  ;;  %vm178_vm3 = vcmp.ge.s32.totalorder %v3197_v49, 1 }
   0x9   :  { %v3144_v39 = vld [vmem:[%s5199_s0 + $0x40] sm:$0xff]  ;;  %v3154_v41 = vld [vmem:[%s5199_s0 + $0x30] sm:$0xff]  ;;  %v3161_v42 = vld [vmem:[%s5199_s0 + $0x38] sm:$0xff]  ;;  %345 = vmatpush.msrb.mxu1 %v3149_v40  ;;  %2685 = vmatpush.msra.mxu3 %v3149_v40  ;;  %vm196_vm4 = vcmp.lt.s32.totalorder %v3197_v49, 1  ;;  %s2400_s14 = sshll.u32 %s5210_s11, 4  ;;  %s2401_s14 = int_to_ptr.hbm [resolvable:$true] %s2400_s14 }
   0xa   :  { %304 = vmatpush.msrb.mxu0 %v3144_v39  ;;  %2669 = vmatpush.msra.mxu2 %v3144_v39  ;;  %v3168_v43 = vld [vmem:[%s5199_s0 + $0x20] sm:$0xff]  ;;  %v3175_v44 = vld [vmem:[%s5199_s0 + $0x28] sm:$0xff]  ;;  %v3182_v45 = vld [vmem:[%s5199_s0 + $0x10] sm:$0xff]  ;;  %v3200_v52 = vand.u32 127, %v153_v51 }
   0xb   :  { %2428 = vmatmul.msk.f32.gmra.mxu0 %vm80_vm0, %v53_v6  ;;  %2432 = vmatmul.msk.f32.gmra.mxu1 %vm80_vm0, %v53_v6  ;;  %v3189_v46 = vld [vmem:[%s5199_s0 + $0x18] sm:$0xff] }
   0xc   :  { %62 = vperm.xlu1 %2715, %v56_v7   ;;  %72 = vperm.xlu0 %2714, %v58_v8   ;;  %vm214_vm2 = vcmp.lt.s32.totalorder %v3200_v52, 127  ;;  %vm179_vm5 = vcmp.ge.s32.totalorder %v3200_v52, 1 }
   0xd   :  { %305 = vmatpush.msrb.mxu0 %v3154_v41  ;;  %2670 = vmatpush.msra.mxu2 %v3154_v41 }
   0xe   :  { %346 = vmatpush.msrb.mxu1 %v3161_v42  ;;  %2686 = vmatpush.msra.mxu3 %v3161_v42 }
   0xf   :  { %306 = vmatpush.msrb.mxu0 %v3168_v43  ;;  %2671 = vmatpush.msra.mxu2 %v3168_v43 }
  0x10   :  { %347 = vmatpush.msrb.mxu1 %v3175_v44  ;;  %2687 = vmatpush.msra.mxu3 %v3175_v44 }
  0x11   :  { %2672 = vmatpush.msra.mxu2 %v3182_v45  ;;  %307 = vmatpush.msrb.mxu0 %v3182_v45 }
  0x12   :  { %348 = vmatpush.msrb.mxu1 %v3189_v46  ;;  %2688 = vmatpush.msra.mxu3 %v3189_v46 }
  0x13   :  { %2429 = vmatmul.msk.f32.gmra.mxu0 %vm80_vm0, %v54_v9  ;;  %2433 = vmatmul.msk.f32.gmra.mxu1 %vm80_vm0, %v54_v9 }
  0x1b   :  { %2430 = vmatmul.msk.f32.gmra.mxu0 %vm80_vm0, %v55_v10  ;;  %2434 = vmatmul.msk.f32.gmra.mxu1 %vm80_vm0, %v55_v10 }
  0x76   :  { %v68_v11 = vpop.permute.xlu1 %67  ;;  %v78_v16 = vpop.permute.xlu0 %77 }
  0x7e   :  { %v63_v12 = vpop.permute.xlu1 %62  ;;  %v73_v21 = vpop.permute.xlu0 %72 }
  0x80   :  { %v110_v13 = vpop.f32.mrf.mxu0  ;;  %v139_v14 = vpop.f32.mrf.mxu1 }
  0x81   :  { %v3085_v15 = vadd.f32 %v110_v13, %v63_v12  ;;  %v3110_v30 = vadd.f32 %v139_v14, %v63_v12  ;;  %v263_v14 = vld [vmem:[%s5203_s4 + $0x38] sm:$0xff] }
  0x83   :  { %215 = vrot.lane.b32.xlu1 %v3085_v15, %s2970_s2 }
  0x88   :  { %v113_v17 = vpop.f32.mrf.mxu0  ;;  %v142_v18 = vpop.f32.mrf.mxu1 }
  0x89   :  { %v3088_v19 = vadd.f32 %v113_v17, %v68_v11  ;;  %v3090_v20 = vadd.f32 %v142_v18, %v68_v11 }
  0x8b   :  { %225 = vrot.lane.b32.xlu0 %v3090_v20, %s2970_s2  ;;  %217 = vrot.lane.b32.xlu2 %v3088_v19, %s2970_s2 }
  0x90   :  { %v116_v22 = vpop.f32.mrf.mxu0  ;;  %v145_v23 = vpop.f32.mrf.mxu1 }
  0x91   :  { %v3094_v24 = vadd.f32 %v116_v22, %v73_v21  ;;  %v3096_v25 = vadd.f32 %v145_v23, %v73_v21  ;;  %v248_v23 = vld [vmem:[%s5202_s3] sm:$0xff] }
  0x93   :  { %219 = vrot.lane.b32.xlu0 %v3094_v24, %s2970_s2  ;;  %227 = vrot.lane.b32.xlu1 %v3096_v25, %s2970_s2 }
  0x98   :  { %v119_v26 = vpop.f32.mrf.mxu0  ;;  %v148_v28 = vpop.f32.mrf.mxu1 }
  0x99   :  { %v3100_v27 = vadd.f32 %v119_v26, %v78_v16  ;;  %v3105_v29 = vadd.f32 %v148_v28, %v78_v16  ;;  %v249_v26 = vld [vmem:[%s5202_s3 + $0x8] sm:$0xff]  ;;  %v260_v28 = vld [vmem:[%s5203_s4 + $0x20] sm:$0xff] }
  0x9b   :  { %192 = vrot.lane.b32.xlu0 %v3096_v25, %s2971_s1  ;;  %221 = vrot.lane.b32.xlu2 %v3100_v27, %s2970_s2 }
  0x9c   :  { %182 = vrot.lane.b32.xlu1 %v3088_v19, %s2971_s1 }
  0xa3   :  { %186 = vrot.lane.b32.xlu0 %v3100_v27, %s2971_s1  ;;  %229 = vrot.lane.b32.xlu2 %v3105_v29, %s2970_s2 }
  0xa4   :  { %194 = vrot.lane.b32.xlu1 %v3105_v29, %s2971_s1 }
  0xab   :  { %223 = vrot.lane.b32.xlu2 %v3110_v30, %s2970_s2  ;;  %180 = vrot.lane.b32.xlu0 %v3085_v15, %s2971_s1 }
  0xac   :  { %188 = vrot.lane.b32.xlu1 %v3110_v30, %s2971_s1 }
  0xb3   :  { %184 = vrot.lane.b32.xlu2 %v3094_v24, %s2971_s1  ;;  %296 = vperm.xlu0 %2714, %v262_v31   ;;  %v250_v31 = vld [vmem:[%s5202_s3 + $0x10] sm:$0xff] }
  0xb4   :  { %291 = vperm.xlu1 %2715, %v261_v32   ;;  %v257_v32 = vld [vmem:[%s5203_s4 + $0x8] sm:$0xff] }
  0xbb   :  { %190 = vrot.lane.b32.xlu2 %v3090_v20, %s2971_s1  ;;  %281 = vperm.xlu0 %2714, %v259_v33   ;;  %v251_v33 = vld [vmem:[%s5202_s3 + $0x18] sm:$0xff] }
  0xbc   :  { %276 = vperm.xlu1 %2715, %v258_v34   ;;  %v564_v34 = vld [vmem:[%s5205_s6 + $0x10] sm:$0xff] }
  0xc3   :  { %266 = vperm.xlu0 %2714, %v256_v35   ;;  %301 = vperm.xlu2 %2716, %v263_v14   ;;  %v252_v35 = vld [vmem:[%s5202_s3 + $0x20] sm:$0xff] }
  0xc4   :  { %587 = vperm.xlu1 %2715, %v565_v36   ;;  %v253_v36 = vld [vmem:[%s5202_s3 + $0x28] sm:$0xff] }
  0xcb   :  { %577 = vperm.xlu0 %2714, %v563_v37   ;;  %286 = vperm.xlu2 %2716, %v260_v28   ;;  %v254_v37 = vld [vmem:[%s5202_s3 + $0x30] sm:$0xff] }
  0xcc   :  { %572 = vperm.xlu1 %2715, %v562_v38   ;;  %v255_v38 = vld [vmem:[%s5202_s3 + $0x38] sm:$0xff] }
  0xd3   :  { %271 = vperm.xlu2 %2716, %v257_v32  }
  0xdb   :  { %582 = vperm.xlu2 %2716, %v564_v34  }
  0xe5   :  { %v218_v47 = vpop.permute.xlu2 %217 }
  0xf5   :  { %v222_v50 = vpop.permute.xlu2 %221  ;;  %v216_v55 = vpop.permute.xlu1 %215 }
  0xfd   :  { %v226_v53 = vpop.permute.xlu0 %225  ;;  %v230_v54 = vpop.permute.xlu2 %229 }
  0xfe   :  { %v235_v56 = vsel %vm213_vm1, %v222_v50, %v230_v54  ;;  %v239_v57 = vsel %vm213_vm1, %v230_v54, %v222_v50  ;;  %v233_v63 = vsel %vm213_vm1, %v218_v47, %v226_v53  ;;  %v237_v0 = vsel %vm213_vm1, %v226_v53, %v218_v47 }
  0xff   :  { %2435 = vmatpush.msk.msrb.mxu0 %vm213_vm1, %v235_v56  ;;  %2673 = vmatpush.msk.msra.mxu2 %vm213_vm1, %v235_v56 }
 0x100   :  { %2443 = vmatpush.msk.msrb.mxu1 %vm214_vm2, %v239_v57  ;;  %2689 = vmatpush.msk.msra.mxu3 %vm214_vm2, %v239_v57 }
 0x105   :  { %v220_v58 = vpop.permute.xlu0 %219  ;;  %v224_v59 = vpop.permute.xlu2 %223 }
 0x106   :  { %v228_v60 = vpop.permute.xlu1 %227  ;;  %v232_v1 = vsel %vm213_vm1, %v216_v55, %v224_v59  ;;  %v236_v2 = vsel %vm213_vm1, %v224_v59, %v216_v55 }
 0x107   :  { %v234_v61 = vsel %vm213_vm1, %v220_v58, %v228_v60  ;;  %v238_v62 = vsel %vm213_vm1, %v228_v60, %v220_v58 }
 0x108   :  { %2436 = vmatpush.msk.msrb.mxu0 %vm213_vm1, %v234_v61  ;;  %2674 = vmatpush.msk.msra.mxu2 %vm213_vm1, %v234_v61 }
 0x109   :  { %2444 = vmatpush.msk.msrb.mxu1 %vm214_vm2, %v238_v62  ;;  %2690 = vmatpush.msk.msra.mxu3 %vm214_vm2, %v238_v62 }
 0x10a   :  { %2437 = vmatpush.msk.msrb.mxu0 %vm213_vm1, %v233_v63  ;;  %2675 = vmatpush.msk.msra.mxu2 %vm213_vm1, %v233_v63 }
 0x10b   :  { %2445 = vmatpush.msk.msrb.mxu1 %vm214_vm2, %v237_v0  ;;  %2691 = vmatpush.msk.msra.mxu3 %vm214_vm2, %v237_v0 }
 0x10c   :  { %2438 = vmatpush.msk.msrb.mxu0 %vm213_vm1, %v232_v1  ;;  %2676 = vmatpush.msk.msra.mxu2 %vm213_vm1, %v232_v1 }
 0x10d   :  { %2446 = vmatpush.msk.msrb.mxu1 %vm214_vm2, %v236_v2  ;;  %2692 = vmatpush.msk.msra.mxu3 %vm214_vm2, %v236_v2  ;;  %v193_v3 = vpop.permute.xlu0 %192  ;;  %v185_v4 = vpop.permute.xlu2 %184 }
 0x10e   :  { %312 = vmatpush.msrb.mxu0 %v3100_v27  ;;  %2677 = vmatpush.msra.mxu2 %v3100_v27  ;;  %v183_v5 = vpop.permute.xlu1 %182  ;;  %v203_v11 = vsel %vm196_vm4, %v193_v3, %v185_v4  ;;  %v199_v12 = vsel %vm196_vm4, %v185_v4, %v193_v3 }
 0x10f   :  { %353 = vmatpush.msrb.mxu1 %v3105_v29  ;;  %2693 = vmatpush.msra.mxu3 %v3105_v29 }
 0x110   :  { %313 = vmatpush.msrb.mxu0 %v3094_v24  ;;  %2678 = vmatpush.msra.mxu2 %v3094_v24 }
 0x111   :  { %354 = vmatpush.msrb.mxu1 %v3096_v25  ;;  %2694 = vmatpush.msra.mxu3 %v3096_v25 }
 0x112   :  { %314 = vmatpush.msrb.mxu0 %v3088_v19  ;;  %2679 = vmatpush.msra.mxu2 %v3088_v19 }
 0x113   :  { %355 = vmatpush.msrb.mxu1 %v3090_v20  ;;  %2695 = vmatpush.msra.mxu3 %v3090_v20 }
 0x114   :  { %315 = vmatpush.msrb.mxu0 %v3085_v15  ;;  %2680 = vmatpush.msra.mxu2 %v3085_v15 }
 0x115   :  { %356 = vmatpush.msrb.mxu1 %v3110_v30  ;;  %2696 = vmatpush.msra.mxu3 %v3110_v30  ;;  %v187_v6 = vpop.permute.xlu0 %186  ;;  %v191_v10 = vpop.permute.xlu2 %190 }
 0x116   :  { %v195_v7 = vpop.permute.xlu1 %194  ;;  %v202_v13 = vsel %vm196_vm4, %v191_v10, %v183_v5  ;;  %v198_v16 = vsel %vm196_vm4, %v183_v5, %v191_v10 }
 0x117   :  { %v204_v8 = vsel %vm196_vm4, %v195_v7, %v187_v6  ;;  %v200_v9 = vsel %vm196_vm4, %v187_v6, %v195_v7 }
 0x118   :  { %2439 = vmatpush.msk.msrb.mxu0 %vm178_vm3, %v204_v8  ;;  %2681 = vmatpush.msk.msra.mxu2 %vm178_vm3, %v204_v8 }
 0x119   :  { %2447 = vmatpush.msk.msrb.mxu1 %vm179_vm5, %v200_v9  ;;  %2697 = vmatpush.msk.msra.mxu3 %vm179_vm5, %v200_v9 }
 0x11a   :  { %2440 = vmatpush.msk.msrb.mxu0 %vm178_vm3, %v203_v11  ;;  %2682 = vmatpush.msk.msra.mxu2 %vm178_vm3, %v203_v11 }
 0x11b   :  { %2448 = vmatpush.msk.msrb.mxu1 %vm179_vm5, %v199_v12  ;;  %2698 = vmatpush.msk.msra.mxu3 %vm179_vm5, %v199_v12 }
 0x11c   :  { %2441 = vmatpush.msk.msrb.mxu0 %vm178_vm3, %v202_v13  ;;  %2683 = vmatpush.msk.msra.mxu2 %vm178_vm3, %v202_v13 }
 0x11d   :  { %2449 = vmatpush.msk.msrb.mxu1 %vm179_vm5, %v198_v16  ;;  %2699 = vmatpush.msk.msra.mxu3 %vm179_vm5, %v198_v16  ;;  %v181_v17 = vpop.permute.xlu0 %180 }
 0x11e   :  { %v189_v18 = vpop.permute.xlu1 %188 }
 0x11f   :  { %v201_v21 = vsel %vm196_vm4, %v189_v18, %v181_v17  ;;  %v197_v22 = vsel %vm196_vm4, %v181_v17, %v189_v18 }
 0x120   :  { %2442 = vmatpush.msk.msrb.mxu0 %vm178_vm3, %v201_v21  ;;  %2684 = vmatpush.msk.msra.mxu2 %vm178_vm3, %v201_v21 }
 0x121   :  { %2450 = vmatpush.msk.msrb.mxu1 %vm179_vm5, %v197_v22  ;;  %2700 = vmatpush.msk.msra.mxu3 %vm179_vm5, %v197_v22 }
 0x122   :  { %320 = vmatmul.f32.vlgmr.msrb.gmra.mxu0 %v248_v23  ;;  %323 = vmatmul.f32.vlgmr.msra.gmra.mxu2 %v249_v26 }
 0x123   :  { %361 = vmatmul.f32.vlgmr.msrb.gmra.mxu1 %v248_v23  ;;  %364 = vmatmul.f32.vlgmr.msra.gmra.mxu3 %v249_v26 }
 0x124   :  { %861 = vmatpush.msrb.mxu2 %v3144_v39  ;;  %902 = vmatpush.msrb.mxu3 %v3149_v40 }
 0x126   :  { %862 = vmatpush.msrb.mxu2 %v3154_v41  ;;  %903 = vmatpush.msrb.mxu3 %v3161_v42  ;;  %v292_v56 = vpop.permute.xlu1 %291 }
 0x128   :  { %863 = vmatpush.msrb.mxu2 %v3168_v43  ;;  %904 = vmatpush.msrb.mxu3 %v3175_v44  ;;  %v302_v43 = vpop.permute.xlu2 %301 }
 0x12a   :  { %326 = vmatmul.f32.gmra.mxu2 %v250_v31  ;;  %905 = vmatpush.msrb.mxu3 %v3189_v46 }
 0x12b   :  { %367 = vmatmul.f32.gmra.mxu3 %v250_v31  ;;  %864 = vmatpush.msrb.mxu2 %v3182_v45  ;;  %v297_v45 = vpop.permute.xlu0 %296 }
 0x12e   :  { %v277_v17 = vpop.permute.xlu1 %276 }
 0x130   :  { %v287_v47 = vpop.permute.xlu2 %286 }
 0x132   :  { %329 = vmatmul.f32.gmra.mxu2 %v251_v33 }
 0x133   :  { %370 = vmatmul.f32.gmra.mxu3 %v251_v33  ;;  %v3369_v53 = vpop.permute.xlu0 %281 }
 0x138   :  { %v272_v8 = vpop.permute.xlu2 %271 }
 0x13a   :  { %332 = vmatmul.f32.gmra.mxu2 %v252_v35 }
 0x13b   :  { %373 = vmatmul.f32.gmra.mxu3 %v252_v35  ;;  %v267_v2 = vpop.permute.xlu0 %266 }
 0x142   :  { %335 = vmatmul.f32.gmra.mxu2 %v253_v36 }
 0x143   :  { %376 = vmatmul.f32.gmra.mxu3 %v253_v36 }
 0x14a   :  { %338 = vmatmul.f32.gmra.mxu2 %v254_v37 }
 0x14b   :  { %379 = vmatmul.f32.gmra.mxu3 %v254_v37 }
 0x152   :  { %341 = vmatmul.f32.gmra.mxu2 %v255_v38 }
 0x153   :  { %382 = vmatmul.f32.gmra.mxu3 %v255_v38 }
 0x19f   :  { %v321_v62 = vpop.f32.mrf.mxu0 }
 0x1a0   :  { %v362_v3 = vpop.f32.mrf.mxu1  ;;  %v322_v4 = vadd.f32 %v321_v62, %v267_v2 }
 0x1a1   :  { %v363_v6 = vadd.f32 %v362_v3, %v267_v2 }
 0x1a5   :  { %v324_v39 = vpop.f32.mrf.mxu2 }
 0x1a6   :  { %v365_v40 = vpop.f32.mrf.mxu3  ;;  %v325_v11 = vadd.f32 %v324_v39, %v272_v8 }
 0x1a7   :  { %v366_v18 = vadd.f32 %v365_v40, %v272_v8 }
 0x1ad   :  { %v327_v41 = vpop.f32.mrf.mxu2 }
 0x1ae   :  { %v3363_v42 = vpop.f32.mrf.mxu3  ;;  %v328_v22 = vadd.f32 %v327_v41, %v277_v17 }
 0x1b5   :  { %v3365_v44 = vpop.f32.mrf.mxu2 }
 0x1b6   :  { %v3367_v46 = vpop.f32.mrf.mxu3 }
 0x1bd   :  { %v333_v48 = vpop.f32.mrf.mxu2 }
 0x1be   :  { %v334_v50 = vadd.f32 %v333_v48, %v287_v47  ;;  %v374_v51 = vpop.f32.mrf.mxu3 }
 0x1bf   :  { %v375_v55 = vadd.f32 %v374_v51, %v287_v47  ;;  %v369_v51 = vadd.f32 %v3363_v42, %v277_v17 }
 0x1c0   :  { %v2451_v54 = vmul.f32 -1.442695, %v334_v50 }
 0x1c1   :  { %v2452_v58 = vmul.f32 -1.442695, %v375_v55 }
 0x1c2   :  { %2717 = vpow2.f32 %v2451_v54 }
 0x1c3   :  { %2719 = vpow2.f32 %v2452_v58 }
 0x1c5   :  { %v336_v57 = vpop.f32.mrf.mxu2 }
 0x1c6   :  { %v337_v59 = vadd.f32 %v336_v57, %v292_v56  ;;  %v377_v60 = vpop.f32.mrf.mxu3  ;;  %v372_v57 = vadd.f32 %v3367_v46, %v3369_v53 }
 0x1c7   :  { %v378_v61 = vadd.f32 %v377_v60, %v292_v56 }
 0x1c8   :  { %v2453_v63 = vmul.f32 -1.442695, %v337_v59  ;;  %v2718_v0 = vpop.eup %2717 }
 0x1c9   :  { %v2454_v1 = vmul.f32 -1.442695, %v378_v61  ;;  %v3371_v5 = vadd.f32 1.0, %v2718_v0  ;;  %v2720_v13 = vpop.eup %2719 }
 0x1ca   :  { %2721 = vpow2.f32 %v2453_v63  ;;  %v3374_v26 = vadd.f32 1.0, %v2720_v13 }
 0x1cb   :  { %2723 = vpow2.f32 %v2454_v1  ;;  %vm431_vm6 = vweird.f32 %v3371_v5  ;;  %v437_v61 = vand.u32 2147483648, %v3371_v5  ;;  %v435_v3 = vand.u32 2147483647, %v3371_v5 }
 0x1cc   :  { %2725 = vtanh.f32 %v322_v4  ;;  %v450_v4 = vand.u32 2147483647, %v3374_v26 }
 0x1cd   :  { %v339_v7 = vpop.f32.mrf.mxu2  ;;  %2727 = vrcp.f32 %v3371_v5  ;;  %vm3518_vm4 = vcmp.eq.f32.partialorder %v435_v3, 8.507059e+37 }
 0x1ce   :  { %v340_v9 = vadd.f32 %v339_v7, %v297_v45  ;;  %v380_v10 = vpop.f32.mrf.mxu3  ;;  %2729 = vtanh.f32 %v363_v6  ;;  %v452_v6 = vand.u32 2147483648, %v3374_v26 }
 0x1cf   :  { %v381_v12 = vadd.f32 %v380_v10, %v297_v45 }
 0x1d0   :  { %v2455_v14 = vmul.f32 -1.442695, %v340_v9  ;;  %v2722_v16 = vpop.eup %2721 }
 0x1d1   :  { %v2456_v21 = vmul.f32 -1.442695, %v381_v12  ;;  %v2724_v23 = vpop.eup %2723  ;;  %v3376_v28 = vadd.f32 1.0, %v2722_v16 }
 0x1d2   :  { %2731 = vpow2.f32 %v2455_v14  ;;  %v3378_v31 = vpop.eup %2725  ;;  %v3380_v32 = vadd.f32 1.0, %v2724_v23  ;;  %v3443_v14 = vor.u32 1.1754944e-38, %v437_v61 }
 0x1d3   :  { %2733 = vtanh.f32 %v325_v11  ;;  %v3382_v34 = vpop.eup %2727  ;;  %v467_v9 = vand.u32 2147483648, %v3376_v28  ;;  %vm461_vm8 = vweird.f32 %v3376_v28 }
 0x1d4   :  { %2735 = vpow2.f32 %v2456_v21  ;;  %v3384_v37 = vpop.eup %2729  ;;  %v427_v48 = vmul.f32 %v3382_v34, %v3371_v5  ;;  %vm432_vm7 = vweird.f32 %v3382_v34 }
 0x1d5   :  { %2737 = vtanh.f32 %v366_v18  ;;  %v342_v33 = vpop.f32.mrf.mxu2  ;;  %vm3468_vm10 = vmor %vm431_vm6, %vm432_vm7 }
 0x1d6   :  { %2739 = vtanh.f32 %v328_v22  ;;  %v343_v35 = vadd.f32 %v342_v33, %v302_v43  ;;  %v383_v36 = vpop.f32.mrf.mxu3  ;;  %v428_v42 = vsub.f32 1.0, %v427_v48 }
 0x1d7   :  { %2741 = vrcp.f32 %v3374_v26  ;;  %v384_v38 = vadd.f32 %v383_v36, %v302_v43  ;;  %v331_v43 = vadd.f32 %v3365_v44, %v3369_v53 }
 0x1d8   :  { %v2732_v39 = vpop.eup %2731  ;;  %2743 = vrcp.f32 %v3376_v28  ;;  %v2457_v40 = vmul.f32 -1.442695, %v343_v35  ;;  %v429_v63 = vmul.f32 %v3382_v34, %v428_v42  ;;  %v465_v35 = vand.u32 2147483647, %v3376_v28 }
 0x1d9   :  { %v3388_v41 = vpop.eup %2733  ;;  %2745 = vrcp.f32 %v3380_v32  ;;  %v3391_v45 = vadd.f32 1.0, %v2732_v39  ;;  %v2458_v47 = vmul.f32 -1.442695, %v384_v38  ;;  %v3457_v38 = vor.u32 1.1754944e-38, %v467_v9 }
 0x1da   :  { %v2736_v50 = vpop.eup %2735  ;;  %2747 = vpow2.f32 %v2457_v40  ;;  %v3449_v18 = vadd.f32 %v3382_v34, %v429_v63  ;;  %v480_v40 = vand.u32 2147483647, %v3380_v32  ;;  %vm3498_vm3 = vcmp.eq.f32.partialorder %v465_v35, 8.507059e+37 }
 0x1db   :  { %v3396_v54 = vpop.eup %2737  ;;  %2749 = vrcp.f32 %v3391_v45  ;;  %v3401_v55 = vadd.f32 1.0, %v2736_v50  ;;  %v495_v23 = vand.u32 2147483647, %v3391_v45  ;;  %v497_v36 = vand.u32 2147483648, %v3391_v45 }
 0x1dc   :  { %v3403_v56 = vpop.eup %2739  ;;  %2751 = vpow2.f32 %v2458_v47  ;;  %v482_v50 = vand.u32 2147483648, %v3380_v32  ;;  %vm491_vm11 = vweird.f32 %v3391_v45  ;;  %v434_v42 = vsel %vm3468_vm10, %v3382_v34, %v3449_v18 }
 0x1dd   :  { %v3407_v58 = vpop.eup %2741  ;;  %2753 = vrcp.f32 %v3401_v55  ;;  %v510_v48 = vand.u32 2147483647, %v3401_v55  ;;  %vm3481_vm13 = vcmp.eq.f32.partialorder %v495_v23, 8.507059e+37  ;;  %vm506_vm14 = vweird.f32 %v3401_v55 }
 0x1de   :  { %v3410_v59 = vpop.eup %2743  ;;  %2755 = vtanh.f32 %v369_v51  ;;  %v442_v0 = vmul.f32 %v3407_v58, %v3374_v26  ;;  %vm5214_vm10 = vcmask 261120   ;;  %v578_v51 = vpop.permute.xlu0 %577 }
 0x1df   :  { %v3412_v60 = vpop.eup %2745  ;;  %2757 = vtanh.f32 %v331_v43  ;;  %v457_v53 = vmul.f32 %v3410_v59, %v3376_v28  ;;  %vm462_vm9 = vweird.f32 %v3410_v59  ;;  %vm3494_vm2 = vcmp.eq.f32.partialorder %v510_v48, 8.507059e+37 }
 0x1e0   :  { %v2748_v44 = vpop.eup %2747  ;;  %2759 = vtanh.f32 %v372_v57  ;;  %v472_v10 = vmul.f32 %v3412_v60, %v3380_v32  ;;  %v443_v21 = vsub.f32 1.0, %v442_v0  ;;  %vm477_vm0 = vweird.f32 %v3412_v60  ;;  %vm3512_vm7 = vmor %vm461_vm8, %vm462_vm9 }
 0x1e1   :  { %v3416_v62 = vpop.eup %2749  ;;  %v3418_v46 = vadd.f32 1.0, %v2748_v44  ;;  %v458_v17 = vsub.f32 1.0, %v457_v53  ;;  %v483_v53 = vor.u32 1.1754944e-38, %v482_v50 }
 0x1e2   :  { %v2752_v1 = vpop.eup %2751  ;;  %v487_v2 = vmul.f32 %v3416_v62, %v3391_v45  ;;  %v473_v39 = vsub.f32 1.0, %v472_v10  ;;  %v444_v44 = vmul.f32 %v3407_v58, %v443_v21  ;;  %vm492_vm1 = vweird.f32 %v3416_v62 }
 0x1e3   :  { %v3430_v7 = vpop.eup %2753  ;;  %2761 = vrcp.f32 %v3418_v46  ;;  %v3433_v8 = vadd.f32 1.0, %v2752_v1  ;;  %v459_v57 = vmul.f32 %v3410_v59, %v458_v17  ;;  %v498_v1 = vor.u32 1.1754944e-38, %v497_v36  ;;  %vm3529_vm8 = vmor %vm491_vm11, %vm492_vm1 }
 0x1e4   :  { %v3438_v11 = vpop.eup %2755  ;;  %v488_v12 = vsub.f32 1.0, %v487_v2  ;;  %v502_v13 = vmul.f32 %v3430_v7, %v3401_v55  ;;  %v512_v2 = vand.u32 2147483648, %v3401_v55  ;;  %v474_v9 = vmul.f32 %v3412_v60, %v473_v39 }
 0x1e5   :  { %v3445_v16 = vpop.eup %2757  ;;  %2763 = vrcp.f32 %v3433_v8  ;;  %v525_v23 = vand.u32 2147483647, %v3418_v46  ;;  %vm507_vm5 = vweird.f32 %v3430_v7  ;;  %v460_v36 = vadd.f32 %v3410_v59, %v459_v57 }
 0x1e6   :  { %v3451_v22 = vpop.eup %2759  ;;  %v503_v33 = vsub.f32 1.0, %v502_v13  ;;  %v489_v47 = vmul.f32 %v3416_v62, %v488_v12  ;;  %vm521_vm15 = vweird.f32 %v3418_v46  ;;  %v540_v57 = vand.u32 2147483647, %v3433_v8  ;;  %vm3541_vm12 = vmor %vm506_vm14, %vm507_vm5 }
 0x1e7   :  { %v475_v5 = vadd.f32 %v3412_v60, %v474_v9  ;;  %vm526_vm1 = vcmp.eq.f32.partialorder %v525_v23, 8.507059e+37  ;;  %v464_v9 = vsel %vm3512_vm7, %v3410_v59, %v460_v36  ;;  %vm5232_vm14 = vweird.f32 %v3380_v32 }
 0x1e8   :  { %v504_v63 = vmul.f32 %v3430_v7, %v503_v33  ;;  %v490_v13 = vadd.f32 %v3416_v62, %v489_v47  ;;  %v527_v33 = vand.u32 2147483648, %v3418_v46  ;;  %vm768_vm7 = vcmp.lt.s32.totalorder %v3197_v49, 126 }
 0x1e9   :  { %v2762_v43 = vpop.eup %2761 }
 0x1ea   :  { %v517_v61 = vmul.f32 %v2762_v43, %v3418_v46  ;;  %vm522_vm6 = vweird.f32 %v2762_v43  ;;  %v505_v48 = vadd.f32 %v3430_v7, %v504_v63  ;;  %v542_v63 = vand.u32 2147483648, %v3433_v8 }
 0x1eb   :  { %v2764_v0 = vpop.eup %2763  ;;  %v494_v46 = vsel %vm3529_vm8, %v3416_v62, %v490_v13  ;;  %vm523_vm11 = vmor %vm521_vm15, %vm522_vm6  ;;  %v528_v45 = vor.u32 1.1754944e-38, %v527_v33  ;;  %vm536_vm8 = vweird.f32 %v3433_v8  ;;  %vm541_vm6 = vcmp.eq.f32.partialorder %v540_v57, 8.507059e+37  ;;  %v2485_v62 = vld [vmem:[%s5203_s4 + $0x50] sm:$0xff] }
 0x1ec   :  { %v518_v10 = vsub.f32 1.0, %v517_v61  ;;  %v532_v12 = vmul.f32 %v2764_v0, %v3433_v8  ;;  %vm537_vm9 = vweird.f32 %v2764_v0  ;;  %v509_v55 = vsel %vm3541_vm12, %v3430_v7, %v505_v48  ;;  %vm3557_vm15 = vmor %vm5232_vm14, %vm477_vm0 }
 0x1ed   :  { %vm538_vm5 = vmor %vm536_vm8, %vm537_vm9  ;;  %v543_v59 = vor.u32 1.1754944e-38, %v542_v63  ;;  %v479_v7 = vsel %vm3557_vm15, %v3412_v60, %v475_v5  ;;  %v469_v48 = vsel %vm3498_vm3, %v3457_v38, %v464_v9  ;;  %vm5235_vm12 = vweird.f32 %v3407_v58 }
 0x1ee   :  { %v533_v39 = vsub.f32 1.0, %v532_v12  ;;  %v519_v47 = vmul.f32 %v2762_v43, %v518_v10  ;;  %v439_v38 = vsel %vm3518_vm4, %v3443_v14, %v434_v42  ;;  %vm451_vm3 = vcmp.eq.f32.partialorder %v450_v4, 8.507059e+37 }
 0x1ef   :  { %v546_v18 = vmul.f32 %v3378_v31, %v439_v38  ;;  %v556_v31 = vld [vmem:[%s5204_s5 + $0x10] sm:$0xff]  ;;  %vm769_vm4 = vcmp.lt.s32.totalorder %v3200_v52, 126  ;;  %vm751_vm9 = vcmp.lt.s32.totalorder %v3197_v49, 2 }
 0x1f0   :  { %v520_v3 = vadd.f32 %v2762_v43, %v519_v47  ;;  %v534_v10 = vmul.f32 %v2764_v0, %v533_v39  ;;  %v445_v39 = vadd.f32 %v3407_v58, %v444_v44  ;;  %v513_v44 = vor.u32 1.1754944e-38, %v512_v2 }
 0x1f2   :  { %v524_v47 = vsel %vm523_vm11, %v2762_v43, %v520_v3  ;;  %v535_v28 = vadd.f32 %v2764_v0, %v534_v10  ;;  %v499_v43 = vsel %vm3481_vm13, %v498_v1, %v494_v46  ;;  %v514_v36 = vsel %vm3494_vm2, %v513_v44, %v509_v55  ;;  %v2483_v55 = vld [vmem:[%s5203_s4 + $0x40] sm:$0xff]  ;;  %v2525_v44 = vld [vmem:[%s5205_s6 + $0x50] sm:$0xff] }
 0x1f3   :  { %v529_v13 = vsel %vm526_vm1, %v528_v45, %v524_v47  ;;  %vm5236_vm13 = vweird.f32 %v3374_v26  ;;  %v550_v60 = vmul.f32 %v3403_v56, %v499_v43  ;;  %vm481_vm2 = vcmp.eq.f32.partialorder %v480_v40, 8.507059e+37  ;;  %v555_v26 = vld [vmem:[%s5204_s5 + $0x8] sm:$0xff]  ;;  %v2526_v43 = vld [vmem:[%s5205_s6 + $0x58] sm:$0xff] }
 0x1f4   :  { %v552_v8 = vmul.f32 %v3445_v16, %v529_v13  ;;  %v539_v23 = vsel %vm538_vm5, %v2764_v0, %v535_v28  ;;  %vm448_vm0 = vmor %vm5236_vm13, %vm5235_vm12  ;;  %v484_v1 = vsel %vm481_vm2, %v483_v53, %v479_v7  ;;  %v551_v32 = vmul.f32 %v3438_v11, %v514_v36  ;;  %v2488_v47 = vld [vmem:[%s5203_s4 + $0x68] sm:$0xff]  ;;  %v2487_v28 = vld [vmem:[%s5203_s4 + $0x60] sm:$0xff] }
 0x1f5   :  { %v544_v33 = vsel %vm541_vm6, %v543_v59, %v539_v23  ;;  %v449_v0 = vsel %vm448_vm0, %v3407_v58, %v445_v39  ;;  %v548_v56 = vmul.f32 %v3388_v41, %v469_v48  ;;  %v549_v34 = vmul.f32 %v3396_v54, %v484_v1  ;;  %v588_v41 = vpop.permute.xlu1 %587  ;;  %v2484_v13 = vld [vmem:[%s5203_s4 + $0x48] sm:$0xff] }
 0x1f6   :  { %647 = vmatpush.msra.mxu0 %v552_v8  ;;  %v553_v16 = vmul.f32 %v3451_v22, %v544_v33  ;;  %v453_v22 = vor.u32 1.1754944e-38, %v452_v6  ;;  %v554_v6 = vld [vmem:[%s5204_s5] sm:$0xff]  ;;  %v2524_v59 = vld [vmem:[%s5205_s6 + $0x48] sm:$0xff]  ;;  %vm733_vm11 = vcmp.ge.s32.totalorder %v3197_v49, 2  ;;  %vm734_vm1 = vcmp.ge.s32.totalorder %v3200_v52, 2 }
 0x1f7   :  { %v2523_v8 = vld [vmem:[%s5205_s6 + $0x40] sm:$0xff] }
 0x1f8   :  { %688 = vmatpush.msra.mxu1 %v553_v16  ;;  %648 = vmatpush.msra.mxu0 %v550_v60  ;;  %v454_v58 = vsel %vm451_vm3, %v453_v22, %v449_v0 }
 0x1f9   :  { %v547_v11 = vmul.f32 %v3384_v37, %v454_v58  ;;  %v557_v37 = vld [vmem:[%s5204_s5 + $0x18] sm:$0xff] }
 0x1fa   :  { %689 = vmatpush.msra.mxu1 %v551_v32  ;;  %649 = vmatpush.msra.mxu0 %v548_v56 }
 0x1fc   :  { %690 = vmatpush.msra.mxu1 %v549_v34  ;;  %650 = vmatpush.msra.mxu0 %v546_v18 }
 0x1fd   :  { %2459 = vmatmul.msk.f32.vlgmr.msra.gmra.mxu0 %vm5214_vm10, %v554_v6  ;;  %v573_v54 = vpop.permute.xlu1 %572 }
 0x1fe   :  { %691 = vmatpush.msra.mxu1 %v547_v11 }
 0x1ff   :  { %2467 = vmatmul.msk.f32.vlgmr.msra.gmra.mxu1 %vm5214_vm10, %v554_v6 }
 0x205   :  { %2460 = vmatmul.msk.f32.gmra.mxu0 %vm5214_vm10, %v555_v26 }
 0x207   :  { %2468 = vmatmul.msk.f32.gmra.mxu1 %vm5214_vm10, %v555_v26 }
 0x20d   :  { %2461 = vmatmul.msk.f32.gmra.mxu0 %vm5214_vm10, %v556_v31 }
 0x20f   :  { %2469 = vmatmul.msk.f32.gmra.mxu1 %vm5214_vm10, %v556_v31 }
 0x215   :  { %2462 = vmatmul.msk.f32.gmra.mxu0 %vm5214_vm10, %v557_v37 }
 0x217   :  { %2470 = vmatmul.msk.f32.gmra.mxu1 %vm5214_vm10, %v557_v37 }
 0x27a   :  { %v652_v4 = vpop.f32.mrf.mxu0 }
 0x27b   :  { %v653_v14 = vadd.f32 %v652_v4, %v573_v54 }
 0x27c   :  { %v693_v40 = vpop.f32.mrf.mxu1 }
 0x27d   :  { %v3621_v50 = vadd.f32 %v653_v14, %v3085_v15  ;;  %v583_v15 = vpop.permute.xlu2 %582 }
 0x27f   :  { %770 = vrot.lane.b32.xlu2 %v3621_v50, %s2972_s27 }
 0x282   :  { %v655_v42 = vpop.f32.mrf.mxu0 }
 0x283   :  { %v656_v2 = vadd.f32 %v655_v42, %v578_v51 }
 0x284   :  { %v696_v17 = vpop.f32.mrf.mxu1 }
 0x285   :  { %v3626_v21 = vadd.f32 %v656_v2, %v3088_v19  ;;  %v697_v35 = vadd.f32 %v696_v17, %v578_v51  ;;  %v2475_v17 = vld [vmem:[%s5202_s3 + $0x40] sm:$0xff] }
 0x287   :  { %v3629_v61 = vadd.f32 %v697_v35, %v3090_v20  ;;  %772 = vrot.lane.b32.xlu0 %v3626_v21, %s2972_s27 }
 0x289   :  { %780 = vrot.lane.b32.xlu1 %v3629_v61, %s2972_s27 }
 0x28a   :  { %v658_v57 = vpop.f32.mrf.mxu0 }
 0x28b   :  { %v659_v63 = vadd.f32 %v658_v57, %v583_v15  ;;  %v3787_v57 = vld [vmem:[%s5199_s0 + $0x40] sm:$0xff] }
 0x28c   :  { %v699_v5 = vpop.f32.mrf.mxu1 }
 0x28d   :  { %v3636_v3 = vadd.f32 %v659_v63, %v3094_v24  ;;  %v700_v10 = vadd.f32 %v699_v5, %v583_v15  ;;  %v3793_v63 = vld [vmem:[%s5199_s0 + $0x48] sm:$0xff]  ;;  %v3799_v5 = vld [vmem:[%s5199_s0 + $0x30] sm:$0xff] }
 0x28f   :  { %v3639_v19 = vadd.f32 %v700_v10, %v3096_v25  ;;  %v694_v25 = vadd.f32 %v693_v40, %v573_v54  ;;  %v3805_v10 = vld [vmem:[%s5199_s0 + $0x38] sm:$0xff] }
 0x291   :  { %774 = vrot.lane.b32.xlu1 %v3636_v3, %s2972_s27  ;;  %782 = vrot.lane.b32.xlu2 %v3639_v19, %s2972_s27  ;;  %v3657_v39 = vadd.f32 %v694_v25, %v3110_v30  ;;  %v2486_v30 = vld [vmem:[%s5203_s4 + $0x58] sm:$0xff] }
 0x292   :  { %v661_v20 = vpop.f32.mrf.mxu0  ;;  %v3832_v25 = vld [vmem:[%s5199_s0 + $0x18] sm:$0xff] }
 0x293   :  { %v662_v46 = vadd.f32 %v661_v20, %v588_v41  ;;  %v2476_v20 = vld [vmem:[%s5202_s3 + $0x48] sm:$0xff]  ;;  %5239 = vst [vmem:[#allocation10_spill] sm:$0xff] %v3832_v25 }
 0x294   :  { %v702_v12 = vpop.f32.mrf.mxu1 }
 0x295   :  { %v703_v45 = vadd.f32 %v702_v12, %v588_v41  ;;  %v3646_v9 = vadd.f32 %v662_v46, %v3100_v27  ;;  %v2489_v27 = vld [vmem:[%s5203_s4 + $0x70] sm:$0xff]  ;;  %v3814_v46 = vld [vmem:[%s5199_s0 + $0x20] sm:$0xff]  ;;  %v3820_v12 = vld [vmem:[%s5199_s0 + $0x28] sm:$0xff] }
 0x296   :  { %5237 = vst [vmem:[#allocation8_spill] sm:$0xff] %v3820_v12 }
 0x297   :  { %v3649_v24 = vadd.f32 %v703_v45, %v3105_v29  ;;  %v2490_v29 = vld [vmem:[%s5203_s4 + $0x78] sm:$0xff]  ;;  %v3826_v45 = vld [vmem:[%s5199_s0 + $0x10] sm:$0xff] }
 0x298   :  { %5238 = vst [vmem:[#allocation9_spill] sm:$0xff] %v3826_v45 }
 0x299   :  { %747 = vrot.lane.b32.xlu1 %v3639_v19, %s2973_s28  ;;  %784 = vrot.lane.b32.xlu0 %v3649_v24, %s2972_s27 }
 0x29a   :  { %776 = vrot.lane.b32.xlu2 %v3646_v9, %s2972_s27 }
 0x2a1   :  { %741 = vrot.lane.b32.xlu1 %v3646_v9, %s2973_s28  ;;  %778 = vrot.lane.b32.xlu0 %v3657_v39, %s2972_s27  ;;  %s2979_s27 = smov 256  }
 0x2a2   :  { %737 = vrot.lane.b32.xlu2 %v3626_v21, %s2973_s28 }
 0x2a9   :  { %739 = vrot.lane.b32.xlu0 %v3636_v3, %s2973_s28  ;;  %735 = vrot.lane.b32.xlu1 %v3621_v50, %s2973_s28 }
 0x2aa   :  { %749 = vrot.lane.b32.xlu2 %v3649_v24, %s2973_s28 }
 0x2b1   :  { %745 = vrot.lane.b32.xlu0 %v3629_v61, %s2973_s28  ;;  %853 = vperm.xlu1 %2715, %v2489_v27   ;;  %v2477_v27 = vld [vmem:[%s5202_s3 + $0x50] sm:$0xff] }
 0x2b2   :  { %743 = vrot.lane.b32.xlu2 %v3657_v39, %s2973_s28  ;;  %s2980_s28 = smov 16  }
 0x2b9   :  { %858 = vperm.xlu0 %2714, %v2490_v29   ;;  %838 = vperm.xlu1 %2715, %v2486_v30   ;;  %v2478_v29 = vld [vmem:[%s5202_s3 + $0x58] sm:$0xff]  ;;  %v2479_v30 = vld [vmem:[%s5202_s3 + $0x60] sm:$0xff] }
 0x2ba   :  { %848 = vperm.xlu2 %2716, %v2488_v47   ;;  %v2480_v47 = vld [vmem:[%s5202_s3 + $0x68] sm:$0xff] }
 0x2c1   :  { %843 = vperm.xlu0 %2714, %v2487_v28   ;;  %823 = vperm.xlu1 %2715, %v2483_v55   ;;  %v2481_v28 = vld [vmem:[%s5202_s3 + $0x70] sm:$0xff]  ;;  %v2482_v55 = vld [vmem:[%s5202_s3 + $0x78] sm:$0xff] }
 0x2c2   :  { %833 = vperm.xlu2 %2716, %v2485_v62  }
 0x2c9   :  { %828 = vperm.xlu0 %2714, %v2484_v13   ;;  %1136 = vperm.xlu1 %2715, %v2524_v59  }
 0x2ca   :  { %1146 = vperm.xlu2 %2716, %v2526_v43  }
 0x2d1   :  { %1141 = vperm.xlu0 %2714, %v2525_v44  }
 0x2d2   :  { %1131 = vperm.xlu2 %2716, %v2523_v8  }
 0x2d9   :  { %v771_v23 = vpop.permute.xlu2 %770 }
 0x2eb   :  { %v783_v33 = vpop.permute.xlu2 %782 }
 0x2f4   :  { %v777_v53 = vpop.permute.xlu2 %776 }
 0x2f9   :  { %v773_v36 = vpop.permute.xlu0 %772 }
 0x2fb   :  { %v781_v7 = vpop.permute.xlu1 %780 }
 0x2fc   :  { %v788_v32 = vsel %vm768_vm7, %v773_v36, %v781_v7  ;;  %v792_v56 = vsel %vm768_vm7, %v781_v7, %v773_v36  ;;  %v738_v58 = vpop.permute.xlu2 %737 }
 0x303   :  { %v775_v48 = vpop.permute.xlu1 %774 }
 0x304   :  { %v789_v1 = vsel %vm768_vm7, %v775_v48, %v783_v33  ;;  %v793_v38 = vsel %vm768_vm7, %v783_v33, %v775_v48  ;;  %v750_v26 = vpop.permute.xlu2 %749 }
 0x30b   :  { %v785_v16 = vpop.permute.xlu0 %784  ;;  %v748_v22 = vpop.permute.xlu1 %747 }
 0x30c   :  { %v790_v60 = vsel %vm768_vm7, %v777_v53, %v785_v16  ;;  %v794_v0 = vsel %vm768_vm7, %v785_v16, %v777_v53  ;;  %v744_v2 = vpop.permute.xlu2 %743 }
 0x30d   :  { %2491 = vmatpush.msk.msrb.mxu2 %vm768_vm7, %v790_v60  ;;  %2499 = vmatpush.msk.msrb.mxu3 %vm769_vm4, %v794_v0 }
 0x30f   :  { %2492 = vmatpush.msk.msrb.mxu2 %vm768_vm7, %v789_v1  ;;  %2500 = vmatpush.msk.msrb.mxu3 %vm769_vm4, %v793_v38 }
 0x311   :  { %2493 = vmatpush.msk.msrb.mxu2 %vm768_vm7, %v788_v32  ;;  %2501 = vmatpush.msk.msrb.mxu3 %vm769_vm4, %v792_v56 }
 0x313   :  { %v779_v34 = vpop.permute.xlu0 %778  ;;  %v742_v11 = vpop.permute.xlu1 %741 }
 0x314   :  { %v787_v18 = vsel %vm768_vm7, %v771_v23, %v779_v34  ;;  %v791_v6 = vsel %vm768_vm7, %v779_v34, %v771_v23  ;;  %v759_v37 = vsel %vm751_vm9, %v750_v26, %v742_v11  ;;  %v755_v41 = vsel %vm751_vm9, %v742_v11, %v750_v26  ;;  %v849_v32 = vpop.permute.xlu2 %848 }
 0x315   :  { %2494 = vmatpush.msk.msrb.mxu2 %vm768_vm7, %v787_v18  ;;  %2502 = vmatpush.msk.msrb.mxu3 %vm769_vm4, %v791_v6  ;;  %v558_v6 = vld [vmem:[%s5204_s5 + $0x20] sm:$0xff] }
 0x316   :  { %2463 = vmatmul.msk.f32.gmra.mxu0 %vm5214_vm10, %v558_v6  ;;  %2471 = vmatmul.msk.f32.gmra.mxu1 %vm5214_vm10, %v558_v6 }
 0x317   :  { %869 = vmatpush.msrb.mxu2 %v3646_v9  ;;  %910 = vmatpush.msrb.mxu3 %v3649_v24 }
 0x319   :  { %870 = vmatpush.msrb.mxu2 %v3636_v3  ;;  %911 = vmatpush.msrb.mxu3 %v3639_v19 }
 0x31b   :  { %v740_v31 = vpop.permute.xlu0 %739  ;;  %871 = vmatpush.msrb.mxu2 %v3626_v21  ;;  %912 = vmatpush.msrb.mxu3 %v3629_v61  ;;  %v736_v14 = vpop.permute.xlu1 %735 }
 0x31c   :  { %v758_v54 = vsel %vm751_vm9, %v748_v22, %v740_v31  ;;  %v754_v4 = vsel %vm751_vm9, %v740_v31, %v748_v22  ;;  %v756_v35 = vsel %vm751_vm9, %v744_v2, %v736_v14  ;;  %v752_v15 = vsel %vm751_vm9, %v736_v14, %v744_v2 }
 0x31d   :  { %872 = vmatpush.msrb.mxu2 %v3621_v50  ;;  %913 = vmatpush.msrb.mxu3 %v3657_v39 }
 0x31f   :  { %2495 = vmatpush.msk.msrb.mxu2 %vm733_vm11, %v759_v37  ;;  %2503 = vmatpush.msk.msrb.mxu3 %vm734_vm1, %v755_v41 }
 0x321   :  { %2496 = vmatpush.msk.msrb.mxu2 %vm733_vm11, %v758_v54  ;;  %2504 = vmatpush.msk.msrb.mxu3 %vm734_vm1, %v754_v4 }
 0x323   :  { %v746_v40 = vpop.permute.xlu0 %745  ;;  %v854_v36 = vpop.permute.xlu1 %853 }
 0x324   :  { %v757_v51 = vsel %vm751_vm9, %v746_v40, %v738_v58  ;;  %v753_v42 = vsel %vm751_vm9, %v738_v58, %v746_v40 }
 0x325   :  { %2497 = vmatpush.msk.msrb.mxu2 %vm733_vm11, %v757_v51  ;;  %2505 = vmatpush.msk.msrb.mxu3 %vm734_vm1, %v753_v42 }
 0x327   :  { %2498 = vmatpush.msk.msrb.mxu2 %vm733_vm11, %v756_v35  ;;  %2506 = vmatpush.msk.msrb.mxu3 %vm734_vm1, %v752_v15 }
 0x328   :  { %877 = vmatmul.f32.vlgmr.msrb.gmra.mxu2 %v2475_v17  ;;  %918 = vmatmul.f32.vlgmr.msrb.gmra.mxu3 %v2475_v17  ;;  %v559_v17 = vld [vmem:[%s5204_s5 + $0x28] sm:$0xff] }
 0x329   :  { %1419 = vmatpush.msra.mxu2 %v3787_v57  ;;  %1460 = vmatpush.msra.mxu3 %v3793_v63 }
 0x32a   :  { %2464 = vmatmul.msk.f32.gmra.mxu0 %vm5214_vm10, %v559_v17  ;;  %2472 = vmatmul.msk.f32.gmra.mxu1 %vm5214_vm10, %v559_v17 }
 0x32b   :  { %1420 = vmatpush.msra.mxu2 %v3799_v5  ;;  %1461 = vmatpush.msra.mxu3 %v3805_v10  ;;  %v3855_v23 = vpop.permute.xlu0 %858  ;;  %v3861_v1 = vpop.permute.xlu1 %838 }
 0x32d   :  { %1421 = vmatpush.msra.mxu2 %v3814_v46  ;;  %1462 = vmatpush.msra.mxu3 %v3820_v12 }
 0x32f   :  { %1422 = vmatpush.msra.mxu2 %v3826_v45  ;;  %1463 = vmatpush.msra.mxu3 %v3832_v25 }
 0x330   :  { %880 = vmatmul.f32.gmra.mxu2 %v2476_v20  ;;  %921 = vmatmul.f32.gmra.mxu3 %v2476_v20 }
 0x333   :  { %v844_v48 = vpop.permute.xlu0 %843  ;;  %v824_v37 = vpop.permute.xlu1 %823 }
 0x338   :  { %883 = vmatmul.f32.gmra.mxu2 %v2477_v27  ;;  %924 = vmatmul.f32.gmra.mxu3 %v2477_v27 }
 0x33b   :  { %v829_v15 = vpop.permute.xlu0 %828 }
 0x340   :  { %886 = vmatmul.f32.gmra.mxu2 %v2478_v29  ;;  %927 = vmatmul.f32.gmra.mxu3 %v2478_v29 }
 0x348   :  { %889 = vmatmul.f32.gmra.mxu2 %v2479_v30  ;;  %930 = vmatmul.f32.gmra.mxu3 %v2479_v30 }
 0x350   :  { %892 = vmatmul.f32.gmra.mxu2 %v2480_v47  ;;  %933 = vmatmul.f32.gmra.mxu3 %v2480_v47  ;;  %v834_v47 = vpop.permute.xlu2 %833 }
 0x358   :  { %895 = vmatmul.f32.gmra.mxu2 %v2481_v28  ;;  %936 = vmatmul.f32.gmra.mxu3 %v2481_v28 }
 0x360   :  { %898 = vmatmul.f32.gmra.mxu2 %v2482_v55  ;;  %939 = vmatmul.f32.gmra.mxu3 %v2482_v55 }
 0x3ab   :  { %v878_v62 = vpop.f32.mrf.mxu2  ;;  %v919_v13 = vpop.f32.mrf.mxu3 }
 0x3ac   :  { %v879_v41 = vadd.f32 %v878_v62, %v824_v37  ;;  %v920_v14 = vadd.f32 %v919_v13, %v824_v37 }
 0x3b3   :  { %v881_v59 = vpop.f32.mrf.mxu2  ;;  %v922_v43 = vpop.f32.mrf.mxu3 }
 0x3b4   :  { %v882_v30 = vadd.f32 %v881_v59, %v829_v15  ;;  %v923_v28 = vadd.f32 %v922_v43, %v829_v15  ;;  %v560_v59 = vld [vmem:[%s5204_s5 + $0x30] sm:$0xff] }
 0x3b5   :  { %2465 = vmatmul.msk.f32.gmra.mxu0 %vm5214_vm10, %v560_v59  ;;  %2473 = vmatmul.msk.f32.gmra.mxu1 %vm5214_vm10, %v560_v59 }
 0x3bb   :  { %v884_v44 = vpop.f32.mrf.mxu2  ;;  %v3853_v8 = vpop.f32.mrf.mxu3 }
 0x3bc   :  { %v885_v62 = vadd.f32 %v884_v44, %v834_v47 }
 0x3c3   :  { %v3857_v7 = vpop.f32.mrf.mxu2  ;;  %v3859_v33 = vpop.f32.mrf.mxu3 }
 0x3c4   :  { %v929_v37 = vadd.f32 %v3859_v33, %v3861_v1 }
 0x3cb   :  { %v890_v53 = vpop.f32.mrf.mxu2  ;;  %v931_v16 = vpop.f32.mrf.mxu3 }
 0x3cc   :  { %v891_v60 = vadd.f32 %v890_v53, %v844_v48  ;;  %v932_v0 = vadd.f32 %v931_v16, %v844_v48 }
 0x3ce   :  { %v2507_v38 = vmul.f32 -1.442695, %v891_v60  ;;  %v2508_v22 = vmul.f32 -1.442695, %v932_v0 }
 0x3d0   :  { %2765 = vpow2.f32 %v2507_v38 }
 0x3d1   :  { %2767 = vpow2.f32 %v2508_v22 }
 0x3d3   :  { %v893_v56 = vpop.f32.mrf.mxu2  ;;  %v934_v58 = vpop.f32.mrf.mxu3 }
 0x3d4   :  { %v894_v34 = vadd.f32 %v893_v56, %v849_v32  ;;  %v935_v18 = vadd.f32 %v934_v58, %v849_v32 }
 0x3d6   :  { %v2509_v11 = vmul.f32 -1.442695, %v894_v34  ;;  %v2766_v26 = vpop.eup %2765  ;;  %v2510_v31 = vmul.f32 -1.442695, %v935_v18  ;;  %v926_v18 = vadd.f32 %v3853_v8, %v834_v47 }
 0x3d7   :  { %v2768_v54 = vpop.eup %2767  ;;  %v3868_v4 = vadd.f32 1.0, %v2766_v26 }
 0x3d8   :  { %2769 = vpow2.f32 %v2509_v11  ;;  %v3873_v35 = vadd.f32 1.0, %v2768_v54  ;;  %v888_v11 = vadd.f32 %v3857_v7, %v3861_v1  ;;  %v561_v7 = vld [vmem:[%s5204_s5 + $0x38] sm:$0xff] }
 0x3d9   :  { %2771 = vpow2.f32 %v2510_v31  ;;  %2466 = vmatmul.msk.f32.gmra.mxu0 %vm5214_vm10, %v561_v7  ;;  %2474 = vmatmul.msk.f32.gmra.mxu1 %vm5214_vm10, %v561_v7  ;;  %vm988_vm8 = vweird.f32 %v3868_v4  ;;  %v5248_v45 = vand.u32 2147483647, %v3868_v4 }
 0x3da   :  { %2773 = vtanh.f32 %v879_v41 }
 0x3db   :  { %v896_v40 = vpop.f32.mrf.mxu2  ;;  %v937_v51 = vpop.f32.mrf.mxu3  ;;  %2775 = vrcp.f32 %v3868_v4  ;;  %vm4031_vm10 = vcmp.eq.f32.partialorder %v5248_v45, 8.507059e+37 }
 0x3dc   :  { %v897_v42 = vadd.f32 %v896_v40, %v854_v36  ;;  %v938_v2 = vadd.f32 %v937_v51, %v854_v36  ;;  %2777 = vtanh.f32 %v920_v14 }
 0x3de   :  { %v2511_v20 = vmul.f32 -1.442695, %v897_v42  ;;  %v2512_v27 = vmul.f32 -1.442695, %v938_v2  ;;  %v2770_v29 = vpop.eup %2769 }
 0x3df   :  { %v2772_v55 = vpop.eup %2771  ;;  %v3879_v13 = vadd.f32 1.0, %v2770_v29  ;;  %v994_v29 = vand.u32 2147483648, %v3868_v4 }
 0x3e0   :  { %2779 = vpow2.f32 %v2511_v20  ;;  %v3881_v36 = vpop.eup %2773  ;;  %v3883_v48 = vadd.f32 1.0, %v2772_v55 }
 0x3e1   :  { %2781 = vrcp.f32 %v3873_v35  ;;  %v3888_v43 = vpop.eup %2775  ;;  %vm1018_vm15 = vweird.f32 %v3879_v13 }
 0x3e2   :  { %2783 = vpow2.f32 %v2512_v27  ;;  %v3892_v0 = vpop.eup %2777  ;;  %v984_v58 = vmul.f32 %v3888_v43, %v3868_v4  ;;  %vm989_vm14 = vweird.f32 %v3888_v43 }
 0x3e3   :  { %2785 = vtanh.f32 %v882_v30  ;;  %v899_v53 = vpop.f32.mrf.mxu2  ;;  %v940_v16 = vpop.f32.mrf.mxu3  ;;  %vm3982_vm6 = vmor %vm988_vm8, %vm989_vm14 }
 0x3e4   :  { %2787 = vtanh.f32 %v923_v28  ;;  %v900_v44 = vadd.f32 %v899_v53, %v3855_v23  ;;  %v941_v60 = vadd.f32 %v940_v16, %v3855_v23  ;;  %v985_v54 = vsub.f32 1.0, %v984_v58 }
 0x3e5   :  { %2789 = vtanh.f32 %v885_v62  ;;  %v1024_v62 = vand.u32 2147483648, %v3879_v13 }
 0x3e6   :  { %v2780_v38 = vpop.eup %2779  ;;  %2791 = vrcp.f32 %v3879_v13  ;;  %v2513_v22 = vmul.f32 -1.442695, %v900_v44  ;;  %v2514_v32 = vmul.f32 -1.442695, %v941_v60  ;;  %v986_v2 = vmul.f32 %v3888_v43, %v985_v54 }
 0x3e7   :  { %v3897_v56 = vpop.eup %2781  ;;  %2793 = vrcp.f32 %v3883_v48  ;;  %v3902_v23 = vadd.f32 1.0, %v2780_v38  ;;  %v3972_v7 = vor.u32 1.1754944e-38, %v1024_v62 }
 0x3e8   :  { %v2784_v34 = vpop.eup %2783  ;;  %2795 = vpow2.f32 %v2513_v22  ;;  %v999_v8 = vmul.f32 %v3897_v56, %v3873_v35  ;;  %v3961_v22 = vadd.f32 %v3888_v43, %v986_v2 }
 0x3e9   :  { %v3905_v6 = vpop.eup %2785  ;;  %2797 = vrcp.f32 %v3902_v23  ;;  %v3910_v26 = vadd.f32 1.0, %v2784_v34  ;;  %v1052_v34 = vand.u32 2147483647, %v3902_v23  ;;  %vm1048_vm12 = vweird.f32 %v3902_v23 }
 0x3ea   :  { %v3912_v31 = vpop.eup %2787  ;;  %2799 = vpow2.f32 %v2514_v32  ;;  %v1000_v17 = vsub.f32 1.0, %v999_v8  ;;  %v1022_v8 = vand.u32 2147483647, %v3879_v13 }
 0x3eb   :  { %v3916_v41 = vpop.eup %2789  ;;  %2801 = vrcp.f32 %v3910_v26  ;;  %vm3997_vm0 = vcmp.eq.f32.partialorder %v1052_v34, 8.507059e+37  ;;  %vm1063_vm2 = vweird.f32 %v3910_v26  ;;  %v1067_v44 = vand.u32 2147483647, %v3910_v26 }
 0x3ec   :  { %v3924_v14 = vpop.eup %2791  ;;  %2803 = vtanh.f32 %v926_v18  ;;  %v1001_v32 = vmul.f32 %v3897_v56, %v1000_v17  ;;  %v1054_v18 = vand.u32 2147483648, %v3902_v23  ;;  %vm4011_vm9 = vcmp.eq.f32.partialorder %v1022_v8, 8.507059e+37 }
 0x3ed   :  { %v3926_v40 = vpop.eup %2793  ;;  %2805 = vtanh.f32 %v888_v11  ;;  %v1014_v51 = vmul.f32 %v3924_v14, %v3879_v13  ;;  %vm1019_vm5 = vweird.f32 %v3924_v14  ;;  %vm4058_vm13 = vcmp.eq.f32.partialorder %v1067_v44, 8.507059e+37 }
 0x3ee   :  { %v2796_v33 = vpop.eup %2795  ;;  %2807 = vtanh.f32 %v929_v37  ;;  %v1029_v28 = vmul.f32 %v3926_v40, %v3883_v48  ;;  %v3968_v37 = vor.u32 1.1754944e-38, %v994_v29  ;;  %v1069_v29 = vand.u32 2147483648, %v3910_v26  ;;  %vm4025_vm14 = vmor %vm1018_vm15, %vm1019_vm5 }
 0x3ef   :  { %v3931_v1 = vpop.eup %2797  ;;  %v3935_v42 = vadd.f32 1.0, %v2796_v33  ;;  %v1015_v38 = vsub.f32 1.0, %v1014_v51  ;;  %vm1034_vm4 = vweird.f32 %v3926_v40 }
 0x3f0   :  { %v2800_v15 = vpop.eup %2799  ;;  %v1044_v20 = vmul.f32 %v3931_v1, %v3902_v23  ;;  %v1030_v54 = vsub.f32 1.0, %v1029_v28  ;;  %v3994_v28 = vadd.f32 %v3897_v56, %v1001_v32  ;;  %vm1049_vm7 = vweird.f32 %v3931_v1 }
 0x3f1   :  { %v3943_v47 = vpop.eup %2801  ;;  %2809 = vrcp.f32 %v3935_v42  ;;  %v3948_v55 = vadd.f32 1.0, %v2800_v15  ;;  %v1082_v2 = vand.u32 2147483647, %v3935_v42  ;;  %v1084_v27 = vand.u32 2147483648, %v3935_v42  ;;  %vm4042_vm15 = vmor %vm1048_vm12, %vm1049_vm7 }
 0x3f2   :  { %v3951_v53 = vpop.eup %2803  ;;  %v1059_v16 = vmul.f32 %v3943_v47, %v3910_v26  ;;  %v1045_v59 = vsub.f32 1.0, %v1044_v20  ;;  %v1016_v20 = vmul.f32 %v3924_v14, %v1015_v38  ;;  %v1031_v32 = vmul.f32 %v3926_v40, %v1030_v54 }
 0x3f3   :  { %v3957_v60 = vpop.eup %2805  ;;  %2811 = vrcp.f32 %v3948_v55  ;;  %vm1064_vm1 = vweird.f32 %v3943_v47  ;;  %vm1078_vm11 = vweird.f32 %v3935_v42  ;;  %vm1083_vm7 = vcmp.eq.f32.partialorder %v1082_v2, 8.507059e+37 }
 0x3f4   :  { %v3964_v58 = vpop.eup %2807  ;;  %v1060_v11 = vsub.f32 1.0, %v1059_v16  ;;  %v1046_v33 = vmul.f32 %v3931_v1, %v1045_v59  ;;  %v1055_v59 = vor.u32 1.1754944e-38, %v1054_v18  ;;  %v1017_v54 = vadd.f32 %v3924_v14, %v1016_v20  ;;  %vm4054_vm3 = vmor %vm1063_vm2, %vm1064_vm1 }
 0x3f5   :  { %v1032_v4 = vadd.f32 %v3926_v40, %v1031_v32  ;;  %v1085_v23 = vor.u32 1.1754944e-38, %v1084_v27  ;;  %vm5257_vm2 = vweird.f32 %v3883_v48  ;;  %v5260_v16 = vand.u32 2147483648, %v3883_v48 }
 0x3f6   :  { %v1061_v30 = vmul.f32 %v3943_v47, %v1060_v11  ;;  %v1047_v18 = vadd.f32 %v3931_v1, %v1046_v33  ;;  %v5264_v11 = vsel %vm3982_vm6, %v3888_v43, %v3961_v22  ;;  %v2515_v22 = vld [vmem:[%s5204_s5 + $0x40] sm:$0xff] }
 0x3f7   :  { %v2810_v15 = vpop.eup %2809 }
 0x3f8   :  { %v1074_v62 = vmul.f32 %v2810_v15, %v3935_v42  ;;  %vm1079_vm8 = vweird.f32 %v2810_v15  ;;  %v1062_v33 = vadd.f32 %v3943_v47, %v1061_v30  ;;  %v1099_v30 = vand.u32 2147483648, %v3948_v55 }
 0x3f9   :  { %v2812_v38 = vpop.eup %2811  ;;  %v1051_v42 = vsel %vm4042_vm15, %v3931_v1, %v1047_v18  ;;  %vm1080_vm12 = vmor %vm1078_vm11, %vm1079_vm8  ;;  %vm1093_vm15 = vweird.f32 %v3948_v55 }
 0x3fa   :  { %v1075_v34 = vsub.f32 1.0, %v1074_v62  ;;  %v1089_v51 = vmul.f32 %v2812_v38, %v3948_v55  ;;  %vm1094_vm5 = vweird.f32 %v2812_v38  ;;  %v1066_v26 = vsel %vm4054_vm3, %v3943_v47, %v1062_v33  ;;  %vm4073_vm11 = vmor %vm5257_vm2, %vm1034_vm4 }
 0x3fb   :  { %vm1095_vm1 = vmor %vm1093_vm15, %vm1094_vm5  ;;  %v1100_v2 = vor.u32 1.1754944e-38, %v1099_v30  ;;  %v1036_v47 = vsel %vm4073_vm11, %v3926_v40, %v1032_v4  ;;  %vm5262_vm3 = vweird.f32 %v3873_v35  ;;  %vm1327_vm11 = vcmp.lt.s32.totalorder %v3200_v52, 124 }
 0x3fc   :  { %v1090_v62 = vsub.f32 1.0, %v1089_v51  ;;  %v1076_v25 = vmul.f32 %v2810_v15, %v1075_v34  ;;  %v1097_v51 = vand.u32 2147483647, %v3948_v55 }
 0x3fe   :  { %v1077_v45 = vadd.f32 %v2810_v15, %v1076_v25  ;;  %v1091_v20 = vmul.f32 %v2812_v38, %v1090_v62  ;;  %v1021_v25 = vsel %vm4025_vm14, %v3924_v14, %v1017_v54  ;;  %v1056_v14 = vsel %vm3997_vm0, %v1055_v59, %v1051_v42 }
 0x3ff   :  { %vm1098_vm8 = vcmp.eq.f32.partialorder %v1097_v51, 8.507059e+37  ;;  %v1026_v8 = vsel %vm4011_vm9, %v3972_v7, %v1021_v25  ;;  %v1040_v59 = vor.u32 1.1754944e-38, %v5260_v16  ;;  %vm5261_vm0 = vweird.f32 %v3897_v56 }
 0x400   :  { %v1081_v1 = vsel %vm1080_vm12, %v2810_v15, %v1077_v45  ;;  %v1092_v18 = vadd.f32 %v2812_v38, %v1091_v20  ;;  %v1070_v15 = vor.u32 1.1754944e-38, %v1069_v29  ;;  %vm1005_vm4 = vmor %vm5262_vm3, %vm5261_vm0  ;;  %v1107_v40 = vmul.f32 %v3916_v41, %v1056_v14  ;;  %v1147_v45 = vpop.permute.xlu2 %1146 }
 0x401   :  { %v1086_v44 = vsel %vm1083_vm7, %v1085_v23, %v1081_v1  ;;  %v5263_v29 = vand.u32 2147483647, %v3883_v48  ;;  %v996_v51 = vsel %vm4031_vm10, %v3968_v37, %v5264_v11  ;;  %v1105_v41 = vmul.f32 %v3905_v6, %v1026_v8  ;;  %v4137_v6 = vpop.f32.mrf.mxu0  ;;  %v2559_v11 = vld [vmem:[%s5203_s4 + $0xa0] sm:$0xff] }
 0x402   :  { %v1109_v55 = vmul.f32 %v3957_v60, %v1086_v44  ;;  %v1096_v54 = vsel %vm1095_vm1, %v2812_v38, %v1092_v18  ;;  %v1071_v33 = vsel %vm4058_vm13, %v1070_v15, %v1066_v26  ;;  %v1006_v38 = vsel %vm1005_vm4, %v3897_v56, %v3994_v28  ;;  %v1137_v18 = vpop.permute.xlu1 %1136 }
 0x403   :  { %v1101_v62 = vsel %vm1098_vm8, %v1100_v2, %v1096_v54  ;;  %vm1038_vm13 = vcmp.eq.f32.partialorder %v5263_v29, 8.507059e+37  ;;  %v1108_v48 = vmul.f32 %v3951_v53, %v1071_v33  ;;  %v5266_v56 = vand.u32 2147483647, %v3873_v35  ;;  %v2562_v29 = vld [vmem:[%s5203_s4 + $0xb8] sm:$0xff] }
 0x404   :  { %1205 = vmatpush.msrb.mxu0 %v1109_v55  ;;  %v1110_v60 = vmul.f32 %v3964_v58, %v1101_v62  ;;  %v1041_v7 = vsel %vm1038_vm13, %v1040_v59, %v1036_v47  ;;  %v5265_v58 = vand.u32 2147483648, %v3873_v35  ;;  %v1103_v12 = vmul.f32 %v3881_v36, %v996_v51  ;;  %v2516_v35 = vld [vmem:[%s5204_s5 + $0x48] sm:$0xff]  ;;  %v2517_v36 = vld [vmem:[%s5204_s5 + $0x50] sm:$0xff] }
 0x405   :  { %vm1008_vm9 = vcmp.eq.f32.partialorder %v5266_v56, 8.507059e+37  ;;  %v1106_v43 = vmul.f32 %v3912_v31, %v1041_v7  ;;  %vm5267_vm10 = vcmask 261120   ;;  %v4139_v31 = vpop.f32.mrf.mxu1  ;;  %v2557_v7 = vld [vmem:[%s5203_s4 + $0x90] sm:$0xff]  ;;  %v2596_v51 = vld [vmem:[%s5205_s6 + $0x88] sm:$0xff]  ;;  %vm1326_vm1 = vcmp.lt.s32.totalorder %v3197_v49, 124 }
 0x406   :  { %v1010_v30 = vor.u32 1.1754944e-38, %v5265_v58  ;;  %1246 = vmatpush.msrb.mxu1 %v1110_v60  ;;  %1206 = vmatpush.msrb.mxu0 %v1107_v40  ;;  %vm5268_vm6 = vmmov %vm5267_vm10  ;;  %v2598_v58 = vld [vmem:[%s5205_s6 + $0x98] sm:$0xff]  ;;  %vm1309_vm8 = vcmp.lt.s32.totalorder %v3197_v49, 4  ;;  %vm1291_vm0 = vcmp.ge.s32.totalorder %v3197_v49, 4  ;;  %vm1292_vm3 = vcmp.ge.s32.totalorder %v3200_v52, 4 }
 0x407   :  { %vm5269_vm14 = vmmov %vm5268_vm6 }
 0x408   :  { %v1011_v17 = vsel %vm1008_vm9, %v1010_v30, %v1006_v38  ;;  %1247 = vmatpush.msrb.mxu1 %v1108_v48  ;;  %1207 = vmatpush.msrb.mxu0 %v1105_v41  ;;  %vm5270_vm5 = vmmov %vm5268_vm6  ;;  %v1132_v34 = vpop.permute.xlu2 %1131  ;;  %v2555_v38 = vld [vmem:[%s5203_s4 + $0x80] sm:$0xff]  ;;  %v2556_v30 = vld [vmem:[%s5203_s4 + $0x88] sm:$0xff] }
 0x409   :  { %v1104_v53 = vmul.f32 %v3892_v0, %v1011_v17  ;;  %vm5271_vm12 = vmmov %vm5270_vm5  ;;  %v2518_v0 = vld [vmem:[%s5204_s5 + $0x58] sm:$0xff]  ;;  %v4141_v37 = vpop.f32.mrf.mxu0  ;;  %v2595_v48 = vld [vmem:[%s5205_s6 + $0x80] sm:$0xff] }
 0x40a   :  { %1248 = vmatpush.msrb.mxu1 %v1106_v43  ;;  %1208 = vmatpush.msrb.mxu0 %v1103_v12  ;;  %vm5272_vm7 = vmmov %vm5270_vm5  ;;  %v2597_v41 = vld [vmem:[%s5205_s6 + $0x90] sm:$0xff] }
 0x40b   :  { %2531 = vmatmul.msk.f32.vlgmr.msrb.gmra.mxu0 %vm5267_vm10, %v2515_v22  ;;  %vm5273_vm15 = vmmov %vm5270_vm5 }
 0x40c   :  { %1249 = vmatpush.msrb.mxu1 %v1104_v53  ;;  %vm5274_vm2 = vmmov %vm5270_vm5 }
 0x40d   :  { %2539 = vmatmul.msk.f32.vlgmr.msrb.gmra.mxu1 %vm5268_vm6, %v2515_v22  ;;  %v4143_v28 = vpop.f32.mrf.mxu1  ;;  %vm5281_vm4 = vmmov %vm5274_vm2 }
 0x40e   :  { %vm5282_vm13 = vmmov %vm5274_vm2 }
 0x40f   :  { %vm5283_vm9 = vmmov %vm5274_vm2 }
 0x410   :  { %vm5284_vm10 = vmmov %vm5274_vm2 }
 0x411   :  { %vm5285_vm6 = vmmov %vm5274_vm2 }
 0x413   :  { %2532 = vmatmul.msk.f32.gmra.mxu0 %vm5269_vm14, %v2516_v35  ;;  %vm5286_vm14 = vmmov %vm5274_vm2 }
 0x415   :  { %2540 = vmatmul.msk.f32.gmra.mxu1 %vm5270_vm5, %v2516_v35  ;;  %vm5287_vm5 = vmmov %vm5274_vm2 }
 0x41b   :  { %2533 = vmatmul.msk.f32.gmra.mxu0 %vm5271_vm12, %v2517_v36  ;;  %vm5288_vm12 = vmmov %vm5274_vm2 }
 0x41d   :  { %2541 = vmatmul.msk.f32.gmra.mxu1 %vm5272_vm7, %v2517_v36 }
 0x423   :  { %2534 = vmatmul.msk.f32.gmra.mxu0 %vm5273_vm15, %v2518_v0 }
 0x425   :  { %2542 = vmatmul.msk.f32.gmra.mxu1 %vm5274_vm2, %v2518_v0 }
 0x432   :  { %v4145_v13 = vpop.f32.mrf.mxu0  ;;  %v4147_v4 = vpop.f32.mrf.mxu1 }
 0x433   :  { %5275 = vst [vmem:[#allocation11_spill] sm:$0xff] %v4147_v4 }
 0x456   :  { %v4149_v20 = vpop.f32.mrf.mxu0  ;;  %v4151_v42 = vpop.f32.mrf.mxu1 }
 0x457   :  { %5276 = vst [vmem:[#allocation12_spill] sm:$0xff] %v4149_v20 }
 0x458   :  { %5277 = vst [vmem:[#allocation13_spill] sm:$0xff] %v4151_v42 }
 0x488   :  { %v1210_v23 = vpop.f32.mrf.mxu0 }
 0x489   :  { %v1211_v32 = vadd.f32 %v1210_v23, %v1132_v34 }
 0x48a   :  { %v1251_v25 = vpop.f32.mrf.mxu1 }
 0x48b   :  { %v4154_v1 = vadd.f32 %v1211_v32, %v3621_v50  ;;  %v1142_v50 = vpop.permute.xlu0 %1141 }
 0x48d   :  { %1328 = vrot.lane.b32.xlu0 %v4154_v1, %s2974_s21 }
 0x490   :  { %v1213_v26 = vpop.f32.mrf.mxu0 }
 0x491   :  { %v1214_v27 = vadd.f32 %v1213_v26, %v1137_v18 }
 0x492   :  { %v1254_v44 = vpop.f32.mrf.mxu1 }
 0x493   :  { %v4159_v2 = vadd.f32 %v1214_v27, %v3626_v21  ;;  %v1255_v14 = vadd.f32 %v1254_v44, %v1137_v18 }
 0x495   :  { %v4162_v15 = vadd.f32 %v1255_v14, %v3629_v61  ;;  %1330 = vrot.lane.b32.xlu1 %v4159_v2, %s2974_s21 }
 0x497   :  { %1338 = vrot.lane.b32.xlu2 %v4162_v15, %s2974_s21 }
 0x498   :  { %v1216_v55 = vpop.f32.mrf.mxu0 }
 0x499   :  { %v1217_v54 = vadd.f32 %v1216_v55, %v1142_v50 }
 0x49a   :  { %v1257_v47 = vpop.f32.mrf.mxu1 }
 0x49b   :  { %v4169_v62 = vadd.f32 %v1217_v54, %v3636_v3  ;;  %v1258_v33 = vadd.f32 %v1257_v47, %v1142_v50 }
 0x49d   :  { %v4172_v21 = vadd.f32 %v1258_v33, %v3639_v19  ;;  %v1252_v19 = vadd.f32 %v1251_v25, %v1132_v34 }
 0x49f   :  { %1340 = vrot.lane.b32.xlu0 %v4172_v21, %s2974_s21  ;;  %1332 = vrot.lane.b32.xlu2 %v4169_v62, %s2974_s21  ;;  %v4190_v40 = vadd.f32 %v1252_v19, %v3657_v39  ;;  %v2560_v39 = vld [vmem:[%s5203_s4 + $0xa8] sm:$0xff] }
 0x4a0   :  { %v1219_v61 = vpop.f32.mrf.mxu0 }
 0x4a1   :  { %v1220_v8 = vadd.f32 %v1219_v61, %v1147_v45 }
 0x4a2   :  { %v1260_v16 = vpop.f32.mrf.mxu1 }
 0x4a3   :  { %v4179_v59 = vadd.f32 %v1220_v8, %v3646_v9  ;;  %v1261_v60 = vadd.f32 %v1260_v16, %v1147_v45  ;;  %v2561_v9 = vld [vmem:[%s5203_s4 + $0xb0] sm:$0xff] }
 0x4a5   :  { %v4182_v3 = vadd.f32 %v1261_v60, %v3649_v24  ;;  %v2558_v24 = vld [vmem:[%s5203_s4 + $0x98] sm:$0xff] }
 0x4a7   :  { %1334 = vrot.lane.b32.xlu0 %v4179_v59, %s2974_s21  ;;  %1305 = vrot.lane.b32.xlu2 %v4172_v21, %s2975_s22 }
 0x4a8   :  { %1342 = vrot.lane.b32.xlu1 %v4182_v3, %s2974_s21 }
 0x4af   :  { %1299 = vrot.lane.b32.xlu2 %v4179_v59, %s2975_s22  ;;  %1295 = vrot.lane.b32.xlu0 %v4159_v2, %s2975_s22 }
 0x4b0   :  { %1336 = vrot.lane.b32.xlu1 %v4190_v40, %s2974_s21 }
 0x4b7   :  { %1293 = vrot.lane.b32.xlu2 %v4154_v1, %s2975_s22  ;;  %1307 = vrot.lane.b32.xlu0 %v4182_v3, %s2975_s22 }
 0x4b8   :  { %1297 = vrot.lane.b32.xlu1 %v4169_v62, %s2975_s22 }
 0x4bf   :  { %1411 = vperm.xlu2 %2716, %v2561_v9   ;;  %1301 = vrot.lane.b32.xlu0 %v4190_v40, %s2975_s22 }
 0x4c0   :  { %1303 = vrot.lane.b32.xlu1 %v4162_v15, %s2975_s22 }
 0x4c7   :  { %1396 = vperm.xlu2 %2716, %v2558_v24   ;;  %1406 = vperm.xlu0 %2714, %v2560_v39   ;;  %v2547_v24 = vld [vmem:[%s5202_s3 + $0x80] sm:$0xff] }
 0x4c8   :  { %1416 = vperm.xlu1 %2715, %v2562_v29  }
 0x4cf   :  { %1381 = vperm.xlu2 %2716, %v2555_v38   ;;  %1391 = vperm.xlu0 %2714, %v2557_v7   ;;  %v2548_v38 = vld [vmem:[%s5202_s3 + $0x88] sm:$0xff]  ;;  %v5278_v7 = vld [vmem:[#allocation8_spill] sm:$0xff] }
 0x4d0   :  { %1401 = vperm.xlu1 %2715, %v2559_v11   ;;  %v5279_v11 = vld [vmem:[#allocation9_spill] sm:$0xff] }
 0x4d7   :  { %1694 = vperm.xlu2 %2716, %v2596_v51   ;;  %1704 = vperm.xlu0 %2714, %v2598_v58   ;;  %v5280_v51 = vld [vmem:[#allocation10_spill] sm:$0xff]  ;;  %v2554_v58 = vld [vmem:[%s5202_s3 + $0xb8] sm:$0xff] }
 0x4d8   :  { %1386 = vperm.xlu1 %2715, %v2556_v30  }
 0x4df   :  { %1689 = vperm.xlu0 %2714, %v2595_v48  }
 0x4e0   :  { %1699 = vperm.xlu1 %2715, %v2597_v41  }
 0x4f1   :  { %v1339_v17 = vpop.permute.xlu2 %1338 }
 0x4f9   :  { %v1333_v22 = vpop.permute.xlu2 %1332 }
 0x4ff   :  { %v1329_v56 = vpop.permute.xlu0 %1328 }
 0x501   :  { %v1306_v25 = vpop.permute.xlu2 %1305 }
 0x507   :  { %v1331_v12 = vpop.permute.xlu1 %1330 }
 0x508   :  { %v1346_v23 = vsel %vm1326_vm1, %v1331_v12, %v1339_v17  ;;  %v1350_v32 = vsel %vm1326_vm1, %v1339_v17, %v1331_v12 }
 0x509   :  { %v1300_v50 = vpop.permute.xlu2 %1299 }
 0x511   :  { %v1341_v43 = vpop.permute.xlu0 %1340  ;;  %v1294_v9 = vpop.permute.xlu2 %1293 }
 0x512   :  { %v1347_v45 = vsel %vm1326_vm1, %v1333_v22, %v1341_v43  ;;  %v1351_v34 = vsel %vm1326_vm1, %v1341_v43, %v1333_v22 }
 0x519   :  { %v1335_v53 = vpop.permute.xlu0 %1334 }
 0x51a   :  { %v1343_v35 = vpop.permute.xlu1 %1342 }
 0x51b   :  { %v1348_v36 = vsel %vm1326_vm1, %v1335_v53, %v1343_v35  ;;  %v1352_v0 = vsel %vm1326_vm1, %v1343_v35, %v1335_v53  ;;  %v1412_v35 = vpop.permute.xlu2 %1411 }
 0x51c   :  { %2563 = vmatpush.msk.msra.mxu2 %vm1326_vm1, %v1348_v36  ;;  %2571 = vmatpush.msk.msra.mxu3 %vm1327_vm11, %v1352_v0 }
 0x51e   :  { %2564 = vmatpush.msk.msra.mxu2 %vm1326_vm1, %v1347_v45  ;;  %2572 = vmatpush.msk.msra.mxu3 %vm1327_vm11, %v1351_v34 }
 0x520   :  { %2565 = vmatpush.msk.msra.mxu2 %vm1326_vm1, %v1346_v23  ;;  %2573 = vmatpush.msk.msra.mxu3 %vm1327_vm11, %v1350_v32 }
 0x521   :  { %v1296_v18 = vpop.permute.xlu0 %1295 }
 0x522   :  { %v1337_v26 = vpop.permute.xlu1 %1336 }
 0x523   :  { %v1345_v27 = vsel %vm1326_vm1, %v1329_v56, %v1337_v26  ;;  %v1349_v44 = vsel %vm1326_vm1, %v1337_v26, %v1329_v56  ;;  %v4354_v32 = vpop.permute.xlu2 %1396 }
 0x524   :  { %2566 = vmatpush.msk.msra.mxu2 %vm1326_vm1, %v1345_v27  ;;  %2574 = vmatpush.msk.msra.mxu3 %vm1327_vm11, %v1349_v44  ;;  %v2519_v27 = vld [vmem:[%s5204_s5 + $0x60] sm:$0xff] }
 0x525   :  { %2535 = vmatmul.msk.f32.gmra.mxu0 %vm5281_vm4, %v2519_v27  ;;  %2543 = vmatmul.msk.f32.gmra.mxu1 %vm5282_vm13, %v2519_v27 }
 0x526   :  { %1427 = vmatpush.msra.mxu2 %v4179_v59  ;;  %1468 = vmatpush.msra.mxu3 %v4182_v3 }
 0x528   :  { %1428 = vmatpush.msra.mxu2 %v4169_v62  ;;  %1469 = vmatpush.msra.mxu3 %v4172_v21 }
 0x529   :  { %v1308_v14 = vpop.permute.xlu0 %1307 }
 0x52a   :  { %1429 = vmatpush.msra.mxu2 %v4159_v2  ;;  %1470 = vmatpush.msra.mxu3 %v4162_v15  ;;  %v1298_v55 = vpop.permute.xlu1 %1297  ;;  %v1313_v54 = vsel %vm1309_vm8, %v1300_v50, %v1308_v14  ;;  %v1317_v47 = vsel %vm1309_vm8, %v1308_v14, %v1300_v50 }
 0x52b   :  { %v1312_v33 = vsel %vm1309_vm8, %v1298_v55, %v1306_v25  ;;  %v1316_v61 = vsel %vm1309_vm8, %v1306_v25, %v1298_v55 }
 0x52c   :  { %1430 = vmatpush.msra.mxu2 %v4154_v1  ;;  %1471 = vmatpush.msra.mxu3 %v4190_v40 }
 0x52e   :  { %2567 = vmatpush.msk.msra.mxu2 %vm1291_vm0, %v1317_v47  ;;  %2575 = vmatpush.msk.msra.mxu3 %vm1292_vm3, %v1313_v54 }
 0x530   :  { %2568 = vmatpush.msk.msra.mxu2 %vm1291_vm0, %v1316_v61  ;;  %2576 = vmatpush.msk.msra.mxu3 %vm1292_vm3, %v1312_v33  ;;  %v1382_v61 = vpop.permute.xlu2 %1381 }
 0x531   :  { %v1302_v8 = vpop.permute.xlu0 %1301 }
 0x532   :  { %v1304_v16 = vpop.permute.xlu1 %1303  ;;  %v1310_v39 = vsel %vm1309_vm8, %v1294_v9, %v1302_v8  ;;  %v1314_v29 = vsel %vm1309_vm8, %v1302_v8, %v1294_v9 }
 0x533   :  { %v1311_v60 = vsel %vm1309_vm8, %v1296_v18, %v1304_v16  ;;  %v1315_v19 = vsel %vm1309_vm8, %v1304_v16, %v1296_v18 }
 0x534   :  { %2569 = vmatpush.msk.msra.mxu2 %vm1291_vm0, %v1315_v19  ;;  %2577 = vmatpush.msk.msra.mxu3 %vm1292_vm3, %v1311_v60  ;;  %v2520_v19 = vld [vmem:[%s5204_s5 + $0x68] sm:$0xff] }
 0x535   :  { %2536 = vmatmul.msk.f32.gmra.mxu0 %vm5283_vm9, %v2520_v19  ;;  %2544 = vmatmul.msk.f32.gmra.mxu1 %vm5284_vm10, %v2520_v19 }
 0x536   :  { %2570 = vmatpush.msk.msra.mxu2 %vm1291_vm0, %v1314_v29  ;;  %2578 = vmatpush.msk.msra.mxu3 %vm1292_vm3, %v1310_v39 }
 0x537   :  { %1435 = vmatmul.f32.vlgmr.msra.gmra.mxu2 %v2547_v24  ;;  %1476 = vmatmul.f32.vlgmr.msra.gmra.mxu3 %v2547_v24 }
 0x538   :  { %1977 = vmatpush.msrb.mxu2 %v3787_v57  ;;  %2018 = vmatpush.msrb.mxu3 %v3793_v63  ;;  %v2549_v57 = vld [vmem:[%s5202_s3 + $0x90] sm:$0xff]  ;;  %v2550_v63 = vld [vmem:[%s5202_s3 + $0x98] sm:$0xff] }
 0x539   :  { %v1407_v26 = vpop.permute.xlu0 %1406 }
 0x53a   :  { %1978 = vmatpush.msrb.mxu2 %v3799_v5  ;;  %2019 = vmatpush.msrb.mxu3 %v3805_v10  ;;  %v2551_v5 = vld [vmem:[%s5202_s3 + $0xa0] sm:$0xff]  ;;  %v2552_v10 = vld [vmem:[%s5202_s3 + $0xa8] sm:$0xff]  ;;  %v4348_v12 = vpop.permute.xlu1 %1416 }
 0x53c   :  { %1979 = vmatpush.msrb.mxu2 %v3814_v46  ;;  %2020 = vmatpush.msrb.mxu3 %v5278_v7  ;;  %v2553_v46 = vld [vmem:[%s5202_s3 + $0xb0] sm:$0xff] }
 0x53e   :  { %1980 = vmatpush.msrb.mxu2 %v5279_v11  ;;  %2021 = vmatpush.msrb.mxu3 %v5280_v51 }
 0x53f   :  { %1438 = vmatmul.f32.gmra.mxu2 %v2548_v38  ;;  %1479 = vmatmul.f32.gmra.mxu3 %v2548_v38 }
 0x542   :  { %v1402_v36 = vpop.permute.xlu1 %1401 }
 0x547   :  { %1441 = vmatmul.f32.gmra.mxu2 %v2549_v57  ;;  %1482 = vmatmul.f32.gmra.mxu3 %v2549_v57 }
 0x54a   :  { %v1387_v11 = vpop.permute.xlu1 %1386 }
 0x54f   :  { %1444 = vmatmul.f32.gmra.mxu2 %v2550_v63  ;;  %1485 = vmatmul.f32.gmra.mxu3 %v2550_v63 }
 0x557   :  { %1447 = vmatmul.f32.gmra.mxu2 %v2551_v5  ;;  %1488 = vmatmul.f32.gmra.mxu3 %v2551_v5 }
 0x55f   :  { %1450 = vmatmul.f32.gmra.mxu2 %v2552_v10  ;;  %1491 = vmatmul.f32.gmra.mxu3 %v2552_v10  ;;  %v1392_v10 = vpop.permute.xlu0 %1391 }
 0x567   :  { %1453 = vmatmul.f32.gmra.mxu2 %v2553_v46  ;;  %1494 = vmatmul.f32.gmra.mxu3 %v2553_v46 }
 0x56f   :  { %1456 = vmatmul.f32.gmra.mxu2 %v2554_v58  ;;  %1497 = vmatmul.f32.gmra.mxu3 %v2554_v58  ;;  %v2521_v58 = vld [vmem:[%s5204_s5 + $0x70] sm:$0xff] }
 0x570   :  { %2537 = vmatmul.msk.f32.gmra.mxu0 %vm5285_vm6, %v2521_v58  ;;  %2545 = vmatmul.msk.f32.gmra.mxu1 %vm5286_vm14, %v2521_v58 }
 0x5ba   :  { %v1436_v30 = vpop.f32.mrf.mxu2  ;;  %v1477_v48 = vpop.f32.mrf.mxu3 }
 0x5bb   :  { %v1437_v8 = vadd.f32 %v1436_v30, %v1382_v61  ;;  %v1478_v9 = vadd.f32 %v1477_v48, %v1382_v61 }
 0x5c2   :  { %v1439_v41 = vpop.f32.mrf.mxu2  ;;  %v1480_v56 = vpop.f32.mrf.mxu3 }
 0x5c3   :  { %v1440_v5 = vadd.f32 %v1439_v41, %v1387_v11  ;;  %v1481_v46 = vadd.f32 %v1480_v56, %v1387_v11 }
 0x5ca   :  { %v1442_v17 = vpop.f32.mrf.mxu2  ;;  %v4346_v43 = vpop.f32.mrf.mxu3 }
 0x5cb   :  { %v1443_v48 = vadd.f32 %v1442_v17, %v1392_v10 }
 0x5d2   :  { %v4350_v22 = vpop.f32.mrf.mxu2  ;;  %v4352_v53 = vpop.f32.mrf.mxu3 }
 0x5da   :  { %v1448_v0 = vpop.f32.mrf.mxu2  ;;  %v1489_v45 = vpop.f32.mrf.mxu3 }
 0x5db   :  { %v1449_v34 = vadd.f32 %v1448_v0, %v1402_v36  ;;  %v1490_v23 = vadd.f32 %v1489_v45, %v1402_v36 }
 0x5dd   :  { %v2579_v25 = vmul.f32 -1.442695, %v1449_v34  ;;  %v2580_v18 = vmul.f32 -1.442695, %v1490_v23 }
 0x5df   :  { %2813 = vpow2.f32 %v2579_v25 }
 0x5e0   :  { %2815 = vpow2.f32 %v2580_v18 }
 0x5e2   :  { %v1451_v44 = vpop.f32.mrf.mxu2  ;;  %v1492_v14 = vpop.f32.mrf.mxu3 }
 0x5e3   :  { %v1452_v50 = vadd.f32 %v1451_v44, %v1407_v26  ;;  %v1493_v55 = vadd.f32 %v1492_v14, %v1407_v26 }
 0x5e5   :  { %v2581_v54 = vmul.f32 -1.442695, %v1452_v50  ;;  %v2814_v47 = vpop.eup %2813  ;;  %v2582_v33 = vmul.f32 -1.442695, %v1493_v55  ;;  %v2522_v55 = vld [vmem:[%s5204_s5 + $0x78] sm:$0xff] }
 0x5e6   :  { %v2816_v16 = vpop.eup %2815  ;;  %v4361_v60 = vadd.f32 1.0, %v2814_v47  ;;  %v1446_v47 = vadd.f32 %v4350_v22, %v4354_v32  ;;  %2538 = vmatmul.msk.f32.gmra.mxu0 %vm5287_vm5, %v2522_v55  ;;  %2546 = vmatmul.msk.f32.gmra.mxu1 %vm5288_vm12, %v2522_v55 }
 0x5e7   :  { %2817 = vpow2.f32 %v2581_v54  ;;  %v4368_v7 = vadd.f32 1.0, %v2816_v16 }
 0x5e8   :  { %2819 = vpow2.f32 %v2582_v33  ;;  %vm1546_vm7 = vweird.f32 %v4361_v60  ;;  %v5297_v20 = vand.u32 2147483647, %v4361_v60 }
 0x5e9   :  { %2821 = vtanh.f32 %v1437_v8  ;;  %v1487_v8 = vadd.f32 %v4352_v53, %v4354_v32 }
 0x5ea   :  { %v1454_v24 = vpop.f32.mrf.mxu2  ;;  %v1495_v39 = vpop.f32.mrf.mxu3  ;;  %2823 = vrcp.f32 %v4361_v60 }
 0x5eb   :  { %v1455_v29 = vadd.f32 %v1454_v24, %v1412_v35  ;;  %v1496_v38 = vadd.f32 %v1495_v39, %v1412_v35  ;;  %2825 = vtanh.f32 %v1478_v9 }
 0x5ed   :  { %v2583_v51 = vmul.f32 -1.442695, %v1455_v29  ;;  %v2584_v57 = vmul.f32 -1.442695, %v1496_v38  ;;  %v2818_v63 = vpop.eup %2817 }
 0x5ee   :  { %v2820_v30 = vpop.eup %2819  ;;  %v4375_v35 = vadd.f32 1.0, %v2818_v63  ;;  %v1552_v63 = vand.u32 2147483648, %v4361_v60 }
 0x5ef   :  { %2827 = vpow2.f32 %v2583_v51  ;;  %v4377_v36 = vpop.eup %2821  ;;  %v4379_v0 = vadd.f32 1.0, %v2820_v30 }
 0x5f0   :  { %2829 = vrcp.f32 %v4368_v7  ;;  %v4383_v56 = vpop.eup %2823  ;;  %v1582_v30 = vand.u32 2147483648, %v4375_v35  ;;  %vm1576_vm2 = vweird.f32 %v4375_v35 }
 0x5f1   :  { %2831 = vpow2.f32 %v2584_v57  ;;  %v4387_v23 = vpop.eup %2825  ;;  %v1542_v44 = vmul.f32 %v4383_v56, %v4361_v60  ;;  %vm1547_vm15 = vweird.f32 %v4383_v56 }
 0x5f2   :  { %2833 = vtanh.f32 %v1440_v5  ;;  %v1457_v41 = vpop.f32.mrf.mxu2  ;;  %v1498_v45 = vpop.f32.mrf.mxu3  ;;  %vm4475_vm1 = vmor %vm1546_vm7, %vm1547_vm15  ;;  %vm4524_vm15 = vcmp.eq.f32.partialorder %v5297_v20, 8.507059e+37 }
 0x5f3   :  { %2835 = vtanh.f32 %v1481_v46  ;;  %v1458_v17 = vadd.f32 %v1457_v41, %v4348_v12  ;;  %v1499_v34 = vadd.f32 %v1498_v45, %v4348_v12  ;;  %v1484_v12 = vadd.f32 %v4346_v43, %v1392_v10 }
 0x5f4   :  { %2837 = vtanh.f32 %v1443_v48  ;;  %v1543_v22 = vsub.f32 1.0, %v1542_v44 }
 0x5f5   :  { %v2828_v25 = vpop.eup %2827  ;;  %2839 = vrcp.f32 %v4375_v35  ;;  %v2585_v18 = vmul.f32 -1.442695, %v1458_v17  ;;  %v2586_v26 = vmul.f32 -1.442695, %v1499_v34 }
 0x5f6   :  { %v4390_v27 = vpop.eup %2829  ;;  %2841 = vrcp.f32 %v4379_v0  ;;  %v4395_v14 = vadd.f32 1.0, %v2828_v25  ;;  %v1544_v29 = vmul.f32 %v4383_v56, %v1543_v22 }
 0x5f7   :  { %v2832_v50 = vpop.eup %2831  ;;  %2843 = vpow2.f32 %v2585_v18  ;;  %v1557_v16 = vmul.f32 %v4390_v27, %v4368_v7 }
 0x5f8   :  { %v4401_v54 = vpop.eup %2833  ;;  %2845 = vrcp.f32 %v4395_v14  ;;  %v4406_v33 = vadd.f32 1.0, %v2832_v50  ;;  %v4454_v18 = vadd.f32 %v4383_v56, %v1544_v29  ;;  %v1610_v50 = vand.u32 2147483647, %v4395_v14 }
 0x5f9   :  { %v4408_v61 = vpop.eup %2835  ;;  %2847 = vpow2.f32 %v2586_v26  ;;  %v1558_v38 = vsub.f32 1.0, %v1557_v16  ;;  %v4465_v16 = vor.u32 1.1754944e-38, %v1582_v30  ;;  %vm1606_vm8 = vweird.f32 %v4395_v14 }
 0x5fa   :  { %v4412_v43 = vpop.eup %2837  ;;  %2849 = vrcp.f32 %v4406_v33  ;;  %vm4490_vm3 = vcmp.eq.f32.partialorder %v1610_v50, 8.507059e+37  ;;  %vm1621_vm4 = vweird.f32 %v4406_v33  ;;  %v1625_v17 = vand.u32 2147483647, %v4406_v33 }
 0x5fb   :  { %v4419_v19 = vpop.eup %2839  ;;  %2851 = vtanh.f32 %v1484_v12  ;;  %v1559_v26 = vmul.f32 %v4390_v27, %v1558_v38  ;;  %v1612_v12 = vand.u32 2147483648, %v4395_v14 }
 0x5fc   :  { %v4421_v9 = vpop.eup %2841  ;;  %2853 = vtanh.f32 %v1446_v47  ;;  %v1572_v24 = vmul.f32 %v4419_v19, %v4375_v35  ;;  %v4461_v47 = vor.u32 1.1754944e-38, %v1552_v63  ;;  %vm1577_vm11 = vweird.f32 %v4419_v19 }
 0x5fd   :  { %v2844_v53 = vpop.eup %2843  ;;  %2855 = vtanh.f32 %v1487_v8  ;;  %v1587_v46 = vmul.f32 %v4421_v9, %v4379_v0  ;;  %v1580_v8 = vand.u32 2147483647, %v4375_v35  ;;  %v1627_v63 = vand.u32 2147483648, %v4406_v33  ;;  %vm4518_vm7 = vmor %vm1576_vm2, %vm1577_vm11 }
 0x5fe   :  { %v4424_v32 = vpop.eup %2845  ;;  %v4428_v39 = vadd.f32 1.0, %v2844_v53  ;;  %v1573_v25 = vsub.f32 1.0, %v1572_v24  ;;  %vm1592_vm9 = vweird.f32 %v4421_v9  ;;  %vm4551_vm0 = vcmp.eq.f32.partialorder %v1625_v17, 8.507059e+37 }
 0x5ff   :  { %v2848_v11 = vpop.eup %2847  ;;  %v1602_v51 = vmul.f32 %v4424_v32, %v4395_v14  ;;  %v1588_v22 = vsub.f32 1.0, %v1587_v46  ;;  %v4487_v46 = vadd.f32 %v4390_v27, %v1559_v26  ;;  %vm1607_vm10 = vweird.f32 %v4424_v32 }
 0x600   :  { %v4436_v10 = vpop.eup %2849  ;;  %2857 = vrcp.f32 %v4428_v39  ;;  %v4441_v58 = vadd.f32 1.0, %v2848_v11  ;;  %vm4504_vm6 = vcmp.eq.f32.partialorder %v1580_v8, 8.507059e+37  ;;  %v1640_v29 = vand.u32 2147483647, %v4428_v39  ;;  %vm4535_vm2 = vmor %vm1606_vm8, %vm1607_vm10 }
 0x601   :  { %v4444_v48 = vpop.eup %2851  ;;  %v1617_v41 = vmul.f32 %v4436_v10, %v4406_v33  ;;  %v1603_v45 = vsub.f32 1.0, %v1602_v51  ;;  %v1574_v51 = vmul.f32 %v4419_v19, %v1573_v25  ;;  %v1589_v26 = vmul.f32 %v4421_v9, %v1588_v22 }
 0x602   :  { %v4450_v34 = vpop.eup %2853  ;;  %2859 = vrcp.f32 %v4441_v58  ;;  %v1642_v57 = vand.u32 2147483648, %v4428_v39  ;;  %vm1622_vm5 = vweird.f32 %v4436_v10  ;;  %vm1636_vm14 = vweird.f32 %v4428_v39 }
 0x603   :  { %v4457_v44 = vpop.eup %2855  ;;  %v1618_v55 = vsub.f32 1.0, %v1617_v41  ;;  %v1604_v53 = vmul.f32 %v4424_v32, %v1603_v45  ;;  %v1613_v45 = vor.u32 1.1754944e-38, %v1612_v12  ;;  %v1575_v22 = vadd.f32 %v4419_v19, %v1574_v51  ;;  %vm4547_vm13 = vmor %vm1621_vm4, %vm1622_vm5 }
 0x604   :  { %v1590_v60 = vadd.f32 %v4421_v9, %v1589_v26  ;;  %vm1641_vm10 = vcmp.eq.f32.partialorder %v1640_v29, 8.507059e+37  ;;  %v1643_v14 = vor.u32 1.1754944e-38, %v1642_v57  ;;  %vm5306_vm4 = vweird.f32 %v4379_v0  ;;  %v2591_v26 = vld [vmem:[%s5204_s5 + $0xa0] sm:$0xff] }
 0x605   :  { %v1619_v5 = vmul.f32 %v4436_v10, %v1618_v55  ;;  %v1605_v12 = vadd.f32 %v4424_v32, %v1604_v53  ;;  %v5309_v41 = vand.u32 2147483648, %v4379_v0  ;;  %v5313_v55 = vsel %vm4475_vm1, %v4383_v56, %v4454_v18  ;;  %v2587_v18 = vld [vmem:[%s5204_s5 + $0x80] sm:$0xff] }
 0x606   :  { %v2858_v11 = vpop.eup %2857  ;;  %vm5316_vm1 = vcmask 261120  }
 0x607   :  { %v1632_v30 = vmul.f32 %v2858_v11, %v4428_v39  ;;  %vm1637_vm12 = vweird.f32 %v2858_v11  ;;  %v1620_v53 = vadd.f32 %v4436_v10, %v1619_v5  ;;  %v1657_v5 = vand.u32 2147483648, %v4441_v58 }
 0x608   :  { %v2860_v25 = vpop.eup %2859  ;;  %v1609_v39 = vsel %vm4535_vm2, %v4424_v32, %v1605_v12  ;;  %vm1638_vm8 = vmor %vm1636_vm14, %vm1637_vm12  ;;  %vm1651_vm2 = vweird.f32 %v4441_v58 }
 0x609   :  { %v1633_v50 = vsub.f32 1.0, %v1632_v30  ;;  %v1647_v24 = vmul.f32 %v2860_v25, %v4441_v58  ;;  %vm1652_vm11 = vweird.f32 %v2860_v25  ;;  %v1624_v33 = vsel %vm4547_vm13, %v4436_v10, %v1620_v53  ;;  %vm4566_vm14 = vmor %vm5306_vm4, %vm1592_vm9 }
 0x60a   :  { %vm1653_vm5 = vmor %vm1651_vm2, %vm1652_vm11  ;;  %v1658_v29 = vor.u32 1.1754944e-38, %v1657_v5  ;;  %v1594_v10 = vsel %vm4566_vm14, %v4421_v9, %v1590_v60  ;;  %vm5311_vm13 = vweird.f32 %v4368_v7 }
 0x60b   :  { %v1648_v30 = vsub.f32 1.0, %v1647_v24  ;;  %v1634_v42 = vmul.f32 %v2858_v11, %v1633_v50  ;;  %v1655_v24 = vand.u32 2147483647, %v4441_v58  ;;  %vm5319_vm11 = vmmov %vm5316_vm1 }
 0x60c   :  { %vm5322_vm2 = vmmov %vm5316_vm1 }
 0x60d   :  { %v1635_v20 = vadd.f32 %v2858_v11, %v1634_v42  ;;  %v1649_v51 = vmul.f32 %v2860_v25, %v1648_v30  ;;  %v1579_v42 = vsel %vm4518_vm7, %v4419_v19, %v1575_v22  ;;  %v1614_v19 = vsel %vm4490_vm3, %v1613_v45, %v1609_v39  ;;  %vm5317_vm7 = vmmov %vm5316_vm1 }
 0x60e   :  { %vm1656_vm12 = vcmp.eq.f32.partialorder %v1655_v24, 8.507059e+37  ;;  %v1584_v8 = vsel %vm4504_vm6, %v4465_v16, %v1579_v42  ;;  %v1598_v45 = vor.u32 1.1754944e-38, %v5309_v41  ;;  %vm5310_vm3 = vweird.f32 %v4390_v27  ;;  %vm5323_vm4 = vmmov %vm5316_vm1 }
 0x60f   :  { %v1639_v32 = vsel %vm1638_vm8, %v2858_v11, %v1635_v20  ;;  %v1650_v12 = vadd.f32 %v2860_v25, %v1649_v51  ;;  %v1628_v11 = vor.u32 1.1754944e-38, %v1627_v63  ;;  %vm1563_vm9 = vmor %vm5311_vm13, %vm5310_vm3  ;;  %v1665_v9 = vmul.f32 %v4412_v43, %v1614_v19  ;;  %v1705_v20 = vpop.permute.xlu0 %1704 }
 0x610   :  { %v1644_v17 = vsel %vm1641_vm10, %v1643_v14, %v1639_v32  ;;  %v5312_v63 = vand.u32 2147483647, %v4379_v0  ;;  %v1554_v24 = vsel %vm4524_vm15, %v4461_v47, %v5313_v55  ;;  %v1663_v43 = vmul.f32 %v4401_v54, %v1584_v8  ;;  %vm5318_vm15 = vmmov %vm5316_vm1  ;;  %v4630_v54 = vpop.f32.mrf.mxu0 }
 0x611   :  { %v1667_v58 = vmul.f32 %v4450_v34, %v1644_v17  ;;  %v1654_v22 = vsel %vm1653_vm5, %v2860_v25, %v1650_v12  ;;  %v1629_v53 = vsel %vm4551_vm0, %v1628_v11, %v1624_v33  ;;  %v1564_v25 = vsel %vm1563_vm9, %v4390_v27, %v4487_v46  ;;  %vm5320_vm8 = vmmov %vm5316_vm1  ;;  %v1695_v33 = vpop.permute.xlu2 %1694  ;;  %v2592_v17 = vld [vmem:[%s5204_s5 + $0xa8] sm:$0xff] }
 0x612   :  { %v1659_v30 = vsel %vm1656_vm12, %v1658_v29, %v1654_v22  ;;  %vm1596_vm0 = vcmp.eq.f32.partialorder %v5312_v63, 8.507059e+37  ;;  %v1666_v0 = vmul.f32 %v4444_v48, %v1629_v53  ;;  %v5315_v27 = vand.u32 2147483647, %v4368_v7  ;;  %vm5321_vm10 = vmmov %vm5316_vm1  ;;  %v1700_v22 = vpop.permute.xlu1 %1699 }
 0x613   :  { %1763 = vmatpush.msra.mxu0 %v1667_v58  ;;  %v1668_v34 = vmul.f32 %v4457_v44, %v1659_v30  ;;  %v1599_v16 = vsel %vm1596_vm0, %v1598_v45, %v1594_v10  ;;  %v5314_v44 = vand.u32 2147483648, %v4368_v7  ;;  %v1661_v4 = vmul.f32 %v4377_v36, %v1554_v24  ;;  %v2588_v7 = vld [vmem:[%s5204_s5 + $0x88] sm:$0xff]  ;;  %v2589_v36 = vld [vmem:[%s5204_s5 + $0x90] sm:$0xff]  ;;  %vm5324_vm14 = vmmov %vm5316_vm1 }
 0x614   :  { %vm1566_vm6 = vcmp.eq.f32.partialorder %v5315_v27, 8.507059e+37  ;;  %v1664_v56 = vmul.f32 %v4408_v61, %v1599_v16  ;;  %v4632_v61 = vpop.f32.mrf.mxu1  ;;  %vm5325_vm5 = vmmov %vm5316_vm1  ;;  %v2593_v30 = vld [vmem:[%s5204_s5 + $0xb0] sm:$0xff]  ;;  %v2630_v24 = vld [vmem:[%s5203_s4 + $0xd8] sm:$0xff] }
 0x615   :  { %v1568_v5 = vor.u32 1.1754944e-38, %v5314_v44  ;;  %1804 = vmatpush.msra.mxu1 %v1668_v34  ;;  %1764 = vmatpush.msra.mxu0 %v1665_v9  ;;  %vm5326_vm12 = vmmov %vm5316_vm1  ;;  %v2594_v34 = vld [vmem:[%s5204_s5 + $0xb8] sm:$0xff]  ;;  %v2629_v44 = vld [vmem:[%s5203_s4 + $0xd0] sm:$0xff] }
 0x616   :  { %vm5327_vm3 = vmmov %vm5316_vm1  ;;  %v2628_v27 = vld [vmem:[%s5203_s4 + $0xc8] sm:$0xff] }
 0x617   :  { %v1569_v38 = vsel %vm1566_vm6, %v1568_v5, %v1564_v25  ;;  %1805 = vmatpush.msra.mxu1 %v1666_v0  ;;  %1765 = vmatpush.msra.mxu0 %v1663_v43  ;;  %v1690_v50 = vpop.permute.xlu0 %1689  ;;  %vm5328_vm13 = vmmov %vm5316_vm1  ;;  %v2631_v5 = vld [vmem:[%s5203_s4 + $0xe0] sm:$0xff]  ;;  %v569_v43 = vld [vmem:[%s5205_s6 + $0x38] sm:$0xff] }
 0x618   :  { %v1662_v48 = vmul.f32 %v4387_v23, %v1569_v38  ;;  %v2590_v23 = vld [vmem:[%s5204_s5 + $0x98] sm:$0xff]  ;;  %v4634_v47 = vpop.f32.mrf.mxu0  ;;  %vm5329_vm9 = vmmov %vm5316_vm1  ;;  %s2977_s5 = smov 8   ;;  %v2627_v0 = vld [vmem:[%s5203_s4 + $0xc0] sm:$0xff] }
 0x619   :  { %1806 = vmatpush.msra.mxu1 %v1664_v56  ;;  %1766 = vmatpush.msra.mxu0 %v1661_v4  ;;  %vm5330_vm0 = vmmov %vm5316_vm1  ;;  %v568_v38 = vld [vmem:[%s5205_s6 + $0x30] sm:$0xff]  ;;  %v2530_v4 = vld [vmem:[%s5205_s6 + $0x78] sm:$0xff] }
 0x61a   :  { %2603 = vmatmul.msk.f32.vlgmr.msra.gmra.mxu0 %vm5316_vm1, %v2587_v18  ;;  %vm5331_vm6 = vmmov %vm5330_vm0  ;;  %v2529_v56 = vld [vmem:[%s5205_s6 + $0x70] sm:$0xff]  ;;  %vm1885_vm1 = vcmp.lt.s32.totalorder %v3200_v52, 120 }
 0x61b   :  { %1807 = vmatpush.msra.mxu1 %v1662_v48  ;;  %v2528_v48 = vld [vmem:[%s5205_s6 + $0x68] sm:$0xff] }
 0x61c   :  { %2611 = vmatmul.msk.f32.vlgmr.msra.gmra.mxu1 %vm5317_vm7, %v2587_v18  ;;  %v4636_v46 = vpop.f32.mrf.mxu1  ;;  %v567_v18 = vld [vmem:[%s5205_s6 + $0x28] sm:$0xff]  ;;  %vm1884_vm7 = vcmp.lt.s32.totalorder %v3197_v49, 120 }
 0x620   :  { %v4638_v35 = vpop.f32.mrf.mxu0 }
 0x622   :  { %2604 = vmatmul.msk.f32.gmra.mxu0 %vm5318_vm15, %v2588_v7  ;;  %vm1849_vm15 = vcmp.ge.s32.totalorder %v3197_v49, 8 }
 0x624   :  { %2612 = vmatmul.msk.f32.gmra.mxu1 %vm5319_vm11, %v2588_v7  ;;  %v4640_v60 = vpop.f32.mrf.mxu1  ;;  %v2602_v7 = vld [vmem:[%s5205_s6 + $0xb8] sm:$0xff]  ;;  %vm1850_vm11 = vcmp.ge.s32.totalorder %v3200_v52, 8  ;;  %v2623_v52 = vld [vmem:[%s5202_s3 + $0xe0] sm:$0xff] }
 0x62a   :  { %2605 = vmatmul.msk.f32.gmra.mxu0 %vm5320_vm8, %v2589_v36  ;;  %vm1867_vm8 = vcmp.lt.s32.totalorder %v3197_v49, 8  ;;  %v2622_v49 = vld [vmem:[%s5202_s3 + $0xd8] sm:$0xff] }
 0x62c   :  { %2613 = vmatmul.msk.f32.gmra.mxu1 %vm5321_vm10, %v2589_v36  ;;  %v2234_v36 = vld [vmem:[%s5207_s8 + $0x18] sm:$0xff] }
 0x632   :  { %2606 = vmatmul.msk.f32.gmra.mxu0 %vm5322_vm2, %v2590_v23 }
 0x634   :  { %2614 = vmatmul.msk.f32.gmra.mxu1 %vm5323_vm4, %v2590_v23  ;;  %v566_v23 = vld [vmem:[%s5205_s6 + $0x20] sm:$0xff] }
 0x63a   :  { %2607 = vmatmul.msk.f32.gmra.mxu0 %vm5324_vm14, %v2591_v26 }
 0x63c   :  { %2615 = vmatmul.msk.f32.gmra.mxu1 %vm5325_vm5, %v2591_v26  ;;  %v2527_v26 = vld [vmem:[%s5205_s6 + $0x60] sm:$0xff] }
 0x642   :  { %2608 = vmatmul.msk.f32.gmra.mxu0 %vm5326_vm12, %v2592_v17 }
 0x644   :  { %2616 = vmatmul.msk.f32.gmra.mxu1 %vm5327_vm3, %v2592_v17 }
 0x64a   :  { %2609 = vmatmul.msk.f32.gmra.mxu0 %vm5328_vm13, %v2593_v30 }
 0x64c   :  { %2617 = vmatmul.msk.f32.gmra.mxu1 %vm5329_vm9, %v2593_v30 }
 0x652   :  { %2610 = vmatmul.msk.f32.gmra.mxu0 %vm5330_vm0, %v2594_v34 }
 0x654   :  { %2618 = vmatmul.msk.f32.gmra.mxu1 %vm5331_vm6, %v2594_v34 }
 0x663   :  { %v4642_v51 = vpop.f32.mrf.mxu0  ;;  %v4644_v39 = vpop.f32.mrf.mxu1 }
 0x697   :  { %v1768_v14 = vpop.f32.mrf.mxu0 }
 0x698   :  { %v1769_v42 = vadd.f32 %v1768_v14, %v1690_v50  ;;  %v2233_v14 = vld [vmem:[%s5207_s8 + $0x10] sm:$0xff] }
 0x699   :  { %v1809_v32 = vpop.f32.mrf.mxu1 }
 0x69a   :  { %v4652_v12 = vadd.f32 %v1769_v42, %v4154_v1  ;;  %v1810_v16 = vadd.f32 %v1809_v32, %v1690_v50  ;;  %v2600_v50 = vld [vmem:[%s5205_s6 + $0xa8] sm:$0xff]  ;;  %v2231_v32 = vld [vmem:[%s5207_s8] sm:$0xff] }
 0x69b   :  { %v2232_v42 = vld [vmem:[%s5207_s8 + $0x8] sm:$0xff] }
 0x69c   :  { %1886 = vrot.lane.b32.xlu1 %v4652_v12, %s2976_s19  ;;  %v4703_v55 = vadd.f32 %v1810_v16, %v4190_v40  ;;  %v2634_v40 = vld [vmem:[%s5203_s4 + $0xf8] sm:$0xff] }
 0x69f   :  { %v1771_v57 = vpop.f32.mrf.mxu0 }
 0x6a0   :  { %v1772_v29 = vadd.f32 %v1771_v57, %v1695_v33  ;;  %v2342_v57 = vld [vmem:[%s5209_s10] sm:$0xff]  ;;  %s2410_s10 = sshll.u32 %s5211_s12, 4  ;;  %s2411_s10 = int_to_ptr.hbm [resolvable:$true] %s2410_s10 }
 0x6a1   :  { %v1812_v19 = vpop.f32.mrf.mxu1 }
 0x6a2   :  { %v4662_v11 = vadd.f32 %v1772_v29, %v4159_v2  ;;  %v1813_v1 = vadd.f32 %v1812_v19, %v1695_v33  ;;  %v2599_v33 = vld [vmem:[%s5205_s6 + $0xa0] sm:$0xff] }
 0x6a4   :  { %v4665_v58 = vadd.f32 %v1813_v1, %v4162_v15  ;;  %1888 = vrot.lane.b32.xlu2 %v4662_v11, %s2976_s19 }
 0x6a6   :  { %1896 = vrot.lane.b32.xlu0 %v4665_v58, %s2976_s19 }
 0x6a7   :  { %v1774_v10 = vpop.f32.mrf.mxu0 }
 0x6a8   :  { %v1775_v53 = vadd.f32 %v1774_v10, %v1700_v22 }
 0x6a9   :  { %v1815_v2 = vpop.f32.mrf.mxu1 }
 0x6aa   :  { %v4677_v15 = vadd.f32 %v1775_v53, %v4169_v62  ;;  %v1816_v8 = vadd.f32 %v1815_v2, %v1700_v22 }
 0x6ac   :  { %v4680_v41 = vadd.f32 %v1816_v8, %v4172_v21 }
 0x6ae   :  { %1898 = vrot.lane.b32.xlu1 %v4680_v41, %s2976_s19  ;;  %1890 = vrot.lane.b32.xlu0 %v4677_v15, %s2976_s19 }
 0x6af   :  { %v1777_v45 = vpop.f32.mrf.mxu0 }
 0x6b0   :  { %v1778_v9 = vadd.f32 %v1777_v45, %v1705_v20 }
 0x6b1   :  { %v1818_v62 = vpop.f32.mrf.mxu1 }
 0x6b2   :  { %v4692_v21 = vadd.f32 %v1778_v9, %v4179_v59  ;;  %v1819_v63 = vadd.f32 %v1818_v62, %v1705_v20  ;;  %v2633_v59 = vld [vmem:[%s5203_s4 + $0xf0] sm:$0xff] }
 0x6b3   :  { %v2601_v20 = vld [vmem:[%s5205_s6 + $0xb0] sm:$0xff] }
 0x6b4   :  { %v4695_v25 = vadd.f32 %v1819_v63, %v4182_v3  ;;  %v2632_v3 = vld [vmem:[%s5203_s4 + $0xe8] sm:$0xff]  ;;  %s2408_s4 = sshll.u32 %s2978_s26, 4  ;;  %s2409_s4 = int_to_ptr.vmem [resolvable:$true] %s2408_s4 }
 0x6b6   :  { %1900 = vrot.lane.b32.xlu2 %v4695_v25, %s2976_s19  ;;  %1892 = vrot.lane.b32.xlu1 %v4692_v21, %s2976_s19 }
 0x6b7   :  { %1863 = vrot.lane.b32.xlu0 %v4680_v41, %s2977_s5 }
 0x6be   :  { %1894 = vrot.lane.b32.xlu2 %v4703_v55, %s2976_s19  ;;  %1853 = vrot.lane.b32.xlu1 %v4662_v11, %s2977_s5 }
 0x6bf   :  { %1857 = vrot.lane.b32.xlu0 %v4692_v21, %s2977_s5 }
 0x6c6   :  { %1865 = vrot.lane.b32.xlu1 %v4695_v25, %s2977_s5  ;;  %1855 = vrot.lane.b32.xlu2 %v4677_v15, %s2977_s5 }
 0x6c7   :  { %1851 = vrot.lane.b32.xlu0 %v4652_v12, %s2977_s5 }
 0x6ce   :  { %1859 = vrot.lane.b32.xlu1 %v4703_v55, %s2977_s5  ;;  %1861 = vrot.lane.b32.xlu2 %v4665_v58, %s2977_s5 }
 0x6cf   :  { %1969 = vperm.xlu0 %2714, %v2633_v59  }
 0x6d6   :  { %1964 = vperm.xlu1 %2715, %v2632_v3   ;;  %1974 = vperm.xlu2 %2716, %v2634_v40  }
 0x6d7   :  { %1954 = vperm.xlu0 %2714, %v2630_v24  }
 0x6de   :  { %1949 = vperm.xlu1 %2715, %v2629_v44   ;;  %1959 = vperm.xlu2 %2716, %v2631_v5  }
 0x6df   :  { %1939 = vperm.xlu0 %2714, %v2627_v0   ;;  %v2619_v0 = vld [vmem:[%s5202_s3 + $0xc0] sm:$0xff] }
 0x6e6   :  { %607 = vperm.xlu1 %2715, %v569_v43   ;;  %1944 = vperm.xlu2 %2716, %v2628_v27  }
 0x6e7   :  { %602 = vperm.xlu0 %2714, %v568_v38   ;;  %v2620_v38 = vld [vmem:[%s5202_s3 + $0xc8] sm:$0xff] }
 0x6ee   :  { %1161 = vperm.xlu1 %2715, %v2529_v56   ;;  %1166 = vperm.xlu2 %2716, %v2530_v4   ;;  %v2621_v56 = vld [vmem:[%s5202_s3 + $0xd0] sm:$0xff]  ;;  %v2624_v4 = vld [vmem:[%s5202_s3 + $0xe8] sm:$0xff] }
 0x6ef   :  { %597 = vperm.xlu0 %2714, %v567_v18   ;;  %v2625_v18 = vld [vmem:[%s5202_s3 + $0xf0] sm:$0xff] }
 0x6f6   :  { %1156 = vperm.xlu1 %2715, %v2528_v48   ;;  %1724 = vperm.xlu2 %2716, %v2602_v7   ;;  %v2626_v48 = vld [vmem:[%s5202_s3 + $0xf8] sm:$0xff] }
 0x6f7   :  { %2252 = vperm.xlu0 %2714, %v2234_v36  }
 0x6fe   :  { %592 = vperm.xlu1 %2715, %v566_v23   ;;  %1719 = vperm.xlu2 %2716, %v2601_v20   ;;  %v1889_v17 = vpop.permute.xlu2 %1888 }
 0x6ff   :  { %1714 = vperm.xlu0 %2714, %v2600_v50  }
 0x706   :  { %2247 = vperm.xlu1 %2715, %v2233_v14   ;;  %1151 = vperm.xlu2 %2716, %v2527_v26  }
 0x707   :  { %2242 = vperm.xlu0 %2714, %v2232_v42  }
 0x70e   :  { %2237 = vperm.xlu1 %2715, %v2231_v32   ;;  %1709 = vperm.xlu2 %2716, %v2599_v33   ;;  %v1887_v29 = vpop.permute.xlu1 %1886 }
 0x710   :  { %v1901_v1 = vpop.permute.xlu2 %1900 }
 0x716   :  { %2345 = vperm.xlu2 %2716, %v2342_v57  }
 0x718   :  { %v1897_v19 = vpop.permute.xlu0 %1896  ;;  %v1895_v30 = vpop.permute.xlu2 %1894 }
 0x719   :  { %v1904_v62 = vsel %vm1884_vm7, %v1889_v17, %v1897_v19  ;;  %v1908_v63 = vsel %vm1884_vm7, %v1897_v19, %v1889_v17  ;;  %v1903_v16 = vsel %vm1884_vm7, %v1887_v29, %v1895_v30  ;;  %v1907_v59 = vsel %vm1884_vm7, %v1895_v30, %v1887_v29 }
 0x720   :  { %v1899_v22 = vpop.permute.xlu1 %1898  ;;  %v1891_v10 = vpop.permute.xlu0 %1890 }
 0x721   :  { %v1905_v45 = vsel %vm1884_vm7, %v1891_v10, %v1899_v22  ;;  %v1909_v34 = vsel %vm1884_vm7, %v1899_v22, %v1891_v10  ;;  %v1856_v40 = vpop.permute.xlu2 %1855 }
 0x728   :  { %v1893_v53 = vpop.permute.xlu1 %1892 }
 0x729   :  { %v1906_v2 = vsel %vm1884_vm7, %v1893_v53, %v1901_v1  ;;  %v1910_v8 = vsel %vm1884_vm7, %v1901_v1, %v1893_v53  ;;  %v1864_v9 = vpop.permute.xlu0 %1863 }
 0x72a   :  { %2635 = vmatpush.msk.msrb.mxu2 %vm1884_vm7, %v1906_v2  ;;  %2643 = vmatpush.msk.msrb.mxu3 %vm1885_vm1, %v1910_v8 }
 0x72c   :  { %2636 = vmatpush.msk.msrb.mxu2 %vm1884_vm7, %v1905_v45  ;;  %2644 = vmatpush.msk.msrb.mxu3 %vm1885_vm1, %v1909_v34 }
 0x72e   :  { %2637 = vmatpush.msk.msrb.mxu2 %vm1884_vm7, %v1904_v62  ;;  %2645 = vmatpush.msk.msrb.mxu3 %vm1885_vm1, %v1908_v63 }
 0x730   :  { %2638 = vmatpush.msk.msrb.mxu2 %vm1884_vm7, %v1903_v16  ;;  %2646 = vmatpush.msk.msrb.mxu3 %vm1885_vm1, %v1907_v59  ;;  %v1854_v3 = vpop.permute.xlu1 %1853 }
 0x731   :  { %v1858_v24 = vpop.permute.xlu0 %1857 }
 0x732   :  { %1985 = vmatpush.msrb.mxu2 %v4692_v21  ;;  %2026 = vmatpush.msrb.mxu3 %v4695_v25 }
 0x734   :  { %1986 = vmatpush.msrb.mxu2 %v4677_v15  ;;  %2027 = vmatpush.msrb.mxu3 %v4680_v41 }
 0x736   :  { %1987 = vmatpush.msrb.mxu2 %v4662_v11  ;;  %2028 = vmatpush.msrb.mxu3 %v4665_v58  ;;  %v1870_v11 = vsel %vm1867_vm8, %v1856_v40, %v1864_v9  ;;  %v1862_v58 = vpop.permute.xlu2 %1861 }
 0x737   :  { %v1869_v25 = vsel %vm1867_vm8, %v1854_v3, %v1862_v58 }
 0x738   :  { %1988 = vmatpush.msrb.mxu2 %v4652_v12  ;;  %2029 = vmatpush.msrb.mxu3 %v4703_v55  ;;  %v1866_v21 = vpop.permute.xlu1 %1865  ;;  %v1874_v12 = vsel %vm1867_vm8, %v1864_v9, %v1856_v40  ;;  %v1873_v55 = vsel %vm1867_vm8, %v1862_v58, %v1854_v3 }
 0x739   :  { %v1871_v15 = vsel %vm1867_vm8, %v1858_v24, %v1866_v21  ;;  %v1875_v41 = vsel %vm1867_vm8, %v1866_v21, %v1858_v24  ;;  %v1852_v44 = vpop.permute.xlu0 %1851 }
 0x73a   :  { %2639 = vmatpush.msk.msrb.mxu2 %vm1849_vm15, %v1875_v41  ;;  %2647 = vmatpush.msk.msrb.mxu3 %vm1850_vm11, %v1871_v15 }
 0x73c   :  { %2640 = vmatpush.msk.msrb.mxu2 %vm1849_vm15, %v1874_v12  ;;  %2648 = vmatpush.msk.msrb.mxu3 %vm1850_vm11, %v1870_v11 }
 0x73e   :  { %2641 = vmatpush.msk.msrb.mxu2 %vm1849_vm15, %v1873_v55  ;;  %2649 = vmatpush.msk.msrb.mxu3 %vm1850_vm11, %v1869_v25  ;;  %v1975_v26 = vpop.permute.xlu2 %1974 }
 0x740   :  { %v1860_v5 = vpop.permute.xlu1 %1859 }
 0x741   :  { %v1868_v43 = vsel %vm1867_vm8, %v1852_v44, %v1860_v5  ;;  %v1872_v27 = vsel %vm1867_vm8, %v1860_v5, %v1852_v44  ;;  %v1970_v33 = vpop.permute.xlu0 %1969 }
 0x742   :  { %2642 = vmatpush.msk.msrb.mxu2 %vm1849_vm15, %v1872_v27  ;;  %2650 = vmatpush.msk.msrb.mxu3 %vm1850_vm11, %v1868_v43 }
 0x743   :  { %1993 = vmatmul.f32.vlgmr.msrb.gmra.mxu2 %v2619_v0  ;;  %2034 = vmatmul.f32.vlgmr.msrb.gmra.mxu3 %v2619_v0 }
 0x746   :  { %v1960_v57 = vpop.permute.xlu2 %1959 }
 0x748   :  { %v1965_v30 = vpop.permute.xlu1 %1964 }
 0x749   :  { %v4896_v1 = vpop.permute.xlu0 %1954 }
 0x74b   :  { %1996 = vmatmul.f32.gmra.mxu2 %v2620_v38  ;;  %2037 = vmatmul.f32.gmra.mxu3 %v2620_v38 }
 0x74e   :  { %v1945_v21 = vpop.permute.xlu2 %1944 }
 0x750   :  { %v1950_v0 = vpop.permute.xlu1 %1949 }
 0x751   :  { %v1940_v16 = vpop.permute.xlu0 %1939 }
 0x753   :  { %1999 = vmatmul.f32.gmra.mxu2 %v2621_v56  ;;  %2040 = vmatmul.f32.gmra.mxu3 %v2621_v56 }
 0x75b   :  { %2002 = vmatmul.f32.gmra.mxu2 %v2622_v49  ;;  %2043 = vmatmul.f32.gmra.mxu3 %v2622_v49 }
 0x763   :  { %2005 = vmatmul.f32.gmra.mxu2 %v2623_v52  ;;  %2046 = vmatmul.f32.gmra.mxu3 %v2623_v52 }
 0x76b   :  { %2008 = vmatmul.f32.gmra.mxu2 %v2624_v4  ;;  %2049 = vmatmul.f32.gmra.mxu3 %v2624_v4 }
 0x773   :  { %2011 = vmatmul.f32.gmra.mxu2 %v2625_v18  ;;  %2052 = vmatmul.f32.gmra.mxu3 %v2625_v18 }
 0x77b   :  { %2014 = vmatmul.f32.gmra.mxu2 %v2626_v48  ;;  %2055 = vmatmul.f32.gmra.mxu3 %v2626_v48 }
 0x7c6   :  { %v1994_v7 = vpop.f32.mrf.mxu2  ;;  %v2035_v36 = vpop.f32.mrf.mxu3 }
 0x7c7   :  { %v1995_v59 = vadd.f32 %v1994_v7, %v1940_v16  ;;  %v2036_v40 = vadd.f32 %v2035_v36, %v1940_v16 }
 0x7ce   :  { %v1997_v23 = vpop.f32.mrf.mxu2  ;;  %v2038_v20 = vpop.f32.mrf.mxu3 }
 0x7cf   :  { %v1998_v12 = vadd.f32 %v1997_v23, %v1945_v21  ;;  %v2039_v44 = vadd.f32 %v2038_v20, %v1945_v21 }
 0x7d6   :  { %v2000_v50 = vpop.f32.mrf.mxu2  ;;  %v4890_v14 = vpop.f32.mrf.mxu3 }
 0x7d7   :  { %v2001_v38 = vadd.f32 %v2000_v50, %v1950_v0 }
 0x7de   :  { %v4892_v42 = vpop.f32.mrf.mxu2  ;;  %v4894_v32 = vpop.f32.mrf.mxu3 }
 0x7e6   :  { %v2006_v17 = vpop.f32.mrf.mxu2  ;;  %v2047_v29 = vpop.f32.mrf.mxu3 }
 0x7e7   :  { %v2007_v19 = vadd.f32 %v2006_v17, %v1960_v57  ;;  %v2048_v10 = vadd.f32 %v2047_v29, %v1960_v57 }
 0x7e9   :  { %v2651_v22 = vmul.f32 -1.442695, %v2007_v19  ;;  %v2652_v53 = vmul.f32 -1.442695, %v2048_v10 }
 0x7eb   :  { %2861 = vpow2.f32 %v2651_v22  ;;  %v2042_v22 = vadd.f32 %v4890_v14, %v1950_v0 }
 0x7ec   :  { %2863 = vpow2.f32 %v2652_v53 }
 0x7ee   :  { %v2009_v2 = vpop.f32.mrf.mxu2  ;;  %v2050_v8 = vpop.f32.mrf.mxu3 }
 0x7ef   :  { %v2010_v45 = vadd.f32 %v2009_v2, %v1965_v30  ;;  %v2051_v34 = vadd.f32 %v2050_v8, %v1965_v30  ;;  %v2045_v2 = vadd.f32 %v4894_v32, %v4896_v1 }
 0x7f1   :  { %v2653_v9 = vmul.f32 -1.442695, %v2010_v45  ;;  %v2862_v62 = vpop.eup %2861  ;;  %v2654_v63 = vmul.f32 -1.442695, %v2051_v34 }
 0x7f2   :  { %v4898_v3 = vadd.f32 1.0, %v2862_v62  ;;  %v2864_v11 = vpop.eup %2863 }
 0x7f3   :  { %2865 = vpow2.f32 %v2653_v9  ;;  %v4901_v43 = vadd.f32 1.0, %v2864_v11 }
 0x7f4   :  { %2867 = vpow2.f32 %v2654_v63  ;;  %v2110_v62 = vand.u32 2147483648, %v4898_v3  ;;  %vm2104_vm10 = vweird.f32 %v4898_v3  ;;  %v2108_v21 = vand.u32 2147483647, %v4898_v3 }
 0x7f5   :  { %2869 = vtanh.f32 %v1995_v59 }
 0x7f6   :  { %v2012_v24 = vpop.f32.mrf.mxu2  ;;  %v2053_v41 = vpop.f32.mrf.mxu3  ;;  %2871 = vrcp.f32 %v4898_v3 }
 0x7f7   :  { %v2013_v15 = vadd.f32 %v2012_v24, %v1970_v33  ;;  %v2054_v58 = vadd.f32 %v2053_v41, %v1970_v33  ;;  %2873 = vtanh.f32 %v2036_v40 }
 0x7f9   :  { %v2655_v25 = vmul.f32 -1.442695, %v2013_v15  ;;  %v2866_v55 = vpop.eup %2865  ;;  %v2656_v5 = vmul.f32 -1.442695, %v2054_v58 }
 0x7fa   :  { %v2868_v27 = vpop.eup %2867  ;;  %v4903_v56 = vadd.f32 1.0, %v2866_v55 }
 0x7fb   :  { %2875 = vpow2.f32 %v2655_v25  ;;  %v4905_v49 = vpop.eup %2869  ;;  %v4907_v52 = vadd.f32 1.0, %v2868_v27 }
 0x7fc   :  { %2877 = vtanh.f32 %v1998_v12  ;;  %v4909_v18 = vpop.eup %2871  ;;  %v2140_v24 = vand.u32 2147483648, %v4903_v56  ;;  %vm2134_vm4 = vweird.f32 %v4903_v56 }
 0x7fd   :  { %2879 = vpow2.f32 %v2656_v5  ;;  %v4912_v36 = vpop.eup %2873  ;;  %v2100_v57 = vmul.f32 %v4909_v18, %v4898_v3  ;;  %v4968_v5 = vor.u32 1.1754944e-38, %v2110_v62  ;;  %vm2105_vm2 = vweird.f32 %v4909_v18 }
 0x7fe   :  { %2881 = vtanh.f32 %v2039_v44  ;;  %v2015_v4 = vpop.f32.mrf.mxu2  ;;  %v2056_v7 = vpop.f32.mrf.mxu3  ;;  %vm4993_vm5 = vmor %vm2104_vm10, %vm2105_vm2  ;;  %vm5040_vm2 = vcmp.eq.f32.partialorder %v2108_v21, 8.507059e+37 }
 0x7ff   :  { %2883 = vrcp.f32 %v4901_v43  ;;  %v2016_v48 = vadd.f32 %v2015_v4, %v1975_v26  ;;  %v2057_v23 = vadd.f32 %v2056_v7, %v1975_v26  ;;  %v2004_v26 = vadd.f32 %v4892_v42, %v4896_v1 }
 0x800   :  { %2885 = vtanh.f32 %v2001_v38  ;;  %v2101_v14 = vsub.f32 1.0, %v2100_v57  ;;  %v4984_v57 = vor.u32 1.1754944e-38, %v2140_v24 }
 0x801   :  { %v2876_v20 = vpop.eup %2875  ;;  %2887 = vrcp.f32 %v4903_v56  ;;  %v2657_v50 = vmul.f32 -1.442695, %v2016_v48  ;;  %v2658_v29 = vmul.f32 -1.442695, %v2057_v23 }
 0x802   :  { %v4915_v33 = vpop.eup %2877  ;;  %2889 = vrcp.f32 %v4907_v52  ;;  %v4920_v17 = vadd.f32 1.0, %v2876_v20  ;;  %v2102_v16 = vmul.f32 %v4909_v18, %v2101_v14  ;;  %v1780_v14 = vpop.f32.mrf.mxu0 }
 0x803   :  { %v2880_v19 = vpop.eup %2879  ;;  %2891 = vpow2.f32 %v2657_v50  ;;  %v2138_v50 = vand.u32 2147483647, %v4903_v56 }
 0x804   :  { %v4923_v10 = vpop.eup %2881  ;;  %2893 = vrcp.f32 %v4920_v17  ;;  %v4928_v30 = vadd.f32 1.0, %v2880_v19  ;;  %v4975_v4 = vadd.f32 %v4909_v18, %v2102_v16  ;;  %v2168_v7 = vand.u32 2147483647, %v4920_v17 }
 0x805   :  { %v4930_v53 = vpop.eup %2883  ;;  %2895 = vpow2.f32 %v2658_v29  ;;  %v2170_v23 = vand.u32 2147483648, %v4920_v17  ;;  %vm2164_vm12 = vweird.f32 %v4920_v17  ;;  %vm5022_vm7 = vcmp.eq.f32.partialorder %v2138_v50, 8.507059e+37  ;;  %v603_v50 = vpop.permute.xlu0 %602 }
 0x806   :  { %v4934_v8 = vpop.eup %2885  ;;  %2897 = vrcp.f32 %v4928_v30  ;;  %v2115_v42 = vmul.f32 %v4930_v53, %v4901_v43  ;;  %vm2179_vm3 = vweird.f32 %v4928_v30  ;;  %vm5006_vm9 = vcmp.eq.f32.partialorder %v2168_v7, 8.507059e+37 }
 0x807   :  { %v4937_v45 = vpop.eup %2887  ;;  %2899 = vtanh.f32 %v2042_v22  ;;  %v2171_v16 = vor.u32 1.1754944e-38, %v2170_v23 }
 0x808   :  { %v4939_v34 = vpop.eup %2889  ;;  %2901 = vtanh.f32 %v2004_v26  ;;  %v2130_v1 = vmul.f32 %v4937_v45, %v4903_v56  ;;  %v2116_v58 = vsub.f32 1.0, %v2115_v42  ;;  %vm2135_vm14 = vweird.f32 %v4937_v45 }
 0x809   :  { %v2892_v9 = vpop.eup %2891  ;;  %2903 = vtanh.f32 %v2045_v2  ;;  %v2145_v11 = vmul.f32 %v4939_v34, %v4907_v52  ;;  %v2153_v26 = vand.u32 2147483647, %v4907_v52  ;;  %v2155_v2 = vand.u32 2147483648, %v4907_v52  ;;  %vm5036_vm10 = vmor %vm2134_vm4, %vm2135_vm14 }
 0x80a   :  { %v4944_v32 = vpop.eup %2893  ;;  %v4948_v63 = vadd.f32 1.0, %v2892_v9  ;;  %v2131_v38 = vsub.f32 1.0, %v2130_v1  ;;  %v2117_v19 = vmul.f32 %v4930_v53, %v2116_v58  ;;  %vm2150_vm6 = vweird.f32 %v4939_v34 }
 0x80b   :  { %v2896_v59 = vpop.eup %2895  ;;  %v2160_v40 = vmul.f32 %v4944_v32, %v4920_v17  ;;  %v2146_v29 = vsub.f32 1.0, %v2145_v11  ;;  %v2185_v11 = vand.u32 2147483648, %v4928_v30  ;;  %vm2165_vm1 = vweird.f32 %v4944_v32 }
 0x80c   :  { %v4957_v41 = vpop.eup %2897  ;;  %2905 = vrcp.f32 %v4948_v63  ;;  %v4962_v12 = vadd.f32 1.0, %v2896_v59  ;;  %v2132_v9 = vmul.f32 %v4937_v45, %v2131_v38  ;;  %vm2194_vm15 = vweird.f32 %v4948_v63  ;;  %vm5051_vm0 = vmor %vm2164_vm12, %vm2165_vm1 }
 0x80d   :  { %v4964_v25 = vpop.eup %2899  ;;  %v2175_v55 = vmul.f32 %v4957_v41, %v4928_v30  ;;  %v2161_v44 = vsub.f32 1.0, %v2160_v40  ;;  %v2183_v40 = vand.u32 2147483647, %v4928_v30  ;;  %v2147_v58 = vmul.f32 %v4939_v34, %v2146_v29 }
 0x80e   :  { %v4971_v27 = vpop.eup %2901  ;;  %2907 = vrcp.f32 %v4962_v12  ;;  %v2200_v29 = vand.u32 2147483648, %v4948_v63  ;;  %vm2180_vm11 = vweird.f32 %v4957_v41  ;;  %v2156_v1 = vor.u32 1.1754944e-38, %v2155_v2 }
 0x80f   :  { %v4978_v48 = vpop.eup %2903  ;;  %v2176_v20 = vsub.f32 1.0, %v2175_v55  ;;  %v2162_v22 = vmul.f32 %v4944_v32, %v2161_v44  ;;  %v5017_v55 = vadd.f32 %v4930_v53, %v2117_v19  ;;  %v2133_v19 = vadd.f32 %v4937_v45, %v2132_v9  ;;  %vm5063_vm14 = vmor %vm2179_vm3, %vm2180_vm11 }
 0x810   :  { %v2213_v9 = vand.u32 2147483647, %v4962_v12  ;;  %v2201_v17 = vor.u32 1.1754944e-38, %v2200_v29  ;;  %vm5067_vm13 = vcmp.eq.f32.partialorder %v2183_v40, 8.507059e+37  ;;  %vm5348_vm3 = vweird.f32 %v4907_v52 }
 0x811   :  { %v2177_v59 = vmul.f32 %v4957_v41, %v2176_v20  ;;  %v2163_v7 = vadd.f32 %v4944_v32, %v2162_v22  ;;  %v2198_v20 = vand.u32 2147483647, %v4948_v63  ;;  %v5353_v2 = vsel %vm4993_vm5, %v4909_v18, %v4975_v4 }
 0x812   :  { %v2906_v42 = vpop.eup %2905  ;;  %vm5356_vm5 = vcmask 261120  }
 0x813   :  { %v2190_v3 = vmul.f32 %v2906_v42, %v4948_v63  ;;  %vm2195_vm8 = vweird.f32 %v2906_v42  ;;  %v2178_v22 = vadd.f32 %v4957_v41, %v2177_v59  ;;  %v2148_v59 = vadd.f32 %v4939_v34, %v2147_v58 }
 0x814   :  { %v2908_v24 = vpop.eup %2907  ;;  %v2167_v63 = vsel %vm5051_vm0, %v4944_v32, %v2163_v7  ;;  %vm2196_vm12 = vmor %vm2194_vm15, %vm2195_vm8  ;;  %vm2199_vm1 = vcmp.eq.f32.partialorder %v2198_v20, 8.507059e+37  ;;  %vm2209_vm0 = vweird.f32 %v4962_v12  ;;  %vm2214_vm8 = vcmp.eq.f32.partialorder %v2213_v9, 8.507059e+37 }
 0x815   :  { %v2191_v44 = vsub.f32 1.0, %v2190_v3  ;;  %v2205_v38 = vmul.f32 %v2908_v24, %v4962_v12  ;;  %vm2210_vm4 = vweird.f32 %v2908_v24  ;;  %v2182_v30 = vsel %vm5063_vm14, %v4957_v41, %v2178_v22  ;;  %vm5082_vm15 = vmor %vm5348_vm3, %vm2150_vm6 }
 0x816   :  { %vm2211_vm11 = vmor %vm2209_vm0, %vm2210_vm4  ;;  %v2152_v41 = vsel %vm5082_vm15, %v4939_v34, %v2148_v59  ;;  %vm5352_vm6 = vweird.f32 %v4901_v43 }
 0x817   :  { %v2206_v3 = vsub.f32 1.0, %v2205_v38  ;;  %v2192_v15 = vmul.f32 %v2906_v42, %v2191_v44  ;;  %v2215_v44 = vand.u32 2147483648, %v4962_v12 }
 0x819   :  { %v2193_v21 = vadd.f32 %v2906_v42, %v2192_v15  ;;  %v2207_v38 = vmul.f32 %v2908_v24, %v2206_v3  ;;  %v2137_v15 = vsel %vm5036_vm10, %v4937_v45, %v2133_v19  ;;  %v2216_v29 = vor.u32 1.1754944e-38, %v2215_v44  ;;  %v1783_v44 = vpop.f32.mrf.mxu0 }
 0x81a   :  { %v2172_v45 = vsel %vm5006_vm9, %v2171_v16, %v2167_v63  ;;  %v2142_v22 = vsel %vm5022_vm7, %v4984_v57, %v2137_v15  ;;  %vm5351_vm9 = vweird.f32 %v4930_v53 }
 0x81b   :  { %v2197_v32 = vsel %vm2196_vm12, %v2906_v42, %v2193_v21  ;;  %v2208_v7 = vadd.f32 %v2908_v24, %v2207_v38  ;;  %v2186_v42 = vor.u32 1.1754944e-38, %v2185_v11  ;;  %vm2121_vm10 = vmor %vm5352_vm6, %vm5351_vm9  ;;  %v2223_v34 = vmul.f32 %v4934_v8, %v2172_v45  ;;  %v598_v21 = vpop.permute.xlu0 %597 }
 0x81c   :  { %v2202_v20 = vsel %vm2199_vm1, %v2201_v17, %v2197_v32  ;;  %v2122_v16 = vsel %vm2121_vm10, %v4930_v53, %v5017_v55  ;;  %v2221_v8 = vmul.f32 %v4915_v33, %v2142_v22  ;;  %v5355_v53 = vand.u32 2147483647, %v4901_v43  ;;  %v5146_v33 = vpop.permute.xlu1 %607  ;;  %v1821_v55 = vpop.f32.mrf.mxu1 }
 0x81d   :  { %v2225_v12 = vmul.f32 %v4971_v27, %v2202_v20  ;;  %v2212_v19 = vsel %vm2211_vm11, %v2908_v24, %v2208_v7  ;;  %v2187_v3 = vsel %vm5067_vm13, %v2186_v42, %v2182_v30  ;;  %vm2154_vm13 = vcmp.eq.f32.partialorder %v2153_v26, 8.507059e+37 }
 0x81e   :  { %v2217_v62 = vsel %vm2214_vm8, %v2216_v29, %v2212_v19  ;;  %v2157_v57 = vsel %vm2154_vm13, %v2156_v1, %v2152_v41  ;;  %v2112_v24 = vsel %vm5040_vm2, %v4968_v5, %v5353_v2  ;;  %v2224_v52 = vmul.f32 %v4964_v25, %v2187_v3  ;;  %v2227_v5 = vld [vmem:[%s5206_s7] sm:$0xff]  ;;  %vm5357_vm2 = vmmov %vm5356_vm5 }
 0x81f   :  { %2279 = vmatpush.msrb.mxu0 %v2225_v12  ;;  %v2226_v27 = vmul.f32 %v4978_v48, %v2217_v62  ;;  %v5354_v48 = vand.u32 2147483648, %v4901_v43  ;;  %vm2124_vm7 = vcmp.eq.f32.partialorder %v5355_v53, 8.507059e+37  ;;  %v2222_v18 = vmul.f32 %v4923_v10, %v2157_v57  ;;  %v2228_v43 = vld [vmem:[%s5206_s7 + $0x8] sm:$0xff]  ;;  %vm5358_vm4 = vmmov %vm5357_vm2  ;;  %v5148_v10 = vpop.permute.xlu2 %1166 }
 0x820   :  { %v2219_v0 = vmul.f32 %v4905_v49, %v2112_v24  ;;  %vm5359_vm14 = vmmov %vm5357_vm2  ;;  %v2229_v49 = vld [vmem:[%s5206_s7 + $0x10] sm:$0xff] }
 0x821   :  { %v2126_v11 = vor.u32 1.1754944e-38, %v5354_v48  ;;  %2308 = vmatpush.msrb.mxu1 %v2226_v27  ;;  %2280 = vmatpush.msrb.mxu0 %v2223_v34  ;;  %vm5360_vm12 = vmmov %vm5357_vm2  ;;  %v1786_v63 = vpop.f32.mrf.mxu0 }
 0x822   :  { %vm5361_vm1 = vmmov %vm5357_vm2 }
 0x823   :  { %v2127_v26 = vsel %vm2124_vm7, %v2126_v11, %v2122_v16  ;;  %2309 = vmatpush.msrb.mxu1 %v2224_v52  ;;  %2281 = vmatpush.msrb.mxu0 %v2221_v8  ;;  %vm5362_vm0 = vmmov %vm5361_vm1  ;;  %v5152_v15 = vpop.permute.xlu0 %2252  ;;  %v709_v11 = vadd.f32 %v4143_v28, %v598_v21 }
 0x824   :  { %v2220_v25 = vmul.f32 %v4912_v36, %v2127_v26  ;;  %v2230_v36 = vld [vmem:[%s5206_s7 + $0x18] sm:$0xff]  ;;  %vm5363_vm3 = vmmov %vm5362_vm0  ;;  %v1162_v4 = vpop.permute.xlu1 %1161  ;;  %v1824_v56 = vpop.f32.mrf.mxu1 }
 0x825   :  { %2310 = vmatpush.msrb.mxu1 %v2222_v18  ;;  %2282 = vmatpush.msrb.mxu0 %v2219_v0  ;;  %vm5367_vm15 = vmmov %vm5362_vm0 }
 0x826   :  { %2659 = vmatmul.msk.f32.vlgmr.msrb.gmra.mxu0 %vm5356_vm5, %v2227_v5  ;;  %vm5368_vm11 = vmmov %vm5362_vm0 }
 0x827   :  { %2311 = vmatpush.msrb.mxu1 %v2220_v25  ;;  %v5150_v23 = vpop.permute.xlu2 %1724 }
 0x828   :  { %2663 = vmatmul.msk.f32.vlgmr.msrb.gmra.mxu1 %vm5357_vm2, %v2227_v5 }
 0x829   :  { %v5154_v7 = vpop.f32.mrf.mxu0 }
 0x82b   :  { %v1715_v19 = vpop.permute.xlu0 %1714 }
 0x82c   :  { %v1157_v9 = vpop.permute.xlu1 %1156  ;;  %v1827_v17 = vpop.f32.mrf.mxu1  ;;  %v1784_v24 = vadd.f32 %v1783_v44, %v1715_v19  ;;  %v1825_v8 = vadd.f32 %v1824_v56, %v1715_v19 }
 0x82e   :  { %2660 = vmatmul.msk.f32.gmra.mxu0 %vm5358_vm4, %v2228_v43 }
 0x82f   :  { %v1720_v59 = vpop.permute.xlu2 %1719 }
 0x830   :  { %2664 = vmatmul.msk.f32.gmra.mxu1 %vm5359_vm14, %v2228_v43  ;;  %v1787_v44 = vadd.f32 %v1786_v63, %v1720_v59  ;;  %v1273_v63 = vadd.f32 %v4644_v39, %v5148_v10 }
 0x833   :  { %v2243_v53 = vpop.permute.xlu0 %2242 }
 0x834   :  { %v593_v38 = vpop.permute.xlu1 %592  ;;  %v5157_v40 = vpop.f32.mrf.mxu1 }
 0x835   :  { %v665_v30 = vadd.f32 %v4137_v6, %v593_v38  ;;  %v706_v29 = vadd.f32 %v4139_v31, %v593_v38  ;;  %v1226_v6 = vadd.f32 %v4634_v47, %v1157_v9  ;;  %v668_v31 = vadd.f32 %v4141_v37, %v598_v21  ;;  %v5365_v38 = vld [vmem:[#allocation12_spill] sm:$0xff] }
 0x836   :  { %2661 = vmatmul.msk.f32.gmra.mxu0 %vm5360_vm12, %v2229_v49  ;;  %v1229_v47 = vadd.f32 %v4638_v35, %v1162_v4  ;;  %v671_v37 = vadd.f32 %v4145_v13, %v603_v50  ;;  %v1828_v21 = vadd.f32 %v1827_v17, %v1720_v59  ;;  %v1790_v17 = vadd.f32 %v5154_v7, %v5150_v23 }
 0x837   :  { %v1152_v58 = vpop.permute.xlu2 %1151  ;;  %v1285_v52 = vadd.f32 %v1226_v6, %v668_v31 }
 0x838   :  { %2665 = vmatmul.msk.f32.gmra.mxu1 %vm5361_vm1, %v2229_v49  ;;  %v1223_v20 = vadd.f32 %v4630_v54, %v1152_v58  ;;  %v1264_v42 = vadd.f32 %v4632_v61, %v1152_v58  ;;  %v1267_v61 = vadd.f32 %v4636_v46, %v1157_v9  ;;  %v1270_v46 = vadd.f32 %v4640_v60, %v1162_v4 }
 0x839   :  { %v1843_v0 = vadd.f32 %v1784_v24, %v1285_v52  ;;  %v674_v58 = vadd.f32 %v5365_v38, %v5146_v33  ;;  %v1232_v60 = vadd.f32 %v4642_v51, %v5148_v10  ;;  %v1831_v51 = vadd.f32 %v5157_v40, %v5150_v23  ;;  %v2341_v23 = vld [vmem:[%s5208_s9] sm:$0xff]  ;;  %s2981_s9 = smov [#allocation2]  }
 0x83a   :  { %v1283_v12 = vadd.f32 %v1223_v20, %v665_v30  ;;  %v1284_v62 = vadd.f32 %v1264_v42, %v706_v29  ;;  %v1286_v18 = vadd.f32 %v1267_v61, %v709_v11  ;;  %v5366_v20 = vld [vmem:[#allocation13_spill] sm:$0xff]  ;;  %s2398_s29 = sshll.u32 %s2981_s9, 4  ;;  %s2399_s29 = int_to_ptr.vmem [resolvable:$true] %s2398_s29 }
 0x83c   :  { %v2248_v32 = vpop.permute.xlu1 %2247  ;;  %v1844_v43 = vadd.f32 %v1825_v8, %v1286_v18 }
 0x83e   :  { %2662 = vmatmul.msk.f32.gmra.mxu0 %vm5362_vm0, %v2230_v36 }
 0x83f   :  { %v1710_v45 = vpop.permute.xlu2 %1709 }
 0x840   :  { %2666 = vmatmul.msk.f32.gmra.mxu1 %vm5363_vm3, %v2230_v36  ;;  %v1781_v41 = vadd.f32 %v1780_v14, %v1710_v45  ;;  %v1822_v1 = vadd.f32 %v1821_v55, %v1710_v45  ;;  %v5364_v14 = vld [vmem:[#allocation11_spill] sm:$0xff]  ;;  %v1287_v55 = vadd.f32 %v1229_v47, %v671_v37 }
 0x841   :  { %v712_v28 = vadd.f32 %v5364_v14, %v603_v50  ;;  %v715_v50 = vadd.f32 %v5366_v20, %v5146_v33 }
 0x842   :  { %v1841_v27 = vadd.f32 %v1781_v41, %v1283_v12  ;;  %v1842_v54 = vadd.f32 %v1822_v1, %v1284_v62  ;;  %v1845_v13 = vadd.f32 %v1787_v44, %v1287_v55  ;;  %v1289_v12 = vadd.f32 %v1232_v60, %v674_v58 }
 0x843   :  { %v1288_v56 = vadd.f32 %v1270_v46, %v712_v28  ;;  %v1290_v19 = vadd.f32 %v1273_v63, %v715_v50 }
 0x844   :  { %v2238_v3 = vpop.permute.xlu1 %2237  ;;  %v1847_v62 = vadd.f32 %v1790_v17, %v1289_v12 }
 0x845   :  { %v1846_v45 = vadd.f32 %v1828_v21, %v1288_v56 }
 0x8a3   :  { %v2284_v22 = vpop.f32.mrf.mxu0 }
 0x8a4   :  { %v2285_v34 = vadd.f32 %v2284_v22, %v2238_v3  ;;  %v1848_v22 = vadd.f32 %v1831_v51, %v1290_v19 }
 0x8a5   :  { %v2313_v16 = vpop.f32.mrf.mxu1 }
 0x8a6   :  { %v5163_v57 = vadd.f32 %v2285_v34, %v1841_v27  ;;  %v2314_v2 = vadd.f32 %v2313_v16, %v2238_v3 }
 0x8a8   :  { %2333 = vst [vmem:[#allocation4] sm:$0xff] %v5163_v57  ;;  %v2326_v48 = vadd.f32 %v2314_v2, %v1842_v54 }
 0x8aa   :  { %2334 = vst [vmem:[#allocation4 + $0x8] sm:$0xff] %v2326_v48 }
 0x8ab   :  { %v2287_v26 = vpop.f32.mrf.mxu0 }
 0x8ac   :  { %v2288_v5 = vadd.f32 %v2287_v26, %v2243_v53 }
 0x8ad   :  { %v2316_v25 = vpop.f32.mrf.mxu1 }
 0x8ae   :  { %v2327_v49 = vadd.f32 %v2288_v5, %v1843_v0  ;;  %v2317_v36 = vadd.f32 %v2316_v25, %v2243_v53 }
 0x8b0   :  { %2335 = vst [vmem:[#allocation4 + $0x10] sm:$0xff] %v2327_v49  ;;  %v2328_v9 = vadd.f32 %v2317_v36, %v1844_v43 }
 0x8b2   :  { %2336 = vst [vmem:[#allocation4 + $0x18] sm:$0xff] %v2328_v9 }
 0x8b3   :  { %v2290_v35 = vpop.f32.mrf.mxu0 }
 0x8b4   :  { %v2291_v30 = vadd.f32 %v2290_v35, %v2248_v32 }
 0x8b5   :  { %v2319_v4 = vpop.f32.mrf.mxu1 }
 0x8b6   :  { %v2329_v29 = vadd.f32 %v2291_v30, %v1845_v13  ;;  %v2320_v42 = vadd.f32 %v2319_v4, %v2248_v32 }
 0x8b8   :  { %2337 = vst [vmem:[#allocation4 + $0x20] sm:$0xff] %v2329_v29  ;;  %v2330_v59 = vadd.f32 %v2320_v42, %v1846_v45 }
 0x8ba   :  { %2338 = vst [vmem:[#allocation4 + $0x28] sm:$0xff] %v2330_v59 }
 0x8bb   :  { %v2293_v41 = vpop.f32.mrf.mxu0 }
 0x8bc   :  { %v2294_v33 = vadd.f32 %v2293_v41, %v5152_v15 }
 0x8bd   :  { %v2322_v3 = vpop.f32.mrf.mxu1 }
 0x8be   :  { %v2331_v32 = vadd.f32 %v2294_v33, %v1847_v62  ;;  %v2323_v39 = vadd.f32 %v2322_v3, %v5152_v15  ;;  %v2346_v15 = vpop.permute.xlu2 %2345 }
 0x8c0   :  { %2339 = vst [vmem:[#allocation4 + $0x30] sm:$0xff] %v2331_v32  ;;  %v2332_v10 = vadd.f32 %v2323_v39, %v1848_v22  ;;  %2363 = vmatpush.msra.mxu0 %v2331_v32 }
 0x8c2   :  { %2340 = vst [vmem:[#allocation4 + $0x38] sm:$0xff] %v2332_v10  ;;  %2383 = vmatpush.msra.mxu1 %v2332_v10  ;;  %2364 = vmatpush.msra.mxu0 %v2329_v29 }
 0x8c3   :  { %2416 = dma.vmem_to_hbm [thread:$0]  %s2409_s4, 1024, %s2411_s10, [#allocation5], %s2979_s27, %s2979_s27, %s2980_s28  }
 0x8c4   :  { %2384 = vmatpush.msra.mxu1 %v2330_v59  ;;  %2365 = vmatpush.msra.mxu0 %v2327_v49 }
 0x8c6   :  { %2385 = vmatpush.msra.mxu1 %v2328_v9  ;;  %2366 = vmatpush.msra.mxu0 %v5163_v57 }
 0x8c7   :  { %2667 = vmatmul.msk.f32.vlgmr.msra.gmra.mxu0 %vm5367_vm15, %v2341_v23 }
 0x8c8   :  { %2386 = vmatpush.msra.mxu1 %v2326_v48 }
 0x8c9   :  { %2668 = vmatmul.msk.f32.vlgmr.msra.gmra.mxu1 %vm5368_vm11, %v2341_v23 }
 0x944   :  { %v2368_v7 = vpop.f32.mrf.mxu0 }
 0x945   :  { %v2369_v40 = vadd.f32 %v2368_v7, %v2346_v15 }
 0x946   :  { %v2388_v1 = vpop.f32.mrf.mxu1 }
 0x947   :  { %2391 = vst [vmem:[#allocation2] sm:$0xff] %v2369_v40  ;;  %v2389_v27 = vadd.f32 %v2388_v1, %v2346_v15 }
 0x949   :  { %2392 = vst [vmem:[#allocation2 + $0x8] sm:$0xff] %v2389_v27 }
 0x94a   :  { %2403 = dma.vmem_to_hbm [thread:$0]  %s2399_s29, 256, %s2401_s14, [#allocation3]  }
 0x94b   :  { %2965 = dma.done.wait [#allocation3], 256  }
 0x94c   :  { %2966 = vsyncadd [#allocation3], 4294967040 }
 0x94d   :  { %2967 = dma.done.wait [#allocation5], 1024  }
 0x94e   :  { %2968 = vsyncadd [#allocation5], 4294966272 }
 0x94f   :  { %2425 = vsyncpa [#allocation3], 1 }
 0x950   :  { %2426 = vsyncpa [#allocation5], 1 }

</bundles_post_ra>
